<compile_context>
chip_gen: v6e
topology: v6e:2x2x1
jax: 0.10.0
libtpu: 0.0.40
codegen_flags: <defaults>
</compile_context>

<pallas_src>
import functools

import jax
import jax.numpy as jnp
from jax.experimental import pallas as pl
from jax.experimental.pallas import tpu as pltpu


def fused_bilstm_kernel(*refs, num_layers, seq_len, batch, hidden):
    T, B, H = seq_len, batch, hidden

    x_ref = refs[0]
    layer_refs = [refs[1 + 3 * l: 1 + 3 * (l + 1)] for l in range(num_layers)]
    fc_w_ref = refs[1 + 3 * num_layers]
    fc_b_ref = refs[2 + 3 * num_layers]
    out_ref = refs[3 + 3 * num_layers]
    pg_ref = refs[4 + 3 * num_layers]          # (T*B, 8H) pre-gates for current layer
    acts = refs[5 + 3 * num_layers:]           # min(num_layers-1, 2) ping-pong buffers

    def sigmoid(z):
        # tanh-based sigmoid: transcendental goes to the EUP slot, no VPU divide.
        return 0.5 * jnp.tanh(0.5 * z) + 0.5

    def cell(gates, c):
        # gates: (B, 4H) f32, columns reordered to [i | f | o | g]; c: (B, H) f32.
        sg = sigmoid(gates[:, :3 * H])          # one wide sigmoid: [i f o]
        g = jnp.tanh(gates[:, 3 * H:])          # one tanh: [g]
        c_new = sg[:, H:2 * H] * c + sg[:, :H] * g
        return sg[:, 2 * H:3 * H] * jnp.tanh(c_new), c_new

    h_f = h_b = None
    for l in range(num_layers):
        w_ih_ref, b_ref, w_hh_ref = layer_refs[l]
        last_layer = l == num_layers - 1

        if l == 0:
            x_in = x_ref[...]                                   # (T*B, D) bf16
        else:
            x_in = acts[(l - 1) % len(acts)][...].astype(jnp.bfloat16)  # (T*B, 2H)

        # Hoisted input projection: one MXU matmul for all T timesteps and both
        # directions, bias folded in.  Column layout: [fwd: i f o g | bwd: i f o g].
        pg_ref[...] = (
            jnp.dot(x_in, w_ih_ref[...], preferred_element_type=jnp.float32)
            + b_ref[...]
        )

        w_hh = w_hh_ref[...]   # bf16, (2H, 8H) block-diag, or (H, 4H) for last layer

        if not last_layer:
            act_out = acts[l % len(acts)]
            h = jnp.zeros((B, 2 * H), jnp.float32)    # [h_f | h_b]
            c_f = jnp.zeros((B, H), jnp.float32)
            c_b = jnp.zeros((B, H), jnp.float32)

            # T is small and static: unrolled python loop gives static slice offsets
            # and full scheduler visibility (carried state is tiny).
            for s in range(T):
                rf = s * B            # fwd processes timestep s
                rb = (T - 1 - s) * B  # bwd processes timestep T-1-s

                # ONE merged recurrent matmul on the critical path: [h_f|h_b] @ W_hh.
                mm = jnp.dot(h.astype(jnp.bfloat16), w_hh,
                             preferred_element_type=jnp.float32)     # (B, 8H)
                g_f = pg_ref[rf:rf + B, :4 * H] + mm[:, :4 * H]
                g_b = pg_ref[rb:rb + B, 4 * H:] + mm[:, 4 * H:]

                h_f, c_f = cell(g_f, c_f)
                h_b, c_b = cell(g_b, c_b)
                h = jnp.concatenate([h_f, h_b], axis=-1)

                # Layer output sequence stays VMEM-resident; fwd -> [:H], bwd -> [H:].
                act_out[rf:rf + B, :H] = h_f
                act_out[rb:rb + B, H:] = h_b
        else:
            # Last layer: only out[:, -1, :] is consumed.  Run the forward recurrence
            # only; h_b(T-1) is the first backward step (h0 = c0 = 0 -> its recurrent
            # matmul term is exactly zero), computed once below.  No activation stores.
            h_f = jnp.zeros((B, H), jnp.float32)
            c_f = jnp.zeros((B, H), jnp.float32)
            for s in range(T):
                rf = s * B
                g_f = pg_ref[rf:rf + B, :4 * H] + jnp.dot(
                    h_f.astype(jnp.bfloat16), w_hh,
                    preferred_element_type=jnp.float32)
                h_f, c_f = cell(g_f, c_f)
            h_b, _ = cell(pg_ref[(T - 1) * B:T * B, 4 * H:],
                          jnp.zeros((B, H), jnp.float32))

    # out[:, -1, :] = [h_f(T-1) | h_b(T-1)], then the FC head, fused in the kernel.
    last = jnp.concatenate([h_f, h_b], axis=-1)                 # (B, 2H) f32
    out_ref[...] = (
        jnp.dot(last.astype(jnp.bfloat16), fc_w_ref[...],
                preferred_element_type=jnp.float32)
        + fc_b_ref[...]
    ).astype(out_ref.dtype)


def lstm_model_forward(x, params):
    """x: (batch, input_size, seq_len), exactly like the PyTorch module input."""
    B, D, T = x.shape
    layers = params["layers"]
    L = len(layers)
    H = layers[0]["w_ih"].shape[1] // 8
    num_classes = params["fc_w"].shape[1]

    # permute(0,2,1) -> (B,T,D); time-major (T,B,D); flatten time into sublanes.
    x2d = jnp.transpose(x, (2, 0, 1)).astype(jnp.bfloat16).reshape(T * B, D)

    inputs = [x2d]
    for layer in layers:
        inputs += [layer["w_ih"], layer["bias"], layer["w_hh"]]
    inputs += [params["fc_w"], params["fc_b"]]

    kernel = functools.partial(
        fused_bilstm_kernel, num_layers=L, seq_len=T, batch=B, hidden=H)

    n_act = min(L - 1, 2)   # only non-last layers write an output sequence
    vmem_spec = pl.BlockSpec(memory_space=pltpu.MemorySpace.VMEM)
    return pl.pallas_call(
        kernel,
        out_shape=jax.ShapeDtypeStruct((B, num_classes), jnp.float32),
        in_specs=[vmem_spec] * len(inputs),
        out_specs=vmem_spec,
        scratch_shapes=(
            [pltpu.VMEM((T * B, 8 * H), jnp.float32)]            # pre-gates
            + [pltpu.VMEM((T * B, 2 * H), jnp.float32)] * n_act  # layer activations
        ),
    )(*inputs)


# --------------------------- parameters ------------------------------------------
def init_raw_params(key, input_size, hidden_size, num_layers, num_classes=5):
    """PyTorch-convention raw f32 parameters (gate row order i, f, g, o)."""
    H = hidden_size
    k = 1.0 / float(H ** 0.5)

    def u(kk, shape, bound):
        return jax.random.uniform(kk, shape, jnp.float32, -bound, bound)

    layers = []
    for l in range(num_layers):
        d_in = input_size if l == 0 else 2 * H
        key, *ks = jax.random.split(key, 9)
        layers.append(dict(
            w_ih_f=u(ks[0], (4 * H, d_in), k), w_hh_f=u(ks[1], (4 * H, H), k),
            b_ih_f=u(ks[2], (4 * H,), k),      b_hh_f=u(ks[3], (4 * H,), k),
            w_ih_b=u(ks[4], (4 * H, d_in), k), w_hh_b=u(ks[5], (4 * H, H), k),
            b_ih_b=u(ks[6], (4 * H,), k),      b_hh_b=u(ks[7], (4 * H,), k)))

    kf = 1.0 / float((2 * H) ** 0.5)
    key, k1, k2 = jax.random.split(key, 3)
    return dict(layers=layers,
                fc_w=u(k1, (num_classes, 2 * H), kf),
                fc_b=u(k2, (num_classes,), kf))


def pack_params(raw):
    """Kernel-ready packing: gate columns reordered i,f,g,o -> i,f,o,g; fwd/bwd
    input projections fused column-wise; W_hh block-diagonal for merged layers;
    last layer keeps only the fwd W_hh (its bwd recurrence is never run)."""
    layers_raw = raw["layers"]
    L = len(layers_raw)
    H = layers_raw[0]["w_hh_f"].shape[1]

    def reorder(w):  # gate blocks along axis 0: [i; f; g; o] -> [i; f; o; g]
        return jnp.concatenate([w[0:H], w[H:2 * H], w[3 * H:4 * H], w[2 * H:3 * H]],
                               axis=0)

    packed_layers = []
    for l, lr in enumerate(layers_raw):
        w_ih = jnp.concatenate(
            [reorder(lr["w_ih_f"]).T, reorder(lr["w_ih_b"]).T], axis=1)  # (D_in, 8H)
        bias = jnp.concatenate(
            [reorder(lr["b_ih_f"] + lr["b_hh_f"]),
             reorder(lr["b_ih_b"] + lr["b_hh_b"])])[None, :]             # (1, 8H) f32

        whf = reorder(lr["w_hh_f"]).T.astype(jnp.bfloat16)   # (H, 4H) cols [i f o g]
        whb = reorder(lr["w_hh_b"]).T.astype(jnp.bfloat16)
        if l < L - 1:
            z = jnp.zeros((H, 4 * H), jnp.bfloat16)
            w_hh = jnp.concatenate(                          # (2H, 8H) block-diagonal
                [jnp.concatenate([whf, z], axis=1),
                 jnp.concatenate([z, whb], axis=1)], axis=0)
        else:
            w_hh = whf                                       # (H, 4H): fwd chain only

        packed_layers.append(dict(w_ih=w_ih.astype(jnp.bfloat16),
                                  bias=bias.astype(jnp.float32),
                                  w_hh=w_hh))

    return dict(layers=packed_layers,
                fc_w=raw["fc_w"].T.astype(jnp.bfloat16),     # (2H, num_classes)
                fc_b=raw["fc_b"][None, :].astype(jnp.float32))


# ---------------- pure-JAX reference (bf16-weight emulation, for sanity check) -----
def lstm_model_ref(x, raw):
    layers = raw["layers"]
    H = layers[0]["w_hh_f"].shape[1]
    x_tm = jnp.transpose(x, (2, 0, 1)).astype(jnp.float32)   # (T, B, D)
    T, B, _ = x_tm.shape

    def mm(a, w):  # emulate bf16 x bf16 MXU matmul with f32 accumulation
        return jnp.dot(a.astype(jnp.bfloat16).astype(jnp.float32),
                       w.astype(jnp.bfloat16).astype(jnp.float32))

    layer_in = x_tm
    for lr in layers:
        def run_dir(w_ih, w_hh, b, reverse):
            xs = layer_in[::-1] if reverse else layer_in

            def step(carry, x_t):
                h, c = carry
                g = mm(x_t, w_ih.T) + mm(h, w_hh.T) + b
                i = jax.nn.sigmoid(g[:, :H])
                f = jax.nn.sigmoid(g[:, H:2 * H])
                gg = jnp.tanh(g[:, 2 * H:3 * H])
                o = jax.nn.sigmoid(g[:, 3 * H:])
                c = f * c + i * gg
                h = o * jnp.tanh(c)
                return (h, c), h

            _, hs = jax.lax.scan(step, (jnp.zeros((B, H)), jnp.zeros((B, H))), xs)
            return hs[::-1] if reverse else hs

        out_f = run_dir(lr["w_ih_f"], lr["w_hh_f"], lr["b_ih_f"] + lr["b_hh_f"], False)
        out_b = run_dir(lr["w_ih_b"], lr["w_hh_b"], lr["b_ih_b"] + lr["b_hh_b"], True)
        layer_in = jnp.concatenate([out_f, out_b], axis=-1)

    last = layer_in[-1]
    return mm(last, raw["fc_w"].T) + raw["fc_b"]


if __name__ == "__main__":
    batch, input_size, seq_len = 4, 8, 16
    hidden_size, num_layers = 32, 2

    key = jax.random.PRNGKey(0)
    key, kx, kp = jax.random.split(key, 3)
    x = jax.random.normal(kx, (batch, input_size, seq_len), dtype=jnp.float32)

    raw = init_raw_params(kp, input_size, hidden_size, num_layers)
    params = pack_params(raw)

    out = jax.block_until_ready(jax.jit(lstm_model_forward)(x, params))
    assert out.shape == (batch, 5)

    ref = jax.block_until_ready(lstm_model_ref(x, raw))
    assert jnp.allclose(out, ref, atol=1e-2, rtol=1e-2), (out, ref)

    print("KERNEL_OK")
</pallas_src>

<mosaic_0001>
module attributes {stable_mosaic.version = 11 : i64} {
  func.func @fused_bilstm_kernel(%arg0: memref<64x8xbf16, #tpu.memory_space<vmem>>, %arg1: memref<8x256xbf16, #tpu.memory_space<vmem>>, %arg2: memref<1x256xf32, #tpu.memory_space<vmem>>, %arg3: memref<64x256xbf16, #tpu.memory_space<vmem>>, %arg4: memref<64x256xbf16, #tpu.memory_space<vmem>>, %arg5: memref<1x256xf32, #tpu.memory_space<vmem>>, %arg6: memref<32x128xbf16, #tpu.memory_space<vmem>>, %arg7: memref<64x5xbf16, #tpu.memory_space<vmem>>, %arg8: memref<1x5xf32, #tpu.memory_space<vmem>>, %arg9: memref<4x5xf32, #tpu.memory_space<vmem>>, %arg10: memref<64x256xf32, #tpu.memory_space<vmem>>, %arg11: memref<64x64xf32, #tpu.memory_space<vmem>>) attributes {dimension_semantics = [], scalar_prefetch = 0 : i64, scratch_operands = 2 : i64, tpu.core_type = #tpu.core_type<tc>} {
    %c0 = arith.constant 0 : index
    %c0_0 = arith.constant 0 : index
    %0 = vector.load %arg0[%c0, %c0_0] : memref<64x8xbf16, #tpu.memory_space<vmem>>, vector<64x8xbf16>
    %c0_1 = arith.constant 0 : index
    %c0_2 = arith.constant 0 : index
    %1 = vector.load %arg1[%c0_1, %c0_2] : memref<8x256xbf16, #tpu.memory_space<vmem>>, vector<8x256xbf16>
    %cst = arith.constant dense<0.000000e+00> : vector<64x256xf32>
    %2 = tpu.matmul %0, %1, %cst {dimension_numbers = #tpu.dot_dimension_numbers<[1], [0], [0], [1], [0, 0, 1, 1], [], []>} : vector<64x8xbf16>, vector<8x256xbf16>, vector<64x256xf32> -> vector<64x256xf32>
    %c0_3 = arith.constant 0 : index
    %c0_4 = arith.constant 0 : index
    %3 = vector.load %arg2[%c0_3, %c0_4] : memref<1x256xf32, #tpu.memory_space<vmem>>, vector<1x256xf32>
    %4 = vector.broadcast %3 : vector<1x256xf32> to vector<64x256xf32>
    %5 = arith.addf %2, %4 : vector<64x256xf32>
    %c0_5 = arith.constant 0 : index
    %c0_6 = arith.constant 0 : index
    %6 = vector.load %arg10[%c0_5, %c0_6] : memref<64x256xf32, #tpu.memory_space<vmem>>, vector<64x256xf32>
    tpu.vector_store %arg10[%c0_5, %c0_6], %5 {strides = array<i32>} : memref<64x256xf32, #tpu.memory_space<vmem>>, vector<64x256xf32>,
    %c0_7 = arith.constant 0 : index
    %c0_8 = arith.constant 0 : index
    %7 = vector.load %arg3[%c0_7, %c0_8] : memref<64x256xbf16, #tpu.memory_space<vmem>>, vector<64x256xbf16>
    %cst_9 = arith.constant 0.000000e+00 : f32
    %8 = vector.broadcast %cst_9 : f32 to vector<4x64xf32>
    %cst_10 = arith.constant 0.000000e+00 : f32
    %9 = vector.broadcast %cst_10 : f32 to vector<4x32xf32>
    %cst_11 = arith.constant 0.000000e+00 : f32
    %10 = vector.broadcast %cst_11 : f32 to vector<4x32xf32>
    %11 = arith.truncf %8 : vector<4x64xf32> to vector<4x64xbf16>
    %cst_12 = arith.constant dense<0.000000e+00> : vector<4x256xf32>
    %12 = tpu.matmul %11, %7, %cst_12 {dimension_numbers = #tpu.dot_dimension_numbers<[1], [0], [0], [1], [0, 0, 1, 1], [], []>} : vector<4x64xbf16>, vector<64x256xbf16>, vector<4x256xf32> -> vector<4x256xf32>
    %c0_13 = arith.constant 0 : index
    %c0_14 = arith.constant 0 : index
    %13 = vector.load %arg10[%c0_13, %c0_14] : memref<64x256xf32, #tpu.memory_space<vmem>>, vector<4x128xf32>
    %14 = vector.extract_strided_slice %12 {offsets = [0, 0], sizes = [4, 128], strides = [1, 1]} : vector<4x256xf32> to vector<4x128xf32>
    %15 = arith.addf %13, %14 : vector<4x128xf32>
    %c60 = arith.constant 60 : index
    %c128 = arith.constant 128 : index
    %16 = vector.load %arg10[%c60, %c128] : memref<64x256xf32, #tpu.memory_space<vmem>>, vector<4x128xf32>
    %17 = vector.extract_strided_slice %12 {offsets = [0, 128], sizes = [4, 128], strides = [1, 1]} : vector<4x256xf32> to vector<4x128xf32>
    %18 = arith.addf %16, %17 : vector<4x128xf32>
    %19 = vector.extract_strided_slice %15 {offsets = [0, 0], sizes = [4, 96], strides = [1, 1]} : vector<4x128xf32> to vector<4x96xf32>
    %cst_15 = arith.constant 5.000000e-01 : f32
    %20 = vector.broadcast %cst_15 : f32 to vector<4x96xf32>
    %21 = arith.mulf %20, %19 : vector<4x96xf32>
    %22 = math.tanh %21 : vector<4x96xf32>
    %cst_16 = arith.constant 5.000000e-01 : f32
    %23 = vector.broadcast %cst_16 : f32 to vector<4x96xf32>
    %24 = arith.mulf %23, %22 : vector<4x96xf32>
    %cst_17 = arith.constant 5.000000e-01 : f32
    %25 = vector.broadcast %cst_17 : f32 to vector<4x96xf32>
    %26 = arith.addf %24, %25 : vector<4x96xf32>
    %27 = vector.extract_strided_slice %15 {offsets = [0, 96], sizes = [4, 32], strides = [1, 1]} : vector<4x128xf32> to vector<4x32xf32>
    %28 = math.tanh %27 : vector<4x32xf32>
    %29 = vector.extract_strided_slice %26 {offsets = [0, 32], sizes = [4, 32], strides = [1, 1]} : vector<4x96xf32> to vector<4x32xf32>
    %30 = arith.mulf %29, %9 : vector<4x32xf32>
    %31 = vector.extract_strided_slice %26 {offsets = [0, 0], sizes = [4, 32], strides = [1, 1]} : vector<4x96xf32> to vector<4x32xf32>
    %32 = arith.mulf %31, %28 : vector<4x32xf32>
    %33 = arith.addf %30, %32 : vector<4x32xf32>
    %34 = vector.extract_strided_slice %26 {offsets = [0, 64], sizes = [4, 32], strides = [1, 1]} : vector<4x96xf32> to vector<4x32xf32>
    %35 = math.tanh %33 : vector<4x32xf32>
    %36 = arith.mulf %34, %35 : vector<4x32xf32>
    %37 = vector.extract_strided_slice %18 {offsets = [0, 0], sizes = [4, 96], strides = [1, 1]} : vector<4x128xf32> to vector<4x96xf32>
    %cst_18 = arith.constant 5.000000e-01 : f32
    %38 = vector.broadcast %cst_18 : f32 to vector<4x96xf32>
    %39 = arith.mulf %38, %37 : vector<4x96xf32>
    %40 = math.tanh %39 : vector<4x96xf32>
    %cst_19 = arith.constant 5.000000e-01 : f32
    %41 = vector.broadcast %cst_19 : f32 to vector<4x96xf32>
    %42 = arith.mulf %41, %40 : vector<4x96xf32>
    %cst_20 = arith.constant 5.000000e-01 : f32
    %43 = vector.broadcast %cst_20 : f32 to vector<4x96xf32>
    %44 = arith.addf %42, %43 : vector<4x96xf32>
    %45 = vector.extract_strided_slice %18 {offsets = [0, 96], sizes = [4, 32], strides = [1, 1]} : vector<4x128xf32> to vector<4x32xf32>
    %46 = math.tanh %45 : vector<4x32xf32>
    %47 = vector.extract_strided_slice %44 {offsets = [0, 32], sizes = [4, 32], strides = [1, 1]} : vector<4x96xf32> to vector<4x32xf32>
    %48 = arith.mulf %47, %10 : vector<4x32xf32>
    %49 = vector.extract_strided_slice %44 {offsets = [0, 0], sizes = [4, 32], strides = [1, 1]} : vector<4x96xf32> to vector<4x32xf32>
    %50 = arith.mulf %49, %46 : vector<4x32xf32>
    %51 = arith.addf %48, %50 : vector<4x32xf32>
    %52 = vector.extract_strided_slice %44 {offsets = [0, 64], sizes = [4, 32], strides = [1, 1]} : vector<4x96xf32> to vector<4x32xf32>
    %53 = math.tanh %51 : vector<4x32xf32>
    %54 = arith.mulf %52, %53 : vector<4x32xf32>
    %55 = tpu.concatenate %36, %54 in 1 : vector<4x32xf32>, vector<4x32xf32> -> vector<4x64xf32>
    %c0_21 = arith.constant 0 : index
    %c0_22 = arith.constant 0 : index
    %56 = vector.load %arg11[%c0_21, %c0_22] : memref<64x64xf32, #tpu.memory_space<vmem>>, vector<4x32xf32>
    tpu.vector_store %arg11[%c0_21, %c0_22], %36 {strides = array<i32>} : memref<64x64xf32, #tpu.memory_space<vmem>>, vector<4x32xf32>,
    %c60_23 = arith.constant 60 : index
    %c32 = arith.constant 32 : index
    %57 = vector.load %arg11[%c60_23, %c32] : memref<64x64xf32, #tpu.memory_space<vmem>>, vector<4x32xf32>
    tpu.vector_store %arg11[%c60_23, %c32], %54 {strides = array<i32>} : memref<64x64xf32, #tpu.memory_space<vmem>>, vector<4x32xf32>,
    %58 = arith.truncf %55 : vector<4x64xf32> to vector<4x64xbf16>
    %cst_24 = arith.constant dense<0.000000e+00> : vector<4x256xf32>
    %59 = tpu.matmul %58, %7, %cst_24 {dimension_numbers = #tpu.dot_dimension_numbers<[1], [0], [0], [1], [0, 0, 1, 1], [], []>} : vector<4x64xbf16>, vector<64x256xbf16>, vector<4x256xf32> -> vector<4x256xf32>
    %c4 = arith.constant 4 : index
    %c0_25 = arith.constant 0 : index
    %60 = vector.load %arg10[%c4, %c0_25] : memref<64x256xf32, #tpu.memory_space<vmem>>, vector<4x128xf32>
    %61 = vector.extract_strided_slice %59 {offsets = [0, 0], sizes = [4, 128], strides = [1, 1]} : vector<4x256xf32> to vector<4x128xf32>
    %62 = arith.addf %60, %61 : vector<4x128xf32>
    %c56 = arith.constant 56 : index
    %c128_26 = arith.constant 128 : index
    %63 = vector.load %arg10[%c56, %c128_26] : memref<64x256xf32, #tpu.memory_space<vmem>>, vector<4x128xf32>
    %64 = vector.extract_strided_slice %59 {offsets = [0, 128], sizes = [4, 128], strides = [1, 1]} : vector<4x256xf32> to vector<4x128xf32>
    %65 = arith.addf %63, %64 : vector<4x128xf32>
    %66 = vector.extract_strided_slice %62 {offsets = [0, 0], sizes = [4, 96], strides = [1, 1]} : vector<4x128xf32> to vector<4x96xf32>
    %cst_27 = arith.constant 5.000000e-01 : f32
    %67 = vector.broadcast %cst_27 : f32 to vector<4x96xf32>
    %68 = arith.mulf %67, %66 : vector<4x96xf32>
    %69 = math.tanh %68 : vector<4x96xf32>
    %cst_28 = arith.constant 5.000000e-01 : f32
    %70 = vector.broadcast %cst_28 : f32 to vector<4x96xf32>
    %71 = arith.mulf %70, %69 : vector<4x96xf32>
    %cst_29 = arith.constant 5.000000e-01 : f32
    %72 = vector.broadcast %cst_29 : f32 to vector<4x96xf32>
    %73 = arith.addf %71, %72 : vector<4x96xf32>
    %74 = vector.extract_strided_slice %62 {offsets = [0, 96], sizes = [4, 32], strides = [1, 1]} : vector<4x128xf32> to vector<4x32xf32>
    %75 = math.tanh %74 : vector<4x32xf32>
    %76 = vector.extract_strided_slice %73 {offsets = [0, 32], sizes = [4, 32], strides = [1, 1]} : vector<4x96xf32> to vector<4x32xf32>
    %77 = arith.mulf %76, %33 : vector<4x32xf32>
    %78 = vector.extract_strided_slice %73 {offsets = [0, 0], sizes = [4, 32], strides = [1, 1]} : vector<4x96xf32> to vector<4x32xf32>
    %79 = arith.mulf %78, %75 : vector<4x32xf32>
    %80 = arith.addf %77, %79 : vector<4x32xf32>
    %81 = vector.extract_strided_slice %73 {offsets = [0, 64], sizes = [4, 32], strides = [1, 1]} : vector<4x96xf32> to vector<4x32xf32>
    %82 = math.tanh %80 : vector<4x32xf32>
    %83 = arith.mulf %81, %82 : vector<4x32xf32>
    %84 = vector.extract_strided_slice %65 {offsets = [0, 0], sizes = [4, 96], strides = [1, 1]} : vector<4x128xf32> to vector<4x96xf32>
    %cst_30 = arith.constant 5.000000e-01 : f32
    %85 = vector.broadcast %cst_30 : f32 to vector<4x96xf32>
    %86 = arith.mulf %85, %84 : vector<4x96xf32>
    %87 = math.tanh %86 : vector<4x96xf32>
    %cst_31 = arith.constant 5.000000e-01 : f32
    %88 = vector.broadcast %cst_31 : f32 to vector<4x96xf32>
    %89 = arith.mulf %88, %87 : vector<4x96xf32>
    %cst_32 = arith.constant 5.000000e-01 : f32
    %90 = vector.broadcast %cst_32 : f32 to vector<4x96xf32>
    %91 = arith.addf %89, %90 : vector<4x96xf32>
    %92 = vector.extract_strided_slice %65 {offsets = [0, 96], sizes = [4, 32], strides = [1, 1]} : vector<4x128xf32> to vector<4x32xf32>
    %93 = math.tanh %92 : vector<4x32xf32>
    %94 = vector.extract_strided_slice %91 {offsets = [0, 32], sizes = [4, 32], strides = [1, 1]} : vector<4x96xf32> to vector<4x32xf32>
    %95 = arith.mulf %94, %51 : vector<4x32xf32>
    %96 = vector.extract_strided_slice %91 {offsets = [0, 0], sizes = [4, 32], strides = [1, 1]} : vector<4x96xf32> to vector<4x32xf32>
    %97 = arith.mulf %96, %93 : vector<4x32xf32>
    %98 = arith.addf %95, %97 : vector<4x32xf32>
    %99 = vector.extract_strided_slice %91 {offsets = [0, 64], sizes = [4, 32], strides = [1, 1]} : vector<4x96xf32> to vector<4x32xf32>
    %100 = math.tanh %98 : vector<4x32xf32>
    %101 = arith.mulf %99, %100 : vector<4x32xf32>
    %102 = tpu.concatenate %83, %101 in 1 : vector<4x32xf32>, vector<4x32xf32> -> vector<4x64xf32>
    %c4_33 = arith.constant 4 : index
    %c0_34 = arith.constant 0 : index
    %103 = vector.load %arg11[%c4_33, %c0_34] : memref<64x64xf32, #tpu.memory_space<vmem>>, vector<4x32xf32>
    tpu.vector_store %arg11[%c4_33, %c0_34], %83 {strides = array<i32>} : memref<64x64xf32, #tpu.memory_space<vmem>>, vector<4x32xf32>,
    %c56_35 = arith.constant 56 : index
    %c32_36 = arith.constant 32 : index
    %104 = vector.load %arg11[%c56_35, %c32_36] : memref<64x64xf32, #tpu.memory_space<vmem>>, vector<4x32xf32>
    tpu.vector_store %arg11[%c56_35, %c32_36], %101 {strides = array<i32>} : memref<64x64xf32, #tpu.memory_space<vmem>>, vector<4x32xf32>,
    %105 = arith.truncf %102 : vector<4x64xf32> to vector<4x64xbf16>
    %cst_37 = arith.constant dense<0.000000e+00> : vector<4x256xf32>
    %106 = tpu.matmul %105, %7, %cst_37 {dimension_numbers = #tpu.dot_dimension_numbers<[1], [0], [0], [1], [0, 0, 1, 1], [], []>} : vector<4x64xbf16>, vector<64x256xbf16>, vector<4x256xf32> -> vector<4x256xf32>
    %c8 = arith.constant 8 : index
    %c0_38 = arith.constant 0 : index
    %107 = vector.load %arg10[%c8, %c0_38] : memref<64x256xf32, #tpu.memory_space<vmem>>, vector<4x128xf32>
    %108 = vector.extract_strided_slice %106 {offsets = [0, 0], sizes = [4, 128], strides = [1, 1]} : vector<4x256xf32> to vector<4x128xf32>
    %109 = arith.addf %107, %108 : vector<4x128xf32>
    %c52 = arith.constant 52 : index
    %c128_39 = arith.constant 128 : index
    %110 = vector.load %arg10[%c52, %c128_39] : memref<64x256xf32, #tpu.memory_space<vmem>>, vector<4x128xf32>
    %111 = vector.extract_strided_slice %106 {offsets = [0, 128], sizes = [4, 128], strides = [1, 1]} : vector<4x256xf32> to vector<4x128xf32>
    %112 = arith.addf %110, %111 : vector<4x128xf32>
    %113 = vector.extract_strided_slice %109 {offsets = [0, 0], sizes = [4, 96], strides = [1, 1]} : vector<4x128xf32> to vector<4x96xf32>
    %cst_40 = arith.constant 5.000000e-01 : f32
    %114 = vector.broadcast %cst_40 : f32 to vector<4x96xf32>
    %115 = arith.mulf %114, %113 : vector<4x96xf32>
    %116 = math.tanh %115 : vector<4x96xf32>
    %cst_41 = arith.constant 5.000000e-01 : f32
    %117 = vector.broadcast %cst_41 : f32 to vector<4x96xf32>
    %118 = arith.mulf %117, %116 : vector<4x96xf32>
    %cst_42 = arith.constant 5.000000e-01 : f32
    %119 = vector.broadcast %cst_42 : f32 to vector<4x96xf32>
    %120 = arith.addf %118, %119 : vector<4x96xf32>
    %121 = vector.extract_strided_slice %109 {offsets = [0, 96], sizes = [4, 32], strides = [1, 1]} : vector<4x128xf32> to vector<4x32xf32>
    %122 = math.tanh %121 : vector<4x32xf32>
    %123 = vector.extract_strided_slice %120 {offsets = [0, 32], sizes = [4, 32], strides = [1, 1]} : vector<4x96xf32> to vector<4x32xf32>
    %124 = arith.mulf %123, %80 : vector<4x32xf32>
    %125 = vector.extract_strided_slice %120 {offsets = [0, 0], sizes = [4, 32], strides = [1, 1]} : vector<4x96xf32> to vector<4x32xf32>
    %126 = arith.mulf %125, %122 : vector<4x32xf32>
    %127 = arith.addf %124, %126 : vector<4x32xf32>
    %128 = vector.extract_strided_slice %120 {offsets = [0, 64], sizes = [4, 32], strides = [1, 1]} : vector<4x96xf32> to vector<4x32xf32>
    %129 = math.tanh %127 : vector<4x32xf32>
    %130 = arith.mulf %128, %129 : vector<4x32xf32>
    %131 = vector.extract_strided_slice %112 {offsets = [0, 0], sizes = [4, 96], strides = [1, 1]} : vector<4x128xf32> to vector<4x96xf32>
    %cst_43 = arith.constant 5.000000e-01 : f32
    %132 = vector.broadcast %cst_43 : f32 to vector<4x96xf32>
    %133 = arith.mulf %132, %131 : vector<4x96xf32>
    %134 = math.tanh %133 : vector<4x96xf32>
    %cst_44 = arith.constant 5.000000e-01 : f32
    %135 = vector.broadcast %cst_44 : f32 to vector<4x96xf32>
    %136 = arith.mulf %135, %134 : vector<4x96xf32>
    %cst_45 = arith.constant 5.000000e-01 : f32
    %137 = vector.broadcast %cst_45 : f32 to vector<4x96xf32>
    %138 = arith.addf %136, %137 : vector<4x96xf32>
    %139 = vector.extract_strided_slice %112 {offsets = [0, 96], sizes = [4, 32], strides = [1, 1]} : vector<4x128xf32> to vector<4x32xf32>
    %140 = math.tanh %139 : vector<4x32xf32>
    %141 = vector.extract_strided_slice %138 {offsets = [0, 32], sizes = [4, 32], strides = [1, 1]} : vector<4x96xf32> to vector<4x32xf32>
    %142 = arith.mulf %141, %98 : vector<4x32xf32>
    %143 = vector.extract_strided_slice %138 {offsets = [0, 0], sizes = [4, 32], strides = [1, 1]} : vector<4x96xf32> to vector<4x32xf32>
    %144 = arith.mulf %143, %140 : vector<4x32xf32>
    %145 = arith.addf %142, %144 : vector<4x32xf32>
    %146 = vector.extract_strided_slice %138 {offsets = [0, 64], sizes = [4, 32], strides = [1, 1]} : vector<4x96xf32> to vector<4x32xf32>
    %147 = math.tanh %145 : vector<4x32xf32>
    %148 = arith.mulf %146, %147 : vector<4x32xf32>
    %149 = tpu.concatenate %130, %148 in 1 : vector<4x32xf32>, vector<4x32xf32> -> vector<4x64xf32>
    %c8_46 = arith.constant 8 : index
    %c0_47 = arith.constant 0 : index
    %150 = vector.load %arg11[%c8_46, %c0_47] : memref<64x64xf32, #tpu.memory_space<vmem>>, vector<4x32xf32>
    tpu.vector_store %arg11[%c8_46, %c0_47], %130 {strides = array<i32>} : memref<64x64xf32, #tpu.memory_space<vmem>>, vector<4x32xf32>,
    %c52_48 = arith.constant 52 : index
    %c32_49 = arith.constant 32 : index
    %151 = vector.load %arg11[%c52_48, %c32_49] : memref<64x64xf32, #tpu.memory_space<vmem>>, vector<4x32xf32>
    tpu.vector_store %arg11[%c52_48, %c32_49], %148 {strides = array<i32>} : memref<64x64xf32, #tpu.memory_space<vmem>>, vector<4x32xf32>,
    %152 = arith.truncf %149 : vector<4x64xf32> to vector<4x64xbf16>
    %cst_50 = arith.constant dense<0.000000e+00> : vector<4x256xf32>
    %153 = tpu.matmul %152, %7, %cst_50 {dimension_numbers = #tpu.dot_dimension_numbers<[1], [0], [0], [1], [0, 0, 1, 1], [], []>} : vector<4x64xbf16>, vector<64x256xbf16>, vector<4x256xf32> -> vector<4x256xf32>
    %c12 = arith.constant 12 : index
    %c0_51 = arith.constant 0 : index
    %154 = vector.load %arg10[%c12, %c0_51] : memref<64x256xf32, #tpu.memory_space<vmem>>, vector<4x128xf32>
    %155 = vector.extract_strided_slice %153 {offsets = [0, 0], sizes = [4, 128], strides = [1, 1]} : vector<4x256xf32> to vector<4x128xf32>
    %156 = arith.addf %154, %155 : vector<4x128xf32>
    %c48 = arith.constant 48 : index
    %c128_52 = arith.constant 128 : index
    %157 = vector.load %arg10[%c48, %c128_52] : memref<64x256xf32, #tpu.memory_space<vmem>>, vector<4x128xf32>
    %158 = vector.extract_strided_slice %153 {offsets = [0, 128], sizes = [4, 128], strides = [1, 1]} : vector<4x256xf32> to vector<4x128xf32>
    %159 = arith.addf %157, %158 : vector<4x128xf32>
    %160 = vector.extract_strided_slice %156 {offsets = [0, 0], sizes = [4, 96], strides = [1, 1]} : vector<4x128xf32> to vector<4x96xf32>
    %cst_53 = arith.constant 5.000000e-01 : f32
    %161 = vector.broadcast %cst_53 : f32 to vector<4x96xf32>
    %162 = arith.mulf %161, %160 : vector<4x96xf32>
    %163 = math.tanh %162 : vector<4x96xf32>
    %cst_54 = arith.constant 5.000000e-01 : f32
    %164 = vector.broadcast %cst_54 : f32 to vector<4x96xf32>
    %165 = arith.mulf %164, %163 : vector<4x96xf32>
    %cst_55 = arith.constant 5.000000e-01 : f32
    %166 = vector.broadcast %cst_55 : f32 to vector<4x96xf32>
    %167 = arith.addf %165, %166 : vector<4x96xf32>
    %168 = vector.extract_strided_slice %156 {offsets = [0, 96], sizes = [4, 32], strides = [1, 1]} : vector<4x128xf32> to vector<4x32xf32>
    %169 = math.tanh %168 : vector<4x32xf32>
    %170 = vector.extract_strided_slice %167 {offsets = [0, 32], sizes = [4, 32], strides = [1, 1]} : vector<4x96xf32> to vector<4x32xf32>
    %171 = arith.mulf %170, %127 : vector<4x32xf32>
    %172 = vector.extract_strided_slice %167 {offsets = [0, 0], sizes = [4, 32], strides = [1, 1]} : vector<4x96xf32> to vector<4x32xf32>
    %173 = arith.mulf %172, %169 : vector<4x32xf32>
    %174 = arith.addf %171, %173 : vector<4x32xf32>
    %175 = vector.extract_strided_slice %167 {offsets = [0, 64], sizes = [4, 32], strides = [1, 1]} : vector<4x96xf32> to vector<4x32xf32>
    %176 = math.tanh %174 : vector<4x32xf32>
    %177 = arith.mulf %175, %176 : vector<4x32xf32>
    %178 = vector.extract_strided_slice %159 {offsets = [0, 0], sizes = [4, 96], strides = [1, 1]} : vector<4x128xf32> to vector<4x96xf32>
    %cst_56 = arith.constant 5.000000e-01 : f32
    %179 = vector.broadcast %cst_56 : f32 to vector<4x96xf32>
    %180 = arith.mulf %179, %178 : vector<4x96xf32>
    %181 = math.tanh %180 : vector<4x96xf32>
    %cst_57 = arith.constant 5.000000e-01 : f32
    %182 = vector.broadcast %cst_57 : f32 to vector<4x96xf32>
    %183 = arith.mulf %182, %181 : vector<4x96xf32>
    %cst_58 = arith.constant 5.000000e-01 : f32
    %184 = vector.broadcast %cst_58 : f32 to vector<4x96xf32>
    %185 = arith.addf %183, %184 : vector<4x96xf32>
    %186 = vector.extract_strided_slice %159 {offsets = [0, 96], sizes = [4, 32], strides = [1, 1]} : vector<4x128xf32> to vector<4x32xf32>
    %187 = math.tanh %186 : vector<4x32xf32>
    %188 = vector.extract_strided_slice %185 {offsets = [0, 32], sizes = [4, 32], strides = [1, 1]} : vector<4x96xf32> to vector<4x32xf32>
    %189 = arith.mulf %188, %145 : vector<4x32xf32>
    %190 = vector.extract_strided_slice %185 {offsets = [0, 0], sizes = [4, 32], strides = [1, 1]} : vector<4x96xf32> to vector<4x32xf32>
    %191 = arith.mulf %190, %187 : vector<4x32xf32>
    %192 = arith.addf %189, %191 : vector<4x32xf32>
    %193 = vector.extract_strided_slice %185 {offsets = [0, 64], sizes = [4, 32], strides = [1, 1]} : vector<4x96xf32> to vector<4x32xf32>
    %194 = math.tanh %192 : vector<4x32xf32>
    %195 = arith.mulf %193, %194 : vector<4x32xf32>
    %196 = tpu.concatenate %177, %195 in 1 : vector<4x32xf32>, vector<4x32xf32> -> vector<4x64xf32>
    %c12_59 = arith.constant 12 : index
    %c0_60 = arith.constant 0 : index
    %197 = vector.load %arg11[%c12_59, %c0_60] : memref<64x64xf32, #tpu.memory_space<vmem>>, vector<4x32xf32>
    tpu.vector_store %arg11[%c12_59, %c0_60], %177 {strides = array<i32>} : memref<64x64xf32, #tpu.memory_space<vmem>>, vector<4x32xf32>,
    %c48_61 = arith.constant 48 : index
    %c32_62 = arith.constant 32 : index
    %198 = vector.load %arg11[%c48_61, %c32_62] : memref<64x64xf32, #tpu.memory_space<vmem>>, vector<4x32xf32>
    tpu.vector_store %arg11[%c48_61, %c32_62], %195 {strides = array<i32>} : memref<64x64xf32, #tpu.memory_space<vmem>>, vector<4x32xf32>,
    %199 = arith.truncf %196 : vector<4x64xf32> to vector<4x64xbf16>
    %cst_63 = arith.constant dense<0.000000e+00> : vector<4x256xf32>
    %200 = tpu.matmul %199, %7, %cst_63 {dimension_numbers = #tpu.dot_dimension_numbers<[1], [0], [0], [1], [0, 0, 1, 1], [], []>} : vector<4x64xbf16>, vector<64x256xbf16>, vector<4x256xf32> -> vector<4x256xf32>
    %c16 = arith.constant 16 : index
    %c0_64 = arith.constant 0 : index
    %201 = vector.load %arg10[%c16, %c0_64] : memref<64x256xf32, #tpu.memory_space<vmem>>, vector<4x128xf32>
    %202 = vector.extract_strided_slice %200 {offsets = [0, 0], sizes = [4, 128], strides = [1, 1]} : vector<4x256xf32> to vector<4x128xf32>
    %203 = arith.addf %201, %202 : vector<4x128xf32>
    %c44 = arith.constant 44 : index
    %c128_65 = arith.constant 128 : index
    %204 = vector.load %arg10[%c44, %c128_65] : memref<64x256xf32, #tpu.memory_space<vmem>>, vector<4x128xf32>
    %205 = vector.extract_strided_slice %200 {offsets = [0, 128], sizes = [4, 128], strides = [1, 1]} : vector<4x256xf32> to vector<4x128xf32>
    %206 = arith.addf %204, %205 : vector<4x128xf32>
    %207 = vector.extract_strided_slice %203 {offsets = [0, 0], sizes = [4, 96], strides = [1, 1]} : vector<4x128xf32> to vector<4x96xf32>
    %cst_66 = arith.constant 5.000000e-01 : f32
    %208 = vector.broadcast %cst_66 : f32 to vector<4x96xf32>
    %209 = arith.mulf %208, %207 : vector<4x96xf32>
    %210 = math.tanh %209 : vector<4x96xf32>
    %cst_67 = arith.constant 5.000000e-01 : f32
    %211 = vector.broadcast %cst_67 : f32 to vector<4x96xf32>
    %212 = arith.mulf %211, %210 : vector<4x96xf32>
    %cst_68 = arith.constant 5.000000e-01 : f32
    %213 = vector.broadcast %cst_68 : f32 to vector<4x96xf32>
    %214 = arith.addf %212, %213 : vector<4x96xf32>
    %215 = vector.extract_strided_slice %203 {offsets = [0, 96], sizes = [4, 32], strides = [1, 1]} : vector<4x128xf32> to vector<4x32xf32>
    %216 = math.tanh %215 : vector<4x32xf32>
    %217 = vector.extract_strided_slice %214 {offsets = [0, 32], sizes = [4, 32], strides = [1, 1]} : vector<4x96xf32> to vector<4x32xf32>
    %218 = arith.mulf %217, %174 : vector<4x32xf32>
    %219 = vector.extract_strided_slice %214 {offsets = [0, 0], sizes = [4, 32], strides = [1, 1]} : vector<4x96xf32> to vector<4x32xf32>
    %220 = arith.mulf %219, %216 : vector<4x32xf32>
    %221 = arith.addf %218, %220 : vector<4x32xf32>
    %222 = vector.extract_strided_slice %214 {offsets = [0, 64], sizes = [4, 32], strides = [1, 1]} : vector<4x96xf32> to vector<4x32xf32>
    %223 = math.tanh %221 : vector<4x32xf32>
    %224 = arith.mulf %222, %223 : vector<4x32xf32>
    %225 = vector.extract_strided_slice %206 {offsets = [0, 0], sizes = [4, 96], strides = [1, 1]} : vector<4x128xf32> to vector<4x96xf32>
    %cst_69 = arith.constant 5.000000e-01 : f32
    %226 = vector.broadcast %cst_69 : f32 to vector<4x96xf32>
    %227 = arith.mulf %226, %225 : vector<4x96xf32>
    %228 = math.tanh %227 : vector<4x96xf32>
    %cst_70 = arith.constant 5.000000e-01 : f32
    %229 = vector.broadcast %cst_70 : f32 to vector<4x96xf32>
    %230 = arith.mulf %229, %228 : vector<4x96xf32>
    %cst_71 = arith.constant 5.000000e-01 : f32
    %231 = vector.broadcast %cst_71 : f32 to vector<4x96xf32>
    %232 = arith.addf %230, %231 : vector<4x96xf32>
    %233 = vector.extract_strided_slice %206 {offsets = [0, 96], sizes = [4, 32], strides = [1, 1]} : vector<4x128xf32> to vector<4x32xf32>
    %234 = math.tanh %233 : vector<4x32xf32>
    %235 = vector.extract_strided_slice %232 {offsets = [0, 32], sizes = [4, 32], strides = [1, 1]} : vector<4x96xf32> to vector<4x32xf32>
    %236 = arith.mulf %235, %192 : vector<4x32xf32>
    %237 = vector.extract_strided_slice %232 {offsets = [0, 0], sizes = [4, 32], strides = [1, 1]} : vector<4x96xf32> to vector<4x32xf32>
    %238 = arith.mulf %237, %234 : vector<4x32xf32>
    %239 = arith.addf %236, %238 : vector<4x32xf32>
    %240 = vector.extract_strided_slice %232 {offsets = [0, 64], sizes = [4, 32], strides = [1, 1]} : vector<4x96xf32> to vector<4x32xf32>
    %241 = math.tanh %239 : vector<4x32xf32>
    %242 = arith.mulf %240, %241 : vector<4x32xf32>
    %243 = tpu.concatenate %224, %242 in 1 : vector<4x32xf32>, vector<4x32xf32> -> vector<4x64xf32>
    %c16_72 = arith.constant 16 : index
    %c0_73 = arith.constant 0 : index
    %244 = vector.load %arg11[%c16_72, %c0_73] : memref<64x64xf32, #tpu.memory_space<vmem>>, vector<4x32xf32>
    tpu.vector_store %arg11[%c16_72, %c0_73], %224 {strides = array<i32>} : memref<64x64xf32, #tpu.memory_space<vmem>>, vector<4x32xf32>,
    %c44_74 = arith.constant 44 : index
    %c32_75 = arith.constant 32 : index
    %245 = vector.load %arg11[%c44_74, %c32_75] : memref<64x64xf32, #tpu.memory_space<vmem>>, vector<4x32xf32>
    tpu.vector_store %arg11[%c44_74, %c32_75], %242 {strides = array<i32>} : memref<64x64xf32, #tpu.memory_space<vmem>>, vector<4x32xf32>,
    %246 = arith.truncf %243 : vector<4x64xf32> to vector<4x64xbf16>
    %cst_76 = arith.constant dense<0.000000e+00> : vector<4x256xf32>
    %247 = tpu.matmul %246, %7, %cst_76 {dimension_numbers = #tpu.dot_dimension_numbers<[1], [0], [0], [1], [0, 0, 1, 1], [], []>} : vector<4x64xbf16>, vector<64x256xbf16>, vector<4x256xf32> -> vector<4x256xf32>
    %c20 = arith.constant 20 : index
    %c0_77 = arith.constant 0 : index
    %248 = vector.load %arg10[%c20, %c0_77] : memref<64x256xf32, #tpu.memory_space<vmem>>, vector<4x128xf32>
    %249 = vector.extract_strided_slice %247 {offsets = [0, 0], sizes = [4, 128], strides = [1, 1]} : vector<4x256xf32> to vector<4x128xf32>
    %250 = arith.addf %248, %249 : vector<4x128xf32>
    %c40 = arith.constant 40 : index
    %c128_78 = arith.constant 128 : index
    %251 = vector.load %arg10[%c40, %c128_78] : memref<64x256xf32, #tpu.memory_space<vmem>>, vector<4x128xf32>
    %252 = vector.extract_strided_slice %247 {offsets = [0, 128], sizes = [4, 128], strides = [1, 1]} : vector<4x256xf32> to vector<4x128xf32>
    %253 = arith.addf %251, %252 : vector<4x128xf32>
    %254 = vector.extract_strided_slice %250 {offsets = [0, 0], sizes = [4, 96], strides = [1, 1]} : vector<4x128xf32> to vector<4x96xf32>
    %cst_79 = arith.constant 5.000000e-01 : f32
    %255 = vector.broadcast %cst_79 : f32 to vector<4x96xf32>
    %256 = arith.mulf %255, %254 : vector<4x96xf32>
    %257 = math.tanh %256 : vector<4x96xf32>
    %cst_80 = arith.constant 5.000000e-01 : f32
    %258 = vector.broadcast %cst_80 : f32 to vector<4x96xf32>
    %259 = arith.mulf %258, %257 : vector<4x96xf32>
    %cst_81 = arith.constant 5.000000e-01 : f32
    %260 = vector.broadcast %cst_81 : f32 to vector<4x96xf32>
    %261 = arith.addf %259, %260 : vector<4x96xf32>
    %262 = vector.extract_strided_slice %250 {offsets = [0, 96], sizes = [4, 32], strides = [1, 1]} : vector<4x128xf32> to vector<4x32xf32>
    %263 = math.tanh %262 : vector<4x32xf32>
    %264 = vector.extract_strided_slice %261 {offsets = [0, 32], sizes = [4, 32], strides = [1, 1]} : vector<4x96xf32> to vector<4x32xf32>
    %265 = arith.mulf %264, %221 : vector<4x32xf32>
    %266 = vector.extract_strided_slice %261 {offsets = [0, 0], sizes = [4, 32], strides = [1, 1]} : vector<4x96xf32> to vector<4x32xf32>
    %267 = arith.mulf %266, %263 : vector<4x32xf32>
    %268 = arith.addf %265, %267 : vector<4x32xf32>
    %269 = vector.extract_strided_slice %261 {offsets = [0, 64], sizes = [4, 32], strides = [1, 1]} : vector<4x96xf32> to vector<4x32xf32>
    %270 = math.tanh %268 : vector<4x32xf32>
    %271 = arith.mulf %269, %270 : vector<4x32xf32>
    %272 = vector.extract_strided_slice %253 {offsets = [0, 0], sizes = [4, 96], strides = [1, 1]} : vector<4x128xf32> to vector<4x96xf32>
    %cst_82 = arith.constant 5.000000e-01 : f32
    %273 = vector.broadcast %cst_82 : f32 to vector<4x96xf32>
    %274 = arith.mulf %273, %272 : vector<4x96xf32>
    %275 = math.tanh %274 : vector<4x96xf32>
    %cst_83 = arith.constant 5.000000e-01 : f32
    %276 = vector.broadcast %cst_83 : f32 to vector<4x96xf32>
    %277 = arith.mulf %276, %275 : vector<4x96xf32>
    %cst_84 = arith.constant 5.000000e-01 : f32
    %278 = vector.broadcast %cst_84 : f32 to vector<4x96xf32>
    %279 = arith.addf %277, %278 : vector<4x96xf32>
    %280 = vector.extract_strided_slice %253 {offsets = [0, 96], sizes = [4, 32], strides = [1, 1]} : vector<4x128xf32> to vector<4x32xf32>
    %281 = math.tanh %280 : vector<4x32xf32>
    %282 = vector.extract_strided_slice %279 {offsets = [0, 32], sizes = [4, 32], strides = [1, 1]} : vector<4x96xf32> to vector<4x32xf32>
    %283 = arith.mulf %282, %239 : vector<4x32xf32>
    %284 = vector.extract_strided_slice %279 {offsets = [0, 0], sizes = [4, 32], strides = [1, 1]} : vector<4x96xf32> to vector<4x32xf32>
    %285 = arith.mulf %284, %281 : vector<4x32xf32>
    %286 = arith.addf %283, %285 : vector<4x32xf32>
    %287 = vector.extract_strided_slice %279 {offsets = [0, 64], sizes = [4, 32], strides = [1, 1]} : vector<4x96xf32> to vector<4x32xf32>
    %288 = math.tanh %286 : vector<4x32xf32>
    %289 = arith.mulf %287, %288 : vector<4x32xf32>
    %290 = tpu.concatenate %271, %289 in 1 : vector<4x32xf32>, vector<4x32xf32> -> vector<4x64xf32>
    %c20_85 = arith.constant 20 : index
    %c0_86 = arith.constant 0 : index
    %291 = vector.load %arg11[%c20_85, %c0_86] : memref<64x64xf32, #tpu.memory_space<vmem>>, vector<4x32xf32>
    tpu.vector_store %arg11[%c20_85, %c0_86], %271 {strides = array<i32>} : memref<64x64xf32, #tpu.memory_space<vmem>>, vector<4x32xf32>,
    %c40_87 = arith.constant 40 : index
    %c32_88 = arith.constant 32 : index
    %292 = vector.load %arg11[%c40_87, %c32_88] : memref<64x64xf32, #tpu.memory_space<vmem>>, vector<4x32xf32>
    tpu.vector_store %arg11[%c40_87, %c32_88], %289 {strides = array<i32>} : memref<64x64xf32, #tpu.memory_space<vmem>>, vector<4x32xf32>,
    %293 = arith.truncf %290 : vector<4x64xf32> to vector<4x64xbf16>
    %cst_89 = arith.constant dense<0.000000e+00> : vector<4x256xf32>
    %294 = tpu.matmul %293, %7, %cst_89 {dimension_numbers = #tpu.dot_dimension_numbers<[1], [0], [0], [1], [0, 0, 1, 1], [], []>} : vector<4x64xbf16>, vector<64x256xbf16>, vector<4x256xf32> -> vector<4x256xf32>
    %c24 = arith.constant 24 : index
    %c0_90 = arith.constant 0 : index
    %295 = vector.load %arg10[%c24, %c0_90] : memref<64x256xf32, #tpu.memory_space<vmem>>, vector<4x128xf32>
    %296 = vector.extract_strided_slice %294 {offsets = [0, 0], sizes = [4, 128], strides = [1, 1]} : vector<4x256xf32> to vector<4x128xf32>
    %297 = arith.addf %295, %296 : vector<4x128xf32>
    %c36 = arith.constant 36 : index
    %c128_91 = arith.constant 128 : index
    %298 = vector.load %arg10[%c36, %c128_91] : memref<64x256xf32, #tpu.memory_space<vmem>>, vector<4x128xf32>
    %299 = vector.extract_strided_slice %294 {offsets = [0, 128], sizes = [4, 128], strides = [1, 1]} : vector<4x256xf32> to vector<4x128xf32>
    %300 = arith.addf %298, %299 : vector<4x128xf32>
    %301 = vector.extract_strided_slice %297 {offsets = [0, 0], sizes = [4, 96], strides = [1, 1]} : vector<4x128xf32> to vector<4x96xf32>
    %cst_92 = arith.constant 5.000000e-01 : f32
    %302 = vector.broadcast %cst_92 : f32 to vector<4x96xf32>
    %303 = arith.mulf %302, %301 : vector<4x96xf32>
    %304 = math.tanh %303 : vector<4x96xf32>
    %cst_93 = arith.constant 5.000000e-01 : f32
    %305 = vector.broadcast %cst_93 : f32 to vector<4x96xf32>
    %306 = arith.mulf %305, %304 : vector<4x96xf32>
    %cst_94 = arith.constant 5.000000e-01 : f32
    %307 = vector.broadcast %cst_94 : f32 to vector<4x96xf32>
    %308 = arith.addf %306, %307 : vector<4x96xf32>
    %309 = vector.extract_strided_slice %297 {offsets = [0, 96], sizes = [4, 32], strides = [1, 1]} : vector<4x128xf32> to vector<4x32xf32>
    %310 = math.tanh %309 : vector<4x32xf32>
    %311 = vector.extract_strided_slice %308 {offsets = [0, 32], sizes = [4, 32], strides = [1, 1]} : vector<4x96xf32> to vector<4x32xf32>
    %312 = arith.mulf %311, %268 : vector<4x32xf32>
    %313 = vector.extract_strided_slice %308 {offsets = [0, 0], sizes = [4, 32], strides = [1, 1]} : vector<4x96xf32> to vector<4x32xf32>
    %314 = arith.mulf %313, %310 : vector<4x32xf32>
    %315 = arith.addf %312, %314 : vector<4x32xf32>
    %316 = vector.extract_strided_slice %308 {offsets = [0, 64], sizes = [4, 32], strides = [1, 1]} : vector<4x96xf32> to vector<4x32xf32>
    %317 = math.tanh %315 : vector<4x32xf32>
    %318 = arith.mulf %316, %317 : vector<4x32xf32>
    %319 = vector.extract_strided_slice %300 {offsets = [0, 0], sizes = [4, 96], strides = [1, 1]} : vector<4x128xf32> to vector<4x96xf32>
    %cst_95 = arith.constant 5.000000e-01 : f32
    %320 = vector.broadcast %cst_95 : f32 to vector<4x96xf32>
    %321 = arith.mulf %320, %319 : vector<4x96xf32>
    %322 = math.tanh %321 : vector<4x96xf32>
    %cst_96 = arith.constant 5.000000e-01 : f32
    %323 = vector.broadcast %cst_96 : f32 to vector<4x96xf32>
    %324 = arith.mulf %323, %322 : vector<4x96xf32>
    %cst_97 = arith.constant 5.000000e-01 : f32
    %325 = vector.broadcast %cst_97 : f32 to vector<4x96xf32>
    %326 = arith.addf %324, %325 : vector<4x96xf32>
    %327 = vector.extract_strided_slice %300 {offsets = [0, 96], sizes = [4, 32], strides = [1, 1]} : vector<4x128xf32> to vector<4x32xf32>
    %328 = math.tanh %327 : vector<4x32xf32>
    %329 = vector.extract_strided_slice %326 {offsets = [0, 32], sizes = [4, 32], strides = [1, 1]} : vector<4x96xf32> to vector<4x32xf32>
    %330 = arith.mulf %329, %286 : vector<4x32xf32>
    %331 = vector.extract_strided_slice %326 {offsets = [0, 0], sizes = [4, 32], strides = [1, 1]} : vector<4x96xf32> to vector<4x32xf32>
    %332 = arith.mulf %331, %328 : vector<4x32xf32>
    %333 = arith.addf %330, %332 : vector<4x32xf32>
    %334 = vector.extract_strided_slice %326 {offsets = [0, 64], sizes = [4, 32], strides = [1, 1]} : vector<4x96xf32> to vector<4x32xf32>
    %335 = math.tanh %333 : vector<4x32xf32>
    %336 = arith.mulf %334, %335 : vector<4x32xf32>
    %337 = tpu.concatenate %318, %336 in 1 : vector<4x32xf32>, vector<4x32xf32> -> vector<4x64xf32>
    %c24_98 = arith.constant 24 : index
    %c0_99 = arith.constant 0 : index
    %338 = vector.load %arg11[%c24_98, %c0_99] : memref<64x64xf32, #tpu.memory_space<vmem>>, vector<4x32xf32>
    tpu.vector_store %arg11[%c24_98, %c0_99], %318 {strides = array<i32>} : memref<64x64xf32, #tpu.memory_space<vmem>>, vector<4x32xf32>,
    %c36_100 = arith.constant 36 : index
    %c32_101 = arith.constant 32 : index
    %339 = vector.load %arg11[%c36_100, %c32_101] : memref<64x64xf32, #tpu.memory_space<vmem>>, vector<4x32xf32>
    tpu.vector_store %arg11[%c36_100, %c32_101], %336 {strides = array<i32>} : memref<64x64xf32, #tpu.memory_space<vmem>>, vector<4x32xf32>,
    %340 = arith.truncf %337 : vector<4x64xf32> to vector<4x64xbf16>
    %cst_102 = arith.constant dense<0.000000e+00> : vector<4x256xf32>
    %341 = tpu.matmul %340, %7, %cst_102 {dimension_numbers = #tpu.dot_dimension_numbers<[1], [0], [0], [1], [0, 0, 1, 1], [], []>} : vector<4x64xbf16>, vector<64x256xbf16>, vector<4x256xf32> -> vector<4x256xf32>
    %c28 = arith.constant 28 : index
    %c0_103 = arith.constant 0 : index
    %342 = vector.load %arg10[%c28, %c0_103] : memref<64x256xf32, #tpu.memory_space<vmem>>, vector<4x128xf32>
    %343 = vector.extract_strided_slice %341 {offsets = [0, 0], sizes = [4, 128], strides = [1, 1]} : vector<4x256xf32> to vector<4x128xf32>
    %344 = arith.addf %342, %343 : vector<4x128xf32>
    %c32_104 = arith.constant 32 : index
    %c128_105 = arith.constant 128 : index
    %345 = vector.load %arg10[%c32_104, %c128_105] : memref<64x256xf32, #tpu.memory_space<vmem>>, vector<4x128xf32>
    %346 = vector.extract_strided_slice %341 {offsets = [0, 128], sizes = [4, 128], strides = [1, 1]} : vector<4x256xf32> to vector<4x128xf32>
    %347 = arith.addf %345, %346 : vector<4x128xf32>
    %348 = vector.extract_strided_slice %344 {offsets = [0, 0], sizes = [4, 96], strides = [1, 1]} : vector<4x128xf32> to vector<4x96xf32>
    %cst_106 = arith.constant 5.000000e-01 : f32
    %349 = vector.broadcast %cst_106 : f32 to vector<4x96xf32>
    %350 = arith.mulf %349, %348 : vector<4x96xf32>
    %351 = math.tanh %350 : vector<4x96xf32>
    %cst_107 = arith.constant 5.000000e-01 : f32
    %352 = vector.broadcast %cst_107 : f32 to vector<4x96xf32>
    %353 = arith.mulf %352, %351 : vector<4x96xf32>
    %cst_108 = arith.constant 5.000000e-01 : f32
    %354 = vector.broadcast %cst_108 : f32 to vector<4x96xf32>
    %355 = arith.addf %353, %354 : vector<4x96xf32>
    %356 = vector.extract_strided_slice %344 {offsets = [0, 96], sizes = [4, 32], strides = [1, 1]} : vector<4x128xf32> to vector<4x32xf32>
    %357 = math.tanh %356 : vector<4x32xf32>
    %358 = vector.extract_strided_slice %355 {offsets = [0, 32], sizes = [4, 32], strides = [1, 1]} : vector<4x96xf32> to vector<4x32xf32>
    %359 = arith.mulf %358, %315 : vector<4x32xf32>
    %360 = vector.extract_strided_slice %355 {offsets = [0, 0], sizes = [4, 32], strides = [1, 1]} : vector<4x96xf32> to vector<4x32xf32>
    %361 = arith.mulf %360, %357 : vector<4x32xf32>
    %362 = arith.addf %359, %361 : vector<4x32xf32>
    %363 = vector.extract_strided_slice %355 {offsets = [0, 64], sizes = [4, 32], strides = [1, 1]} : vector<4x96xf32> to vector<4x32xf32>
    %364 = math.tanh %362 : vector<4x32xf32>
    %365 = arith.mulf %363, %364 : vector<4x32xf32>
    %366 = vector.extract_strided_slice %347 {offsets = [0, 0], sizes = [4, 96], strides = [1, 1]} : vector<4x128xf32> to vector<4x96xf32>
    %cst_109 = arith.constant 5.000000e-01 : f32
    %367 = vector.broadcast %cst_109 : f32 to vector<4x96xf32>
    %368 = arith.mulf %367, %366 : vector<4x96xf32>
    %369 = math.tanh %368 : vector<4x96xf32>
    %cst_110 = arith.constant 5.000000e-01 : f32
    %370 = vector.broadcast %cst_110 : f32 to vector<4x96xf32>
    %371 = arith.mulf %370, %369 : vector<4x96xf32>
    %cst_111 = arith.constant 5.000000e-01 : f32
    %372 = vector.broadcast %cst_111 : f32 to vector<4x96xf32>
    %373 = arith.addf %371, %372 : vector<4x96xf32>
    %374 = vector.extract_strided_slice %347 {offsets = [0, 96], sizes = [4, 32], strides = [1, 1]} : vector<4x128xf32> to vector<4x32xf32>
    %375 = math.tanh %374 : vector<4x32xf32>
    %376 = vector.extract_strided_slice %373 {offsets = [0, 32], sizes = [4, 32], strides = [1, 1]} : vector<4x96xf32> to vector<4x32xf32>
    %377 = arith.mulf %376, %333 : vector<4x32xf32>
    %378 = vector.extract_strided_slice %373 {offsets = [0, 0], sizes = [4, 32], strides = [1, 1]} : vector<4x96xf32> to vector<4x32xf32>
    %379 = arith.mulf %378, %375 : vector<4x32xf32>
    %380 = arith.addf %377, %379 : vector<4x32xf32>
    %381 = vector.extract_strided_slice %373 {offsets = [0, 64], sizes = [4, 32], strides = [1, 1]} : vector<4x96xf32> to vector<4x32xf32>
    %382 = math.tanh %380 : vector<4x32xf32>
    %383 = arith.mulf %381, %382 : vector<4x32xf32>
    %384 = tpu.concatenate %365, %383 in 1 : vector<4x32xf32>, vector<4x32xf32> -> vector<4x64xf32>
    %c28_112 = arith.constant 28 : index
    %c0_113 = arith.constant 0 : index
    %385 = vector.load %arg11[%c28_112, %c0_113] : memref<64x64xf32, #tpu.memory_space<vmem>>, vector<4x32xf32>
    tpu.vector_store %arg11[%c28_112, %c0_113], %365 {strides = array<i32>} : memref<64x64xf32, #tpu.memory_space<vmem>>, vector<4x32xf32>,
    %c32_114 = arith.constant 32 : index
    %c32_115 = arith.constant 32 : index
    %386 = vector.load %arg11[%c32_114, %c32_115] : memref<64x64xf32, #tpu.memory_space<vmem>>, vector<4x32xf32>
    tpu.vector_store %arg11[%c32_114, %c32_115], %383 {strides = array<i32>} : memref<64x64xf32, #tpu.memory_space<vmem>>, vector<4x32xf32>,
    %387 = arith.truncf %384 : vector<4x64xf32> to vector<4x64xbf16>
    %cst_116 = arith.constant dense<0.000000e+00> : vector<4x256xf32>
    %388 = tpu.matmul %387, %7, %cst_116 {dimension_numbers = #tpu.dot_dimension_numbers<[1], [0], [0], [1], [0, 0, 1, 1], [], []>} : vector<4x64xbf16>, vector<64x256xbf16>, vector<4x256xf32> -> vector<4x256xf32>
    %c32_117 = arith.constant 32 : index
    %c0_118 = arith.constant 0 : index
    %389 = vector.load %arg10[%c32_117, %c0_118] : memref<64x256xf32, #tpu.memory_space<vmem>>, vector<4x128xf32>
    %390 = vector.extract_strided_slice %388 {offsets = [0, 0], sizes = [4, 128], strides = [1, 1]} : vector<4x256xf32> to vector<4x128xf32>
    %391 = arith.addf %389, %390 : vector<4x128xf32>
    %c28_119 = arith.constant 28 : index
    %c128_120 = arith.constant 128 : index
    %392 = vector.load %arg10[%c28_119, %c128_120] : memref<64x256xf32, #tpu.memory_space<vmem>>, vector<4x128xf32>
    %393 = vector.extract_strided_slice %388 {offsets = [0, 128], sizes = [4, 128], strides = [1, 1]} : vector<4x256xf32> to vector<4x128xf32>
    %394 = arith.addf %392, %393 : vector<4x128xf32>
    %395 = vector.extract_strided_slice %391 {offsets = [0, 0], sizes = [4, 96], strides = [1, 1]} : vector<4x128xf32> to vector<4x96xf32>
    %cst_121 = arith.constant 5.000000e-01 : f32
    %396 = vector.broadcast %cst_121 : f32 to vector<4x96xf32>
    %397 = arith.mulf %396, %395 : vector<4x96xf32>
    %398 = math.tanh %397 : vector<4x96xf32>
    %cst_122 = arith.constant 5.000000e-01 : f32
    %399 = vector.broadcast %cst_122 : f32 to vector<4x96xf32>
    %400 = arith.mulf %399, %398 : vector<4x96xf32>
    %cst_123 = arith.constant 5.000000e-01 : f32
    %401 = vector.broadcast %cst_123 : f32 to vector<4x96xf32>
    %402 = arith.addf %400, %401 : vector<4x96xf32>
    %403 = vector.extract_strided_slice %391 {offsets = [0, 96], sizes = [4, 32], strides = [1, 1]} : vector<4x128xf32> to vector<4x32xf32>
    %404 = math.tanh %403 : vector<4x32xf32>
    %405 = vector.extract_strided_slice %402 {offsets = [0, 32], sizes = [4, 32], strides = [1, 1]} : vector<4x96xf32> to vector<4x32xf32>
    %406 = arith.mulf %405, %362 : vector<4x32xf32>
    %407 = vector.extract_strided_slice %402 {offsets = [0, 0], sizes = [4, 32], strides = [1, 1]} : vector<4x96xf32> to vector<4x32xf32>
    %408 = arith.mulf %407, %404 : vector<4x32xf32>
    %409 = arith.addf %406, %408 : vector<4x32xf32>
    %410 = vector.extract_strided_slice %402 {offsets = [0, 64], sizes = [4, 32], strides = [1, 1]} : vector<4x96xf32> to vector<4x32xf32>
    %411 = math.tanh %409 : vector<4x32xf32>
    %412 = arith.mulf %410, %411 : vector<4x32xf32>
    %413 = vector.extract_strided_slice %394 {offsets = [0, 0], sizes = [4, 96], strides = [1, 1]} : vector<4x128xf32> to vector<4x96xf32>
    %cst_124 = arith.constant 5.000000e-01 : f32
    %414 = vector.broadcast %cst_124 : f32 to vector<4x96xf32>
    %415 = arith.mulf %414, %413 : vector<4x96xf32>
    %416 = math.tanh %415 : vector<4x96xf32>
    %cst_125 = arith.constant 5.000000e-01 : f32
    %417 = vector.broadcast %cst_125 : f32 to vector<4x96xf32>
    %418 = arith.mulf %417, %416 : vector<4x96xf32>
    %cst_126 = arith.constant 5.000000e-01 : f32
    %419 = vector.broadcast %cst_126 : f32 to vector<4x96xf32>
    %420 = arith.addf %418, %419 : vector<4x96xf32>
    %421 = vector.extract_strided_slice %394 {offsets = [0, 96], sizes = [4, 32], strides = [1, 1]} : vector<4x128xf32> to vector<4x32xf32>
    %422 = math.tanh %421 : vector<4x32xf32>
    %423 = vector.extract_strided_slice %420 {offsets = [0, 32], sizes = [4, 32], strides = [1, 1]} : vector<4x96xf32> to vector<4x32xf32>
    %424 = arith.mulf %423, %380 : vector<4x32xf32>
    %425 = vector.extract_strided_slice %420 {offsets = [0, 0], sizes = [4, 32], strides = [1, 1]} : vector<4x96xf32> to vector<4x32xf32>
    %426 = arith.mulf %425, %422 : vector<4x32xf32>
    %427 = arith.addf %424, %426 : vector<4x32xf32>
    %428 = vector.extract_strided_slice %420 {offsets = [0, 64], sizes = [4, 32], strides = [1, 1]} : vector<4x96xf32> to vector<4x32xf32>
    %429 = math.tanh %427 : vector<4x32xf32>
    %430 = arith.mulf %428, %429 : vector<4x32xf32>
    %431 = tpu.concatenate %412, %430 in 1 : vector<4x32xf32>, vector<4x32xf32> -> vector<4x64xf32>
    %c32_127 = arith.constant 32 : index
    %c0_128 = arith.constant 0 : index
    %432 = vector.load %arg11[%c32_127, %c0_128] : memref<64x64xf32, #tpu.memory_space<vmem>>, vector<4x32xf32>
    tpu.vector_store %arg11[%c32_127, %c0_128], %412 {strides = array<i32>} : memref<64x64xf32, #tpu.memory_space<vmem>>, vector<4x32xf32>,
    %c28_129 = arith.constant 28 : index
    %c32_130 = arith.constant 32 : index
    %433 = vector.load %arg11[%c28_129, %c32_130] : memref<64x64xf32, #tpu.memory_space<vmem>>, vector<4x32xf32>
    tpu.vector_store %arg11[%c28_129, %c32_130], %430 {strides = array<i32>} : memref<64x64xf32, #tpu.memory_space<vmem>>, vector<4x32xf32>,
    %434 = arith.truncf %431 : vector<4x64xf32> to vector<4x64xbf16>
    %cst_131 = arith.constant dense<0.000000e+00> : vector<4x256xf32>
    %435 = tpu.matmul %434, %7, %cst_131 {dimension_numbers = #tpu.dot_dimension_numbers<[1], [0], [0], [1], [0, 0, 1, 1], [], []>} : vector<4x64xbf16>, vector<64x256xbf16>, vector<4x256xf32> -> vector<4x256xf32>
    %c36_132 = arith.constant 36 : index
    %c0_133 = arith.constant 0 : index
    %436 = vector.load %arg10[%c36_132, %c0_133] : memref<64x256xf32, #tpu.memory_space<vmem>>, vector<4x128xf32>
    %437 = vector.extract_strided_slice %435 {offsets = [0, 0], sizes = [4, 128], strides = [1, 1]} : vector<4x256xf32> to vector<4x128xf32>
    %438 = arith.addf %436, %437 : vector<4x128xf32>
    %c24_134 = arith.constant 24 : index
    %c128_135 = arith.constant 128 : index
    %439 = vector.load %arg10[%c24_134, %c128_135] : memref<64x256xf32, #tpu.memory_space<vmem>>, vector<4x128xf32>
    %440 = vector.extract_strided_slice %435 {offsets = [0, 128], sizes = [4, 128], strides = [1, 1]} : vector<4x256xf32> to vector<4x128xf32>
    %441 = arith.addf %439, %440 : vector<4x128xf32>
    %442 = vector.extract_strided_slice %438 {offsets = [0, 0], sizes = [4, 96], strides = [1, 1]} : vector<4x128xf32> to vector<4x96xf32>
    %cst_136 = arith.constant 5.000000e-01 : f32
    %443 = vector.broadcast %cst_136 : f32 to vector<4x96xf32>
    %444 = arith.mulf %443, %442 : vector<4x96xf32>
    %445 = math.tanh %444 : vector<4x96xf32>
    %cst_137 = arith.constant 5.000000e-01 : f32
    %446 = vector.broadcast %cst_137 : f32 to vector<4x96xf32>
    %447 = arith.mulf %446, %445 : vector<4x96xf32>
    %cst_138 = arith.constant 5.000000e-01 : f32
    %448 = vector.broadcast %cst_138 : f32 to vector<4x96xf32>
    %449 = arith.addf %447, %448 : vector<4x96xf32>
    %450 = vector.extract_strided_slice %438 {offsets = [0, 96], sizes = [4, 32], strides = [1, 1]} : vector<4x128xf32> to vector<4x32xf32>
    %451 = math.tanh %450 : vector<4x32xf32>
    %452 = vector.extract_strided_slice %449 {offsets = [0, 32], sizes = [4, 32], strides = [1, 1]} : vector<4x96xf32> to vector<4x32xf32>
    %453 = arith.mulf %452, %409 : vector<4x32xf32>
    %454 = vector.extract_strided_slice %449 {offsets = [0, 0], sizes = [4, 32], strides = [1, 1]} : vector<4x96xf32> to vector<4x32xf32>
    %455 = arith.mulf %454, %451 : vector<4x32xf32>
    %456 = arith.addf %453, %455 : vector<4x32xf32>
    %457 = vector.extract_strided_slice %449 {offsets = [0, 64], sizes = [4, 32], strides = [1, 1]} : vector<4x96xf32> to vector<4x32xf32>
    %458 = math.tanh %456 : vector<4x32xf32>
    %459 = arith.mulf %457, %458 : vector<4x32xf32>
    %460 = vector.extract_strided_slice %441 {offsets = [0, 0], sizes = [4, 96], strides = [1, 1]} : vector<4x128xf32> to vector<4x96xf32>
    %cst_139 = arith.constant 5.000000e-01 : f32
    %461 = vector.broadcast %cst_139 : f32 to vector<4x96xf32>
    %462 = arith.mulf %461, %460 : vector<4x96xf32>
    %463 = math.tanh %462 : vector<4x96xf32>
    %cst_140 = arith.constant 5.000000e-01 : f32
    %464 = vector.broadcast %cst_140 : f32 to vector<4x96xf32>
    %465 = arith.mulf %464, %463 : vector<4x96xf32>
    %cst_141 = arith.constant 5.000000e-01 : f32
    %466 = vector.broadcast %cst_141 : f32 to vector<4x96xf32>
    %467 = arith.addf %465, %466 : vector<4x96xf32>
    %468 = vector.extract_strided_slice %441 {offsets = [0, 96], sizes = [4, 32], strides = [1, 1]} : vector<4x128xf32> to vector<4x32xf32>
    %469 = math.tanh %468 : vector<4x32xf32>
    %470 = vector.extract_strided_slice %467 {offsets = [0, 32], sizes = [4, 32], strides = [1, 1]} : vector<4x96xf32> to vector<4x32xf32>
    %471 = arith.mulf %470, %427 : vector<4x32xf32>
    %472 = vector.extract_strided_slice %467 {offsets = [0, 0], sizes = [4, 32], strides = [1, 1]} : vector<4x96xf32> to vector<4x32xf32>
    %473 = arith.mulf %472, %469 : vector<4x32xf32>
    %474 = arith.addf %471, %473 : vector<4x32xf32>
    %475 = vector.extract_strided_slice %467 {offsets = [0, 64], sizes = [4, 32], strides = [1, 1]} : vector<4x96xf32> to vector<4x32xf32>
    %476 = math.tanh %474 : vector<4x32xf32>
    %477 = arith.mulf %475, %476 : vector<4x32xf32>
    %478 = tpu.concatenate %459, %477 in 1 : vector<4x32xf32>, vector<4x32xf32> -> vector<4x64xf32>
    %c36_142 = arith.constant 36 : index
    %c0_143 = arith.constant 0 : index
    %479 = vector.load %arg11[%c36_142, %c0_143] : memref<64x64xf32, #tpu.memory_space<vmem>>, vector<4x32xf32>
    tpu.vector_store %arg11[%c36_142, %c0_143], %459 {strides = array<i32>} : memref<64x64xf32, #tpu.memory_space<vmem>>, vector<4x32xf32>,
    %c24_144 = arith.constant 24 : index
    %c32_145 = arith.constant 32 : index
    %480 = vector.load %arg11[%c24_144, %c32_145] : memref<64x64xf32, #tpu.memory_space<vmem>>, vector<4x32xf32>
    tpu.vector_store %arg11[%c24_144, %c32_145], %477 {strides = array<i32>} : memref<64x64xf32, #tpu.memory_space<vmem>>, vector<4x32xf32>,
    %481 = arith.truncf %478 : vector<4x64xf32> to vector<4x64xbf16>
    %cst_146 = arith.constant dense<0.000000e+00> : vector<4x256xf32>
    %482 = tpu.matmul %481, %7, %cst_146 {dimension_numbers = #tpu.dot_dimension_numbers<[1], [0], [0], [1], [0, 0, 1, 1], [], []>} : vector<4x64xbf16>, vector<64x256xbf16>, vector<4x256xf32> -> vector<4x256xf32>
    %c40_147 = arith.constant 40 : index
    %c0_148 = arith.constant 0 : index
    %483 = vector.load %arg10[%c40_147, %c0_148] : memref<64x256xf32, #tpu.memory_space<vmem>>, vector<4x128xf32>
    %484 = vector.extract_strided_slice %482 {offsets = [0, 0], sizes = [4, 128], strides = [1, 1]} : vector<4x256xf32> to vector<4x128xf32>
    %485 = arith.addf %483, %484 : vector<4x128xf32>
    %c20_149 = arith.constant 20 : index
    %c128_150 = arith.constant 128 : index
    %486 = vector.load %arg10[%c20_149, %c128_150] : memref<64x256xf32, #tpu.memory_space<vmem>>, vector<4x128xf32>
    %487 = vector.extract_strided_slice %482 {offsets = [0, 128], sizes = [4, 128], strides = [1, 1]} : vector<4x256xf32> to vector<4x128xf32>
    %488 = arith.addf %486, %487 : vector<4x128xf32>
    %489 = vector.extract_strided_slice %485 {offsets = [0, 0], sizes = [4, 96], strides = [1, 1]} : vector<4x128xf32> to vector<4x96xf32>
    %cst_151 = arith.constant 5.000000e-01 : f32
    %490 = vector.broadcast %cst_151 : f32 to vector<4x96xf32>
    %491 = arith.mulf %490, %489 : vector<4x96xf32>
    %492 = math.tanh %491 : vector<4x96xf32>
    %cst_152 = arith.constant 5.000000e-01 : f32
    %493 = vector.broadcast %cst_152 : f32 to vector<4x96xf32>
    %494 = arith.mulf %493, %492 : vector<4x96xf32>
    %cst_153 = arith.constant 5.000000e-01 : f32
    %495 = vector.broadcast %cst_153 : f32 to vector<4x96xf32>
    %496 = arith.addf %494, %495 : vector<4x96xf32>
    %497 = vector.extract_strided_slice %485 {offsets = [0, 96], sizes = [4, 32], strides = [1, 1]} : vector<4x128xf32> to vector<4x32xf32>
    %498 = math.tanh %497 : vector<4x32xf32>
    %499 = vector.extract_strided_slice %496 {offsets = [0, 32], sizes = [4, 32], strides = [1, 1]} : vector<4x96xf32> to vector<4x32xf32>
    %500 = arith.mulf %499, %456 : vector<4x32xf32>
    %501 = vector.extract_strided_slice %496 {offsets = [0, 0], sizes = [4, 32], strides = [1, 1]} : vector<4x96xf32> to vector<4x32xf32>
    %502 = arith.mulf %501, %498 : vector<4x32xf32>
    %503 = arith.addf %500, %502 : vector<4x32xf32>
    %504 = vector.extract_strided_slice %496 {offsets = [0, 64], sizes = [4, 32], strides = [1, 1]} : vector<4x96xf32> to vector<4x32xf32>
    %505 = math.tanh %503 : vector<4x32xf32>
    %506 = arith.mulf %504, %505 : vector<4x32xf32>
    %507 = vector.extract_strided_slice %488 {offsets = [0, 0], sizes = [4, 96], strides = [1, 1]} : vector<4x128xf32> to vector<4x96xf32>
    %cst_154 = arith.constant 5.000000e-01 : f32
    %508 = vector.broadcast %cst_154 : f32 to vector<4x96xf32>
    %509 = arith.mulf %508, %507 : vector<4x96xf32>
    %510 = math.tanh %509 : vector<4x96xf32>
    %cst_155 = arith.constant 5.000000e-01 : f32
    %511 = vector.broadcast %cst_155 : f32 to vector<4x96xf32>
    %512 = arith.mulf %511, %510 : vector<4x96xf32>
    %cst_156 = arith.constant 5.000000e-01 : f32
    %513 = vector.broadcast %cst_156 : f32 to vector<4x96xf32>
    %514 = arith.addf %512, %513 : vector<4x96xf32>
    %515 = vector.extract_strided_slice %488 {offsets = [0, 96], sizes = [4, 32], strides = [1, 1]} : vector<4x128xf32> to vector<4x32xf32>
    %516 = math.tanh %515 : vector<4x32xf32>
    %517 = vector.extract_strided_slice %514 {offsets = [0, 32], sizes = [4, 32], strides = [1, 1]} : vector<4x96xf32> to vector<4x32xf32>
    %518 = arith.mulf %517, %474 : vector<4x32xf32>
    %519 = vector.extract_strided_slice %514 {offsets = [0, 0], sizes = [4, 32], strides = [1, 1]} : vector<4x96xf32> to vector<4x32xf32>
    %520 = arith.mulf %519, %516 : vector<4x32xf32>
    %521 = arith.addf %518, %520 : vector<4x32xf32>
    %522 = vector.extract_strided_slice %514 {offsets = [0, 64], sizes = [4, 32], strides = [1, 1]} : vector<4x96xf32> to vector<4x32xf32>
    %523 = math.tanh %521 : vector<4x32xf32>
    %524 = arith.mulf %522, %523 : vector<4x32xf32>
    %525 = tpu.concatenate %506, %524 in 1 : vector<4x32xf32>, vector<4x32xf32> -> vector<4x64xf32>
    %c40_157 = arith.constant 40 : index
    %c0_158 = arith.constant 0 : index
    %526 = vector.load %arg11[%c40_157, %c0_158] : memref<64x64xf32, #tpu.memory_space<vmem>>, vector<4x32xf32>
    tpu.vector_store %arg11[%c40_157, %c0_158], %506 {strides = array<i32>} : memref<64x64xf32, #tpu.memory_space<vmem>>, vector<4x32xf32>,
    %c20_159 = arith.constant 20 : index
    %c32_160 = arith.constant 32 : index
    %527 = vector.load %arg11[%c20_159, %c32_160] : memref<64x64xf32, #tpu.memory_space<vmem>>, vector<4x32xf32>
    tpu.vector_store %arg11[%c20_159, %c32_160], %524 {strides = array<i32>} : memref<64x64xf32, #tpu.memory_space<vmem>>, vector<4x32xf32>,
    %528 = arith.truncf %525 : vector<4x64xf32> to vector<4x64xbf16>
    %cst_161 = arith.constant dense<0.000000e+00> : vector<4x256xf32>
    %529 = tpu.matmul %528, %7, %cst_161 {dimension_numbers = #tpu.dot_dimension_numbers<[1], [0], [0], [1], [0, 0, 1, 1], [], []>} : vector<4x64xbf16>, vector<64x256xbf16>, vector<4x256xf32> -> vector<4x256xf32>
    %c44_162 = arith.constant 44 : index
    %c0_163 = arith.constant 0 : index
    %530 = vector.load %arg10[%c44_162, %c0_163] : memref<64x256xf32, #tpu.memory_space<vmem>>, vector<4x128xf32>
    %531 = vector.extract_strided_slice %529 {offsets = [0, 0], sizes = [4, 128], strides = [1, 1]} : vector<4x256xf32> to vector<4x128xf32>
    %532 = arith.addf %530, %531 : vector<4x128xf32>
    %c16_164 = arith.constant 16 : index
    %c128_165 = arith.constant 128 : index
    %533 = vector.load %arg10[%c16_164, %c128_165] : memref<64x256xf32, #tpu.memory_space<vmem>>, vector<4x128xf32>
    %534 = vector.extract_strided_slice %529 {offsets = [0, 128], sizes = [4, 128], strides = [1, 1]} : vector<4x256xf32> to vector<4x128xf32>
    %535 = arith.addf %533, %534 : vector<4x128xf32>
    %536 = vector.extract_strided_slice %532 {offsets = [0, 0], sizes = [4, 96], strides = [1, 1]} : vector<4x128xf32> to vector<4x96xf32>
    %cst_166 = arith.constant 5.000000e-01 : f32
    %537 = vector.broadcast %cst_166 : f32 to vector<4x96xf32>
    %538 = arith.mulf %537, %536 : vector<4x96xf32>
    %539 = math.tanh %538 : vector<4x96xf32>
    %cst_167 = arith.constant 5.000000e-01 : f32
    %540 = vector.broadcast %cst_167 : f32 to vector<4x96xf32>
    %541 = arith.mulf %540, %539 : vector<4x96xf32>
    %cst_168 = arith.constant 5.000000e-01 : f32
    %542 = vector.broadcast %cst_168 : f32 to vector<4x96xf32>
    %543 = arith.addf %541, %542 : vector<4x96xf32>
    %544 = vector.extract_strided_slice %532 {offsets = [0, 96], sizes = [4, 32], strides = [1, 1]} : vector<4x128xf32> to vector<4x32xf32>
    %545 = math.tanh %544 : vector<4x32xf32>
    %546 = vector.extract_strided_slice %543 {offsets = [0, 32], sizes = [4, 32], strides = [1, 1]} : vector<4x96xf32> to vector<4x32xf32>
    %547 = arith.mulf %546, %503 : vector<4x32xf32>
    %548 = vector.extract_strided_slice %543 {offsets = [0, 0], sizes = [4, 32], strides = [1, 1]} : vector<4x96xf32> to vector<4x32xf32>
    %549 = arith.mulf %548, %545 : vector<4x32xf32>
    %550 = arith.addf %547, %549 : vector<4x32xf32>
    %551 = vector.extract_strided_slice %543 {offsets = [0, 64], sizes = [4, 32], strides = [1, 1]} : vector<4x96xf32> to vector<4x32xf32>
    %552 = math.tanh %550 : vector<4x32xf32>
    %553 = arith.mulf %551, %552 : vector<4x32xf32>
    %554 = vector.extract_strided_slice %535 {offsets = [0, 0], sizes = [4, 96], strides = [1, 1]} : vector<4x128xf32> to vector<4x96xf32>
    %cst_169 = arith.constant 5.000000e-01 : f32
    %555 = vector.broadcast %cst_169 : f32 to vector<4x96xf32>
    %556 = arith.mulf %555, %554 : vector<4x96xf32>
    %557 = math.tanh %556 : vector<4x96xf32>
    %cst_170 = arith.constant 5.000000e-01 : f32
    %558 = vector.broadcast %cst_170 : f32 to vector<4x96xf32>
    %559 = arith.mulf %558, %557 : vector<4x96xf32>
    %cst_171 = arith.constant 5.000000e-01 : f32
    %560 = vector.broadcast %cst_171 : f32 to vector<4x96xf32>
    %561 = arith.addf %559, %560 : vector<4x96xf32>
    %562 = vector.extract_strided_slice %535 {offsets = [0, 96], sizes = [4, 32], strides = [1, 1]} : vector<4x128xf32> to vector<4x32xf32>
    %563 = math.tanh %562 : vector<4x32xf32>
    %564 = vector.extract_strided_slice %561 {offsets = [0, 32], sizes = [4, 32], strides = [1, 1]} : vector<4x96xf32> to vector<4x32xf32>
    %565 = arith.mulf %564, %521 : vector<4x32xf32>
    %566 = vector.extract_strided_slice %561 {offsets = [0, 0], sizes = [4, 32], strides = [1, 1]} : vector<4x96xf32> to vector<4x32xf32>
    %567 = arith.mulf %566, %563 : vector<4x32xf32>
    %568 = arith.addf %565, %567 : vector<4x32xf32>
    %569 = vector.extract_strided_slice %561 {offsets = [0, 64], sizes = [4, 32], strides = [1, 1]} : vector<4x96xf32> to vector<4x32xf32>
    %570 = math.tanh %568 : vector<4x32xf32>
    %571 = arith.mulf %569, %570 : vector<4x32xf32>
    %572 = tpu.concatenate %553, %571 in 1 : vector<4x32xf32>, vector<4x32xf32> -> vector<4x64xf32>
    %c44_172 = arith.constant 44 : index
    %c0_173 = arith.constant 0 : index
    %573 = vector.load %arg11[%c44_172, %c0_173] : memref<64x64xf32, #tpu.memory_space<vmem>>, vector<4x32xf32>
    tpu.vector_store %arg11[%c44_172, %c0_173], %553 {strides = array<i32>} : memref<64x64xf32, #tpu.memory_space<vmem>>, vector<4x32xf32>,
    %c16_174 = arith.constant 16 : index
    %c32_175 = arith.constant 32 : index
    %574 = vector.load %arg11[%c16_174, %c32_175] : memref<64x64xf32, #tpu.memory_space<vmem>>, vector<4x32xf32>
    tpu.vector_store %arg11[%c16_174, %c32_175], %571 {strides = array<i32>} : memref<64x64xf32, #tpu.memory_space<vmem>>, vector<4x32xf32>,
    %575 = arith.truncf %572 : vector<4x64xf32> to vector<4x64xbf16>
    %cst_176 = arith.constant dense<0.000000e+00> : vector<4x256xf32>
    %576 = tpu.matmul %575, %7, %cst_176 {dimension_numbers = #tpu.dot_dimension_numbers<[1], [0], [0], [1], [0, 0, 1, 1], [], []>} : vector<4x64xbf16>, vector<64x256xbf16>, vector<4x256xf32> -> vector<4x256xf32>
    %c48_177 = arith.constant 48 : index
    %c0_178 = arith.constant 0 : index
    %577 = vector.load %arg10[%c48_177, %c0_178] : memref<64x256xf32, #tpu.memory_space<vmem>>, vector<4x128xf32>
    %578 = vector.extract_strided_slice %576 {offsets = [0, 0], sizes = [4, 128], strides = [1, 1]} : vector<4x256xf32> to vector<4x128xf32>
    %579 = arith.addf %577, %578 : vector<4x128xf32>
    %c12_179 = arith.constant 12 : index
    %c128_180 = arith.constant 128 : index
    %580 = vector.load %arg10[%c12_179, %c128_180] : memref<64x256xf32, #tpu.memory_space<vmem>>, vector<4x128xf32>
    %581 = vector.extract_strided_slice %576 {offsets = [0, 128], sizes = [4, 128], strides = [1, 1]} : vector<4x256xf32> to vector<4x128xf32>
    %582 = arith.addf %580, %581 : vector<4x128xf32>
    %583 = vector.extract_strided_slice %579 {offsets = [0, 0], sizes = [4, 96], strides = [1, 1]} : vector<4x128xf32> to vector<4x96xf32>
    %cst_181 = arith.constant 5.000000e-01 : f32
    %584 = vector.broadcast %cst_181 : f32 to vector<4x96xf32>
    %585 = arith.mulf %584, %583 : vector<4x96xf32>
    %586 = math.tanh %585 : vector<4x96xf32>
    %cst_182 = arith.constant 5.000000e-01 : f32
    %587 = vector.broadcast %cst_182 : f32 to vector<4x96xf32>
    %588 = arith.mulf %587, %586 : vector<4x96xf32>
    %cst_183 = arith.constant 5.000000e-01 : f32
    %589 = vector.broadcast %cst_183 : f32 to vector<4x96xf32>
    %590 = arith.addf %588, %589 : vector<4x96xf32>
    %591 = vector.extract_strided_slice %579 {offsets = [0, 96], sizes = [4, 32], strides = [1, 1]} : vector<4x128xf32> to vector<4x32xf32>
    %592 = math.tanh %591 : vector<4x32xf32>
    %593 = vector.extract_strided_slice %590 {offsets = [0, 32], sizes = [4, 32], strides = [1, 1]} : vector<4x96xf32> to vector<4x32xf32>
    %594 = arith.mulf %593, %550 : vector<4x32xf32>
    %595 = vector.extract_strided_slice %590 {offsets = [0, 0], sizes = [4, 32], strides = [1, 1]} : vector<4x96xf32> to vector<4x32xf32>
    %596 = arith.mulf %595, %592 : vector<4x32xf32>
    %597 = arith.addf %594, %596 : vector<4x32xf32>
    %598 = vector.extract_strided_slice %590 {offsets = [0, 64], sizes = [4, 32], strides = [1, 1]} : vector<4x96xf32> to vector<4x32xf32>
    %599 = math.tanh %597 : vector<4x32xf32>
    %600 = arith.mulf %598, %599 : vector<4x32xf32>
    %601 = vector.extract_strided_slice %582 {offsets = [0, 0], sizes = [4, 96], strides = [1, 1]} : vector<4x128xf32> to vector<4x96xf32>
    %cst_184 = arith.constant 5.000000e-01 : f32
    %602 = vector.broadcast %cst_184 : f32 to vector<4x96xf32>
    %603 = arith.mulf %602, %601 : vector<4x96xf32>
    %604 = math.tanh %603 : vector<4x96xf32>
    %cst_185 = arith.constant 5.000000e-01 : f32
    %605 = vector.broadcast %cst_185 : f32 to vector<4x96xf32>
    %606 = arith.mulf %605, %604 : vector<4x96xf32>
    %cst_186 = arith.constant 5.000000e-01 : f32
    %607 = vector.broadcast %cst_186 : f32 to vector<4x96xf32>
    %608 = arith.addf %606, %607 : vector<4x96xf32>
    %609 = vector.extract_strided_slice %582 {offsets = [0, 96], sizes = [4, 32], strides = [1, 1]} : vector<4x128xf32> to vector<4x32xf32>
    %610 = math.tanh %609 : vector<4x32xf32>
    %611 = vector.extract_strided_slice %608 {offsets = [0, 32], sizes = [4, 32], strides = [1, 1]} : vector<4x96xf32> to vector<4x32xf32>
    %612 = arith.mulf %611, %568 : vector<4x32xf32>
    %613 = vector.extract_strided_slice %608 {offsets = [0, 0], sizes = [4, 32], strides = [1, 1]} : vector<4x96xf32> to vector<4x32xf32>
    %614 = arith.mulf %613, %610 : vector<4x32xf32>
    %615 = arith.addf %612, %614 : vector<4x32xf32>
    %616 = vector.extract_strided_slice %608 {offsets = [0, 64], sizes = [4, 32], strides = [1, 1]} : vector<4x96xf32> to vector<4x32xf32>
    %617 = math.tanh %615 : vector<4x32xf32>
    %618 = arith.mulf %616, %617 : vector<4x32xf32>
    %619 = tpu.concatenate %600, %618 in 1 : vector<4x32xf32>, vector<4x32xf32> -> vector<4x64xf32>
    %c48_187 = arith.constant 48 : index
    %c0_188 = arith.constant 0 : index
    %620 = vector.load %arg11[%c48_187, %c0_188] : memref<64x64xf32, #tpu.memory_space<vmem>>, vector<4x32xf32>
    tpu.vector_store %arg11[%c48_187, %c0_188], %600 {strides = array<i32>} : memref<64x64xf32, #tpu.memory_space<vmem>>, vector<4x32xf32>,
    %c12_189 = arith.constant 12 : index
    %c32_190 = arith.constant 32 : index
    %621 = vector.load %arg11[%c12_189, %c32_190] : memref<64x64xf32, #tpu.memory_space<vmem>>, vector<4x32xf32>
    tpu.vector_store %arg11[%c12_189, %c32_190], %618 {strides = array<i32>} : memref<64x64xf32, #tpu.memory_space<vmem>>, vector<4x32xf32>,
    %622 = arith.truncf %619 : vector<4x64xf32> to vector<4x64xbf16>
    %cst_191 = arith.constant dense<0.000000e+00> : vector<4x256xf32>
    %623 = tpu.matmul %622, %7, %cst_191 {dimension_numbers = #tpu.dot_dimension_numbers<[1], [0], [0], [1], [0, 0, 1, 1], [], []>} : vector<4x64xbf16>, vector<64x256xbf16>, vector<4x256xf32> -> vector<4x256xf32>
    %c52_192 = arith.constant 52 : index
    %c0_193 = arith.constant 0 : index
    %624 = vector.load %arg10[%c52_192, %c0_193] : memref<64x256xf32, #tpu.memory_space<vmem>>, vector<4x128xf32>
    %625 = vector.extract_strided_slice %623 {offsets = [0, 0], sizes = [4, 128], strides = [1, 1]} : vector<4x256xf32> to vector<4x128xf32>
    %626 = arith.addf %624, %625 : vector<4x128xf32>
    %c8_194 = arith.constant 8 : index
    %c128_195 = arith.constant 128 : index
    %627 = vector.load %arg10[%c8_194, %c128_195] : memref<64x256xf32, #tpu.memory_space<vmem>>, vector<4x128xf32>
    %628 = vector.extract_strided_slice %623 {offsets = [0, 128], sizes = [4, 128], strides = [1, 1]} : vector<4x256xf32> to vector<4x128xf32>
    %629 = arith.addf %627, %628 : vector<4x128xf32>
    %630 = vector.extract_strided_slice %626 {offsets = [0, 0], sizes = [4, 96], strides = [1, 1]} : vector<4x128xf32> to vector<4x96xf32>
    %cst_196 = arith.constant 5.000000e-01 : f32
    %631 = vector.broadcast %cst_196 : f32 to vector<4x96xf32>
    %632 = arith.mulf %631, %630 : vector<4x96xf32>
    %633 = math.tanh %632 : vector<4x96xf32>
    %cst_197 = arith.constant 5.000000e-01 : f32
    %634 = vector.broadcast %cst_197 : f32 to vector<4x96xf32>
    %635 = arith.mulf %634, %633 : vector<4x96xf32>
    %cst_198 = arith.constant 5.000000e-01 : f32
    %636 = vector.broadcast %cst_198 : f32 to vector<4x96xf32>
    %637 = arith.addf %635, %636 : vector<4x96xf32>
    %638 = vector.extract_strided_slice %626 {offsets = [0, 96], sizes = [4, 32], strides = [1, 1]} : vector<4x128xf32> to vector<4x32xf32>
    %639 = math.tanh %638 : vector<4x32xf32>
    %640 = vector.extract_strided_slice %637 {offsets = [0, 32], sizes = [4, 32], strides = [1, 1]} : vector<4x96xf32> to vector<4x32xf32>
    %641 = arith.mulf %640, %597 : vector<4x32xf32>
    %642 = vector.extract_strided_slice %637 {offsets = [0, 0], sizes = [4, 32], strides = [1, 1]} : vector<4x96xf32> to vector<4x32xf32>
    %643 = arith.mulf %642, %639 : vector<4x32xf32>
    %644 = arith.addf %641, %643 : vector<4x32xf32>
    %645 = vector.extract_strided_slice %637 {offsets = [0, 64], sizes = [4, 32], strides = [1, 1]} : vector<4x96xf32> to vector<4x32xf32>
    %646 = math.tanh %644 : vector<4x32xf32>
    %647 = arith.mulf %645, %646 : vector<4x32xf32>
    %648 = vector.extract_strided_slice %629 {offsets = [0, 0], sizes = [4, 96], strides = [1, 1]} : vector<4x128xf32> to vector<4x96xf32>
    %cst_199 = arith.constant 5.000000e-01 : f32
    %649 = vector.broadcast %cst_199 : f32 to vector<4x96xf32>
    %650 = arith.mulf %649, %648 : vector<4x96xf32>
    %651 = math.tanh %650 : vector<4x96xf32>
    %cst_200 = arith.constant 5.000000e-01 : f32
    %652 = vector.broadcast %cst_200 : f32 to vector<4x96xf32>
    %653 = arith.mulf %652, %651 : vector<4x96xf32>
    %cst_201 = arith.constant 5.000000e-01 : f32
    %654 = vector.broadcast %cst_201 : f32 to vector<4x96xf32>
    %655 = arith.addf %653, %654 : vector<4x96xf32>
    %656 = vector.extract_strided_slice %629 {offsets = [0, 96], sizes = [4, 32], strides = [1, 1]} : vector<4x128xf32> to vector<4x32xf32>
    %657 = math.tanh %656 : vector<4x32xf32>
    %658 = vector.extract_strided_slice %655 {offsets = [0, 32], sizes = [4, 32], strides = [1, 1]} : vector<4x96xf32> to vector<4x32xf32>
    %659 = arith.mulf %658, %615 : vector<4x32xf32>
    %660 = vector.extract_strided_slice %655 {offsets = [0, 0], sizes = [4, 32], strides = [1, 1]} : vector<4x96xf32> to vector<4x32xf32>
    %661 = arith.mulf %660, %657 : vector<4x32xf32>
    %662 = arith.addf %659, %661 : vector<4x32xf32>
    %663 = vector.extract_strided_slice %655 {offsets = [0, 64], sizes = [4, 32], strides = [1, 1]} : vector<4x96xf32> to vector<4x32xf32>
    %664 = math.tanh %662 : vector<4x32xf32>
    %665 = arith.mulf %663, %664 : vector<4x32xf32>
    %666 = tpu.concatenate %647, %665 in 1 : vector<4x32xf32>, vector<4x32xf32> -> vector<4x64xf32>
    %c52_202 = arith.constant 52 : index
    %c0_203 = arith.constant 0 : index
    %667 = vector.load %arg11[%c52_202, %c0_203] : memref<64x64xf32, #tpu.memory_space<vmem>>, vector<4x32xf32>
    tpu.vector_store %arg11[%c52_202, %c0_203], %647 {strides = array<i32>} : memref<64x64xf32, #tpu.memory_space<vmem>>, vector<4x32xf32>,
    %c8_204 = arith.constant 8 : index
    %c32_205 = arith.constant 32 : index
    %668 = vector.load %arg11[%c8_204, %c32_205] : memref<64x64xf32, #tpu.memory_space<vmem>>, vector<4x32xf32>
    tpu.vector_store %arg11[%c8_204, %c32_205], %665 {strides = array<i32>} : memref<64x64xf32, #tpu.memory_space<vmem>>, vector<4x32xf32>,
    %669 = arith.truncf %666 : vector<4x64xf32> to vector<4x64xbf16>
    %cst_206 = arith.constant dense<0.000000e+00> : vector<4x256xf32>
    %670 = tpu.matmul %669, %7, %cst_206 {dimension_numbers = #tpu.dot_dimension_numbers<[1], [0], [0], [1], [0, 0, 1, 1], [], []>} : vector<4x64xbf16>, vector<64x256xbf16>, vector<4x256xf32> -> vector<4x256xf32>
    %c56_207 = arith.constant 56 : index
    %c0_208 = arith.constant 0 : index
    %671 = vector.load %arg10[%c56_207, %c0_208] : memref<64x256xf32, #tpu.memory_space<vmem>>, vector<4x128xf32>
    %672 = vector.extract_strided_slice %670 {offsets = [0, 0], sizes = [4, 128], strides = [1, 1]} : vector<4x256xf32> to vector<4x128xf32>
    %673 = arith.addf %671, %672 : vector<4x128xf32>
    %c4_209 = arith.constant 4 : index
    %c128_210 = arith.constant 128 : index
    %674 = vector.load %arg10[%c4_209, %c128_210] : memref<64x256xf32, #tpu.memory_space<vmem>>, vector<4x128xf32>
    %675 = vector.extract_strided_slice %670 {offsets = [0, 128], sizes = [4, 128], strides = [1, 1]} : vector<4x256xf32> to vector<4x128xf32>
    %676 = arith.addf %674, %675 : vector<4x128xf32>
    %677 = vector.extract_strided_slice %673 {offsets = [0, 0], sizes = [4, 96], strides = [1, 1]} : vector<4x128xf32> to vector<4x96xf32>
    %cst_211 = arith.constant 5.000000e-01 : f32
    %678 = vector.broadcast %cst_211 : f32 to vector<4x96xf32>
    %679 = arith.mulf %678, %677 : vector<4x96xf32>
    %680 = math.tanh %679 : vector<4x96xf32>
    %cst_212 = arith.constant 5.000000e-01 : f32
    %681 = vector.broadcast %cst_212 : f32 to vector<4x96xf32>
    %682 = arith.mulf %681, %680 : vector<4x96xf32>
    %cst_213 = arith.constant 5.000000e-01 : f32
    %683 = vector.broadcast %cst_213 : f32 to vector<4x96xf32>
    %684 = arith.addf %682, %683 : vector<4x96xf32>
    %685 = vector.extract_strided_slice %673 {offsets = [0, 96], sizes = [4, 32], strides = [1, 1]} : vector<4x128xf32> to vector<4x32xf32>
    %686 = math.tanh %685 : vector<4x32xf32>
    %687 = vector.extract_strided_slice %684 {offsets = [0, 32], sizes = [4, 32], strides = [1, 1]} : vector<4x96xf32> to vector<4x32xf32>
    %688 = arith.mulf %687, %644 : vector<4x32xf32>
    %689 = vector.extract_strided_slice %684 {offsets = [0, 0], sizes = [4, 32], strides = [1, 1]} : vector<4x96xf32> to vector<4x32xf32>
    %690 = arith.mulf %689, %686 : vector<4x32xf32>
    %691 = arith.addf %688, %690 : vector<4x32xf32>
    %692 = vector.extract_strided_slice %684 {offsets = [0, 64], sizes = [4, 32], strides = [1, 1]} : vector<4x96xf32> to vector<4x32xf32>
    %693 = math.tanh %691 : vector<4x32xf32>
    %694 = arith.mulf %692, %693 : vector<4x32xf32>
    %695 = vector.extract_strided_slice %676 {offsets = [0, 0], sizes = [4, 96], strides = [1, 1]} : vector<4x128xf32> to vector<4x96xf32>
    %cst_214 = arith.constant 5.000000e-01 : f32
    %696 = vector.broadcast %cst_214 : f32 to vector<4x96xf32>
    %697 = arith.mulf %696, %695 : vector<4x96xf32>
    %698 = math.tanh %697 : vector<4x96xf32>
    %cst_215 = arith.constant 5.000000e-01 : f32
    %699 = vector.broadcast %cst_215 : f32 to vector<4x96xf32>
    %700 = arith.mulf %699, %698 : vector<4x96xf32>
    %cst_216 = arith.constant 5.000000e-01 : f32
    %701 = vector.broadcast %cst_216 : f32 to vector<4x96xf32>
    %702 = arith.addf %700, %701 : vector<4x96xf32>
    %703 = vector.extract_strided_slice %676 {offsets = [0, 96], sizes = [4, 32], strides = [1, 1]} : vector<4x128xf32> to vector<4x32xf32>
    %704 = math.tanh %703 : vector<4x32xf32>
    %705 = vector.extract_strided_slice %702 {offsets = [0, 32], sizes = [4, 32], strides = [1, 1]} : vector<4x96xf32> to vector<4x32xf32>
    %706 = arith.mulf %705, %662 : vector<4x32xf32>
    %707 = vector.extract_strided_slice %702 {offsets = [0, 0], sizes = [4, 32], strides = [1, 1]} : vector<4x96xf32> to vector<4x32xf32>
    %708 = arith.mulf %707, %704 : vector<4x32xf32>
    %709 = arith.addf %706, %708 : vector<4x32xf32>
    %710 = vector.extract_strided_slice %702 {offsets = [0, 64], sizes = [4, 32], strides = [1, 1]} : vector<4x96xf32> to vector<4x32xf32>
    %711 = math.tanh %709 : vector<4x32xf32>
    %712 = arith.mulf %710, %711 : vector<4x32xf32>
    %713 = tpu.concatenate %694, %712 in 1 : vector<4x32xf32>, vector<4x32xf32> -> vector<4x64xf32>
    %c56_217 = arith.constant 56 : index
    %c0_218 = arith.constant 0 : index
    %714 = vector.load %arg11[%c56_217, %c0_218] : memref<64x64xf32, #tpu.memory_space<vmem>>, vector<4x32xf32>
    tpu.vector_store %arg11[%c56_217, %c0_218], %694 {strides = array<i32>} : memref<64x64xf32, #tpu.memory_space<vmem>>, vector<4x32xf32>,
    %c4_219 = arith.constant 4 : index
    %c32_220 = arith.constant 32 : index
    %715 = vector.load %arg11[%c4_219, %c32_220] : memref<64x64xf32, #tpu.memory_space<vmem>>, vector<4x32xf32>
    tpu.vector_store %arg11[%c4_219, %c32_220], %712 {strides = array<i32>} : memref<64x64xf32, #tpu.memory_space<vmem>>, vector<4x32xf32>,
    %716 = arith.truncf %713 : vector<4x64xf32> to vector<4x64xbf16>
    %cst_221 = arith.constant dense<0.000000e+00> : vector<4x256xf32>
    %717 = tpu.matmul %716, %7, %cst_221 {dimension_numbers = #tpu.dot_dimension_numbers<[1], [0], [0], [1], [0, 0, 1, 1], [], []>} : vector<4x64xbf16>, vector<64x256xbf16>, vector<4x256xf32> -> vector<4x256xf32>
    %c60_222 = arith.constant 60 : index
    %c0_223 = arith.constant 0 : index
    %718 = vector.load %arg10[%c60_222, %c0_223] : memref<64x256xf32, #tpu.memory_space<vmem>>, vector<4x128xf32>
    %719 = vector.extract_strided_slice %717 {offsets = [0, 0], sizes = [4, 128], strides = [1, 1]} : vector<4x256xf32> to vector<4x128xf32>
    %720 = arith.addf %718, %719 : vector<4x128xf32>
    %c0_224 = arith.constant 0 : index
    %c128_225 = arith.constant 128 : index
    %721 = vector.load %arg10[%c0_224, %c128_225] : memref<64x256xf32, #tpu.memory_space<vmem>>, vector<4x128xf32>
    %722 = vector.extract_strided_slice %717 {offsets = [0, 128], sizes = [4, 128], strides = [1, 1]} : vector<4x256xf32> to vector<4x128xf32>
    %723 = arith.addf %721, %722 : vector<4x128xf32>
    %724 = vector.extract_strided_slice %720 {offsets = [0, 0], sizes = [4, 96], strides = [1, 1]} : vector<4x128xf32> to vector<4x96xf32>
    %cst_226 = arith.constant 5.000000e-01 : f32
    %725 = vector.broadcast %cst_226 : f32 to vector<4x96xf32>
    %726 = arith.mulf %725, %724 : vector<4x96xf32>
    %727 = math.tanh %726 : vector<4x96xf32>
    %cst_227 = arith.constant 5.000000e-01 : f32
    %728 = vector.broadcast %cst_227 : f32 to vector<4x96xf32>
    %729 = arith.mulf %728, %727 : vector<4x96xf32>
    %cst_228 = arith.constant 5.000000e-01 : f32
    %730 = vector.broadcast %cst_228 : f32 to vector<4x96xf32>
    %731 = arith.addf %729, %730 : vector<4x96xf32>
    %732 = vector.extract_strided_slice %720 {offsets = [0, 96], sizes = [4, 32], strides = [1, 1]} : vector<4x128xf32> to vector<4x32xf32>
    %733 = math.tanh %732 : vector<4x32xf32>
    %734 = vector.extract_strided_slice %731 {offsets = [0, 32], sizes = [4, 32], strides = [1, 1]} : vector<4x96xf32> to vector<4x32xf32>
    %735 = arith.mulf %734, %691 : vector<4x32xf32>
    %736 = vector.extract_strided_slice %731 {offsets = [0, 0], sizes = [4, 32], strides = [1, 1]} : vector<4x96xf32> to vector<4x32xf32>
    %737 = arith.mulf %736, %733 : vector<4x32xf32>
    %738 = arith.addf %735, %737 : vector<4x32xf32>
    %739 = vector.extract_strided_slice %731 {offsets = [0, 64], sizes = [4, 32], strides = [1, 1]} : vector<4x96xf32> to vector<4x32xf32>
    %740 = math.tanh %738 : vector<4x32xf32>
    %741 = arith.mulf %739, %740 : vector<4x32xf32>
    %742 = vector.extract_strided_slice %723 {offsets = [0, 0], sizes = [4, 96], strides = [1, 1]} : vector<4x128xf32> to vector<4x96xf32>
    %cst_229 = arith.constant 5.000000e-01 : f32
    %743 = vector.broadcast %cst_229 : f32 to vector<4x96xf32>
    %744 = arith.mulf %743, %742 : vector<4x96xf32>
    %745 = math.tanh %744 : vector<4x96xf32>
    %cst_230 = arith.constant 5.000000e-01 : f32
    %746 = vector.broadcast %cst_230 : f32 to vector<4x96xf32>
    %747 = arith.mulf %746, %745 : vector<4x96xf32>
    %cst_231 = arith.constant 5.000000e-01 : f32
    %748 = vector.broadcast %cst_231 : f32 to vector<4x96xf32>
    %749 = arith.addf %747, %748 : vector<4x96xf32>
    %750 = vector.extract_strided_slice %723 {offsets = [0, 96], sizes = [4, 32], strides = [1, 1]} : vector<4x128xf32> to vector<4x32xf32>
    %751 = math.tanh %750 : vector<4x32xf32>
    %752 = vector.extract_strided_slice %749 {offsets = [0, 32], sizes = [4, 32], strides = [1, 1]} : vector<4x96xf32> to vector<4x32xf32>
    %753 = arith.mulf %752, %709 : vector<4x32xf32>
    %754 = vector.extract_strided_slice %749 {offsets = [0, 0], sizes = [4, 32], strides = [1, 1]} : vector<4x96xf32> to vector<4x32xf32>
    %755 = arith.mulf %754, %751 : vector<4x32xf32>
    %756 = arith.addf %753, %755 : vector<4x32xf32>
    %757 = vector.extract_strided_slice %749 {offsets = [0, 64], sizes = [4, 32], strides = [1, 1]} : vector<4x96xf32> to vector<4x32xf32>
    %758 = math.tanh %756 : vector<4x32xf32>
    %759 = arith.mulf %757, %758 : vector<4x32xf32>
    %c60_232 = arith.constant 60 : index
    %c0_233 = arith.constant 0 : index
    %760 = vector.load %arg11[%c60_232, %c0_233] : memref<64x64xf32, #tpu.memory_space<vmem>>, vector<4x32xf32>
    tpu.vector_store %arg11[%c60_232, %c0_233], %741 {strides = array<i32>} : memref<64x64xf32, #tpu.memory_space<vmem>>, vector<4x32xf32>,
    %c0_234 = arith.constant 0 : index
    %c32_235 = arith.constant 32 : index
    %761 = vector.load %arg11[%c0_234, %c32_235] : memref<64x64xf32, #tpu.memory_space<vmem>>, vector<4x32xf32>
    tpu.vector_store %arg11[%c0_234, %c32_235], %759 {strides = array<i32>} : memref<64x64xf32, #tpu.memory_space<vmem>>, vector<4x32xf32>,
    %c0_236 = arith.constant 0 : index
    %c0_237 = arith.constant 0 : index
    %762 = vector.load %arg11[%c0_236, %c0_237] : memref<64x64xf32, #tpu.memory_space<vmem>>, vector<64x64xf32>
    %763 = arith.truncf %762 : vector<64x64xf32> to vector<64x64xbf16>
    %c0_238 = arith.constant 0 : index
    %c0_239 = arith.constant 0 : index
    %764 = vector.load %arg4[%c0_238, %c0_239] : memref<64x256xbf16, #tpu.memory_space<vmem>>, vector<64x256xbf16>
    %cst_240 = arith.constant dense<0.000000e+00> : vector<64x256xf32>
    %765 = tpu.matmul %763, %764, %cst_240 {dimension_numbers = #tpu.dot_dimension_numbers<[1], [0], [0], [1], [0, 0, 1, 1], [], []>} : vector<64x64xbf16>, vector<64x256xbf16>, vector<64x256xf32> -> vector<64x256xf32>
    %c0_241 = arith.constant 0 : index
    %c0_242 = arith.constant 0 : index
    %766 = vector.load %arg5[%c0_241, %c0_242] : memref<1x256xf32, #tpu.memory_space<vmem>>, vector<1x256xf32>
    %767 = vector.broadcast %766 : vector<1x256xf32> to vector<64x256xf32>
    %768 = arith.addf %765, %767 : vector<64x256xf32>
    %c0_243 = arith.constant 0 : index
    %c0_244 = arith.constant 0 : index
    %769 = vector.load %arg10[%c0_243, %c0_244] : memref<64x256xf32, #tpu.memory_space<vmem>>, vector<64x256xf32>
    tpu.vector_store %arg10[%c0_243, %c0_244], %768 {strides = array<i32>} : memref<64x256xf32, #tpu.memory_space<vmem>>, vector<64x256xf32>,
    %c0_245 = arith.constant 0 : index
    %c0_246 = arith.constant 0 : index
    %770 = vector.load %arg6[%c0_245, %c0_246] : memref<32x128xbf16, #tpu.memory_space<vmem>>, vector<32x128xbf16>
    %cst_247 = arith.constant 0.000000e+00 : f32
    %771 = vector.broadcast %cst_247 : f32 to vector<4x32xf32>
    %cst_248 = arith.constant 0.000000e+00 : f32
    %772 = vector.broadcast %cst_248 : f32 to vector<4x32xf32>
    %c0_249 = arith.constant 0 : index
    %c0_250 = arith.constant 0 : index
    %773 = vector.load %arg10[%c0_249, %c0_250] : memref<64x256xf32, #tpu.memory_space<vmem>>, vector<4x128xf32>
    %774 = arith.truncf %771 : vector<4x32xf32> to vector<4x32xbf16>
    %cst_251 = arith.constant dense<0.000000e+00> : vector<4x128xf32>
    %775 = tpu.matmul %774, %770, %cst_251 {dimension_numbers = #tpu.dot_dimension_numbers<[1], [0], [0], [1], [0, 0, 1, 1], [], []>} : vector<4x32xbf16>, vector<32x128xbf16>, vector<4x128xf32> -> vector<4x128xf32>
    %776 = arith.addf %773, %775 : vector<4x128xf32>
    %777 = vector.extract_strided_slice %776 {offsets = [0, 0], sizes = [4, 96], strides = [1, 1]} : vector<4x128xf32> to vector<4x96xf32>
    %cst_252 = arith.constant 5.000000e-01 : f32
    %778 = vector.broadcast %cst_252 : f32 to vector<4x96xf32>
    %779 = arith.mulf %778, %777 : vector<4x96xf32>
    %780 = math.tanh %779 : vector<4x96xf32>
    %cst_253 = arith.constant 5.000000e-01 : f32
    %781 = vector.broadcast %cst_253 : f32 to vector<4x96xf32>
    %782 = arith.mulf %781, %780 : vector<4x96xf32>
    %cst_254 = arith.constant 5.000000e-01 : f32
    %783 = vector.broadcast %cst_254 : f32 to vector<4x96xf32>
    %784 = arith.addf %782, %783 : vector<4x96xf32>
    %785 = vector.extract_strided_slice %776 {offsets = [0, 96], sizes = [4, 32], strides = [1, 1]} : vector<4x128xf32> to vector<4x32xf32>
    %786 = math.tanh %785 : vector<4x32xf32>
    %787 = vector.extract_strided_slice %784 {offsets = [0, 32], sizes = [4, 32], strides = [1, 1]} : vector<4x96xf32> to vector<4x32xf32>
    %788 = arith.mulf %787, %772 : vector<4x32xf32>
    %789 = vector.extract_strided_slice %784 {offsets = [0, 0], sizes = [4, 32], strides = [1, 1]} : vector<4x96xf32> to vector<4x32xf32>
    %790 = arith.mulf %789, %786 : vector<4x32xf32>
    %791 = arith.addf %788, %790 : vector<4x32xf32>
    %792 = vector.extract_strided_slice %784 {offsets = [0, 64], sizes = [4, 32], strides = [1, 1]} : vector<4x96xf32> to vector<4x32xf32>
    %793 = math.tanh %791 : vector<4x32xf32>
    %794 = arith.mulf %792, %793 : vector<4x32xf32>
    %c4_255 = arith.constant 4 : index
    %c0_256 = arith.constant 0 : index
    %795 = vector.load %arg10[%c4_255, %c0_256] : memref<64x256xf32, #tpu.memory_space<vmem>>, vector<4x128xf32>
    %796 = arith.truncf %794 : vector<4x32xf32> to vector<4x32xbf16>
    %cst_257 = arith.constant dense<0.000000e+00> : vector<4x128xf32>
    %797 = tpu.matmul %796, %770, %cst_257 {dimension_numbers = #tpu.dot_dimension_numbers<[1], [0], [0], [1], [0, 0, 1, 1], [], []>} : vector<4x32xbf16>, vector<32x128xbf16>, vector<4x128xf32> -> vector<4x128xf32>
    %798 = arith.addf %795, %797 : vector<4x128xf32>
    %799 = vector.extract_strided_slice %798 {offsets = [0, 0], sizes = [4, 96], strides = [1, 1]} : vector<4x128xf32> to vector<4x96xf32>
    %cst_258 = arith.constant 5.000000e-01 : f32
    %800 = vector.broadcast %cst_258 : f32 to vector<4x96xf32>
    %801 = arith.mulf %800, %799 : vector<4x96xf32>
    %802 = math.tanh %801 : vector<4x96xf32>
    %cst_259 = arith.constant 5.000000e-01 : f32
    %803 = vector.broadcast %cst_259 : f32 to vector<4x96xf32>
    %804 = arith.mulf %803, %802 : vector<4x96xf32>
    %cst_260 = arith.constant 5.000000e-01 : f32
    %805 = vector.broadcast %cst_260 : f32 to vector<4x96xf32>
    %806 = arith.addf %804, %805 : vector<4x96xf32>
    %807 = vector.extract_strided_slice %798 {offsets = [0, 96], sizes = [4, 32], strides = [1, 1]} : vector<4x128xf32> to vector<4x32xf32>
    %808 = math.tanh %807 : vector<4x32xf32>
    %809 = vector.extract_strided_slice %806 {offsets = [0, 32], sizes = [4, 32], strides = [1, 1]} : vector<4x96xf32> to vector<4x32xf32>
    %810 = arith.mulf %809, %791 : vector<4x32xf32>
    %811 = vector.extract_strided_slice %806 {offsets = [0, 0], sizes = [4, 32], strides = [1, 1]} : vector<4x96xf32> to vector<4x32xf32>
    %812 = arith.mulf %811, %808 : vector<4x32xf32>
    %813 = arith.addf %810, %812 : vector<4x32xf32>
    %814 = vector.extract_strided_slice %806 {offsets = [0, 64], sizes = [4, 32], strides = [1, 1]} : vector<4x96xf32> to vector<4x32xf32>
    %815 = math.tanh %813 : vector<4x32xf32>
    %816 = arith.mulf %814, %815 : vector<4x32xf32>
    %c8_261 = arith.constant 8 : index
    %c0_262 = arith.constant 0 : index
    %817 = vector.load %arg10[%c8_261, %c0_262] : memref<64x256xf32, #tpu.memory_space<vmem>>, vector<4x128xf32>
    %818 = arith.truncf %816 : vector<4x32xf32> to vector<4x32xbf16>
    %cst_263 = arith.constant dense<0.000000e+00> : vector<4x128xf32>
    %819 = tpu.matmul %818, %770, %cst_263 {dimension_numbers = #tpu.dot_dimension_numbers<[1], [0], [0], [1], [0, 0, 1, 1], [], []>} : vector<4x32xbf16>, vector<32x128xbf16>, vector<4x128xf32> -> vector<4x128xf32>
    %820 = arith.addf %817, %819 : vector<4x128xf32>
    %821 = vector.extract_strided_slice %820 {offsets = [0, 0], sizes = [4, 96], strides = [1, 1]} : vector<4x128xf32> to vector<4x96xf32>
    %cst_264 = arith.constant 5.000000e-01 : f32
    %822 = vector.broadcast %cst_264 : f32 to vector<4x96xf32>
    %823 = arith.mulf %822, %821 : vector<4x96xf32>
    %824 = math.tanh %823 : vector<4x96xf32>
    %cst_265 = arith.constant 5.000000e-01 : f32
    %825 = vector.broadcast %cst_265 : f32 to vector<4x96xf32>
    %826 = arith.mulf %825, %824 : vector<4x96xf32>
    %cst_266 = arith.constant 5.000000e-01 : f32
    %827 = vector.broadcast %cst_266 : f32 to vector<4x96xf32>
    %828 = arith.addf %826, %827 : vector<4x96xf32>
    %829 = vector.extract_strided_slice %820 {offsets = [0, 96], sizes = [4, 32], strides = [1, 1]} : vector<4x128xf32> to vector<4x32xf32>
    %830 = math.tanh %829 : vector<4x32xf32>
    %831 = vector.extract_strided_slice %828 {offsets = [0, 32], sizes = [4, 32], strides = [1, 1]} : vector<4x96xf32> to vector<4x32xf32>
    %832 = arith.mulf %831, %813 : vector<4x32xf32>
    %833 = vector.extract_strided_slice %828 {offsets = [0, 0], sizes = [4, 32], strides = [1, 1]} : vector<4x96xf32> to vector<4x32xf32>
    %834 = arith.mulf %833, %830 : vector<4x32xf32>
    %835 = arith.addf %832, %834 : vector<4x32xf32>
    %836 = vector.extract_strided_slice %828 {offsets = [0, 64], sizes = [4, 32], strides = [1, 1]} : vector<4x96xf32> to vector<4x32xf32>
    %837 = math.tanh %835 : vector<4x32xf32>
    %838 = arith.mulf %836, %837 : vector<4x32xf32>
    %c12_267 = arith.constant 12 : index
    %c0_268 = arith.constant 0 : index
    %839 = vector.load %arg10[%c12_267, %c0_268] : memref<64x256xf32, #tpu.memory_space<vmem>>, vector<4x128xf32>
    %840 = arith.truncf %838 : vector<4x32xf32> to vector<4x32xbf16>
    %cst_269 = arith.constant dense<0.000000e+00> : vector<4x128xf32>
    %841 = tpu.matmul %840, %770, %cst_269 {dimension_numbers = #tpu.dot_dimension_numbers<[1], [0], [0], [1], [0, 0, 1, 1], [], []>} : vector<4x32xbf16>, vector<32x128xbf16>, vector<4x128xf32> -> vector<4x128xf32>
    %842 = arith.addf %839, %841 : vector<4x128xf32>
    %843 = vector.extract_strided_slice %842 {offsets = [0, 0], sizes = [4, 96], strides = [1, 1]} : vector<4x128xf32> to vector<4x96xf32>
    %cst_270 = arith.constant 5.000000e-01 : f32
    %844 = vector.broadcast %cst_270 : f32 to vector<4x96xf32>
    %845 = arith.mulf %844, %843 : vector<4x96xf32>
    %846 = math.tanh %845 : vector<4x96xf32>
    %cst_271 = arith.constant 5.000000e-01 : f32
    %847 = vector.broadcast %cst_271 : f32 to vector<4x96xf32>
    %848 = arith.mulf %847, %846 : vector<4x96xf32>
    %cst_272 = arith.constant 5.000000e-01 : f32
    %849 = vector.broadcast %cst_272 : f32 to vector<4x96xf32>
    %850 = arith.addf %848, %849 : vector<4x96xf32>
    %851 = vector.extract_strided_slice %842 {offsets = [0, 96], sizes = [4, 32], strides = [1, 1]} : vector<4x128xf32> to vector<4x32xf32>
    %852 = math.tanh %851 : vector<4x32xf32>
    %853 = vector.extract_strided_slice %850 {offsets = [0, 32], sizes = [4, 32], strides = [1, 1]} : vector<4x96xf32> to vector<4x32xf32>
    %854 = arith.mulf %853, %835 : vector<4x32xf32>
    %855 = vector.extract_strided_slice %850 {offsets = [0, 0], sizes = [4, 32], strides = [1, 1]} : vector<4x96xf32> to vector<4x32xf32>
    %856 = arith.mulf %855, %852 : vector<4x32xf32>
    %857 = arith.addf %854, %856 : vector<4x32xf32>
    %858 = vector.extract_strided_slice %850 {offsets = [0, 64], sizes = [4, 32], strides = [1, 1]} : vector<4x96xf32> to vector<4x32xf32>
    %859 = math.tanh %857 : vector<4x32xf32>
    %860 = arith.mulf %858, %859 : vector<4x32xf32>
    %c16_273 = arith.constant 16 : index
    %c0_274 = arith.constant 0 : index
    %861 = vector.load %arg10[%c16_273, %c0_274] : memref<64x256xf32, #tpu.memory_space<vmem>>, vector<4x128xf32>
    %862 = arith.truncf %860 : vector<4x32xf32> to vector<4x32xbf16>
    %cst_275 = arith.constant dense<0.000000e+00> : vector<4x128xf32>
    %863 = tpu.matmul %862, %770, %cst_275 {dimension_numbers = #tpu.dot_dimension_numbers<[1], [0], [0], [1], [0, 0, 1, 1], [], []>} : vector<4x32xbf16>, vector<32x128xbf16>, vector<4x128xf32> -> vector<4x128xf32>
    %864 = arith.addf %861, %863 : vector<4x128xf32>
    %865 = vector.extract_strided_slice %864 {offsets = [0, 0], sizes = [4, 96], strides = [1, 1]} : vector<4x128xf32> to vector<4x96xf32>
    %cst_276 = arith.constant 5.000000e-01 : f32
    %866 = vector.broadcast %cst_276 : f32 to vector<4x96xf32>
    %867 = arith.mulf %866, %865 : vector<4x96xf32>
    %868 = math.tanh %867 : vector<4x96xf32>
    %cst_277 = arith.constant 5.000000e-01 : f32
    %869 = vector.broadcast %cst_277 : f32 to vector<4x96xf32>
    %870 = arith.mulf %869, %868 : vector<4x96xf32>
    %cst_278 = arith.constant 5.000000e-01 : f32
    %871 = vector.broadcast %cst_278 : f32 to vector<4x96xf32>
    %872 = arith.addf %870, %871 : vector<4x96xf32>
    %873 = vector.extract_strided_slice %864 {offsets = [0, 96], sizes = [4, 32], strides = [1, 1]} : vector<4x128xf32> to vector<4x32xf32>
    %874 = math.tanh %873 : vector<4x32xf32>
    %875 = vector.extract_strided_slice %872 {offsets = [0, 32], sizes = [4, 32], strides = [1, 1]} : vector<4x96xf32> to vector<4x32xf32>
    %876 = arith.mulf %875, %857 : vector<4x32xf32>
    %877 = vector.extract_strided_slice %872 {offsets = [0, 0], sizes = [4, 32], strides = [1, 1]} : vector<4x96xf32> to vector<4x32xf32>
    %878 = arith.mulf %877, %874 : vector<4x32xf32>
    %879 = arith.addf %876, %878 : vector<4x32xf32>
    %880 = vector.extract_strided_slice %872 {offsets = [0, 64], sizes = [4, 32], strides = [1, 1]} : vector<4x96xf32> to vector<4x32xf32>
    %881 = math.tanh %879 : vector<4x32xf32>
    %882 = arith.mulf %880, %881 : vector<4x32xf32>
    %c20_279 = arith.constant 20 : index
    %c0_280 = arith.constant 0 : index
    %883 = vector.load %arg10[%c20_279, %c0_280] : memref<64x256xf32, #tpu.memory_space<vmem>>, vector<4x128xf32>
    %884 = arith.truncf %882 : vector<4x32xf32> to vector<4x32xbf16>
    %cst_281 = arith.constant dense<0.000000e+00> : vector<4x128xf32>
    %885 = tpu.matmul %884, %770, %cst_281 {dimension_numbers = #tpu.dot_dimension_numbers<[1], [0], [0], [1], [0, 0, 1, 1], [], []>} : vector<4x32xbf16>, vector<32x128xbf16>, vector<4x128xf32> -> vector<4x128xf32>
    %886 = arith.addf %883, %885 : vector<4x128xf32>
    %887 = vector.extract_strided_slice %886 {offsets = [0, 0], sizes = [4, 96], strides = [1, 1]} : vector<4x128xf32> to vector<4x96xf32>
    %cst_282 = arith.constant 5.000000e-01 : f32
    %888 = vector.broadcast %cst_282 : f32 to vector<4x96xf32>
    %889 = arith.mulf %888, %887 : vector<4x96xf32>
    %890 = math.tanh %889 : vector<4x96xf32>
    %cst_283 = arith.constant 5.000000e-01 : f32
    %891 = vector.broadcast %cst_283 : f32 to vector<4x96xf32>
    %892 = arith.mulf %891, %890 : vector<4x96xf32>
    %cst_284 = arith.constant 5.000000e-01 : f32
    %893 = vector.broadcast %cst_284 : f32 to vector<4x96xf32>
    %894 = arith.addf %892, %893 : vector<4x96xf32>
    %895 = vector.extract_strided_slice %886 {offsets = [0, 96], sizes = [4, 32], strides = [1, 1]} : vector<4x128xf32> to vector<4x32xf32>
    %896 = math.tanh %895 : vector<4x32xf32>
    %897 = vector.extract_strided_slice %894 {offsets = [0, 32], sizes = [4, 32], strides = [1, 1]} : vector<4x96xf32> to vector<4x32xf32>
    %898 = arith.mulf %897, %879 : vector<4x32xf32>
    %899 = vector.extract_strided_slice %894 {offsets = [0, 0], sizes = [4, 32], strides = [1, 1]} : vector<4x96xf32> to vector<4x32xf32>
    %900 = arith.mulf %899, %896 : vector<4x32xf32>
    %901 = arith.addf %898, %900 : vector<4x32xf32>
    %902 = vector.extract_strided_slice %894 {offsets = [0, 64], sizes = [4, 32], strides = [1, 1]} : vector<4x96xf32> to vector<4x32xf32>
    %903 = math.tanh %901 : vector<4x32xf32>
    %904 = arith.mulf %902, %903 : vector<4x32xf32>
    %c24_285 = arith.constant 24 : index
    %c0_286 = arith.constant 0 : index
    %905 = vector.load %arg10[%c24_285, %c0_286] : memref<64x256xf32, #tpu.memory_space<vmem>>, vector<4x128xf32>
    %906 = arith.truncf %904 : vector<4x32xf32> to vector<4x32xbf16>
    %cst_287 = arith.constant dense<0.000000e+00> : vector<4x128xf32>
    %907 = tpu.matmul %906, %770, %cst_287 {dimension_numbers = #tpu.dot_dimension_numbers<[1], [0], [0], [1], [0, 0, 1, 1], [], []>} : vector<4x32xbf16>, vector<32x128xbf16>, vector<4x128xf32> -> vector<4x128xf32>
    %908 = arith.addf %905, %907 : vector<4x128xf32>
    %909 = vector.extract_strided_slice %908 {offsets = [0, 0], sizes = [4, 96], strides = [1, 1]} : vector<4x128xf32> to vector<4x96xf32>
    %cst_288 = arith.constant 5.000000e-01 : f32
    %910 = vector.broadcast %cst_288 : f32 to vector<4x96xf32>
    %911 = arith.mulf %910, %909 : vector<4x96xf32>
    %912 = math.tanh %911 : vector<4x96xf32>
    %cst_289 = arith.constant 5.000000e-01 : f32
    %913 = vector.broadcast %cst_289 : f32 to vector<4x96xf32>
    %914 = arith.mulf %913, %912 : vector<4x96xf32>
    %cst_290 = arith.constant 5.000000e-01 : f32
    %915 = vector.broadcast %cst_290 : f32 to vector<4x96xf32>
    %916 = arith.addf %914, %915 : vector<4x96xf32>
    %917 = vector.extract_strided_slice %908 {offsets = [0, 96], sizes = [4, 32], strides = [1, 1]} : vector<4x128xf32> to vector<4x32xf32>
    %918 = math.tanh %917 : vector<4x32xf32>
    %919 = vector.extract_strided_slice %916 {offsets = [0, 32], sizes = [4, 32], strides = [1, 1]} : vector<4x96xf32> to vector<4x32xf32>
    %920 = arith.mulf %919, %901 : vector<4x32xf32>
    %921 = vector.extract_strided_slice %916 {offsets = [0, 0], sizes = [4, 32], strides = [1, 1]} : vector<4x96xf32> to vector<4x32xf32>
    %922 = arith.mulf %921, %918 : vector<4x32xf32>
    %923 = arith.addf %920, %922 : vector<4x32xf32>
    %924 = vector.extract_strided_slice %916 {offsets = [0, 64], sizes = [4, 32], strides = [1, 1]} : vector<4x96xf32> to vector<4x32xf32>
    %925 = math.tanh %923 : vector<4x32xf32>
    %926 = arith.mulf %924, %925 : vector<4x32xf32>
    %c28_291 = arith.constant 28 : index
    %c0_292 = arith.constant 0 : index
    %927 = vector.load %arg10[%c28_291, %c0_292] : memref<64x256xf32, #tpu.memory_space<vmem>>, vector<4x128xf32>
    %928 = arith.truncf %926 : vector<4x32xf32> to vector<4x32xbf16>
    %cst_293 = arith.constant dense<0.000000e+00> : vector<4x128xf32>
    %929 = tpu.matmul %928, %770, %cst_293 {dimension_numbers = #tpu.dot_dimension_numbers<[1], [0], [0], [1], [0, 0, 1, 1], [], []>} : vector<4x32xbf16>, vector<32x128xbf16>, vector<4x128xf32> -> vector<4x128xf32>
    %930 = arith.addf %927, %929 : vector<4x128xf32>
    %931 = vector.extract_strided_slice %930 {offsets = [0, 0], sizes = [4, 96], strides = [1, 1]} : vector<4x128xf32> to vector<4x96xf32>
    %cst_294 = arith.constant 5.000000e-01 : f32
    %932 = vector.broadcast %cst_294 : f32 to vector<4x96xf32>
    %933 = arith.mulf %932, %931 : vector<4x96xf32>
    %934 = math.tanh %933 : vector<4x96xf32>
    %cst_295 = arith.constant 5.000000e-01 : f32
    %935 = vector.broadcast %cst_295 : f32 to vector<4x96xf32>
    %936 = arith.mulf %935, %934 : vector<4x96xf32>
    %cst_296 = arith.constant 5.000000e-01 : f32
    %937 = vector.broadcast %cst_296 : f32 to vector<4x96xf32>
    %938 = arith.addf %936, %937 : vector<4x96xf32>
    %939 = vector.extract_strided_slice %930 {offsets = [0, 96], sizes = [4, 32], strides = [1, 1]} : vector<4x128xf32> to vector<4x32xf32>
    %940 = math.tanh %939 : vector<4x32xf32>
    %941 = vector.extract_strided_slice %938 {offsets = [0, 32], sizes = [4, 32], strides = [1, 1]} : vector<4x96xf32> to vector<4x32xf32>
    %942 = arith.mulf %941, %923 : vector<4x32xf32>
    %943 = vector.extract_strided_slice %938 {offsets = [0, 0], sizes = [4, 32], strides = [1, 1]} : vector<4x96xf32> to vector<4x32xf32>
    %944 = arith.mulf %943, %940 : vector<4x32xf32>
    %945 = arith.addf %942, %944 : vector<4x32xf32>
    %946 = vector.extract_strided_slice %938 {offsets = [0, 64], sizes = [4, 32], strides = [1, 1]} : vector<4x96xf32> to vector<4x32xf32>
    %947 = math.tanh %945 : vector<4x32xf32>
    %948 = arith.mulf %946, %947 : vector<4x32xf32>
    %c32_297 = arith.constant 32 : index
    %c0_298 = arith.constant 0 : index
    %949 = vector.load %arg10[%c32_297, %c0_298] : memref<64x256xf32, #tpu.memory_space<vmem>>, vector<4x128xf32>
    %950 = arith.truncf %948 : vector<4x32xf32> to vector<4x32xbf16>
    %cst_299 = arith.constant dense<0.000000e+00> : vector<4x128xf32>
    %951 = tpu.matmul %950, %770, %cst_299 {dimension_numbers = #tpu.dot_dimension_numbers<[1], [0], [0], [1], [0, 0, 1, 1], [], []>} : vector<4x32xbf16>, vector<32x128xbf16>, vector<4x128xf32> -> vector<4x128xf32>
    %952 = arith.addf %949, %951 : vector<4x128xf32>
    %953 = vector.extract_strided_slice %952 {offsets = [0, 0], sizes = [4, 96], strides = [1, 1]} : vector<4x128xf32> to vector<4x96xf32>
    %cst_300 = arith.constant 5.000000e-01 : f32
    %954 = vector.broadcast %cst_300 : f32 to vector<4x96xf32>
    %955 = arith.mulf %954, %953 : vector<4x96xf32>
    %956 = math.tanh %955 : vector<4x96xf32>
    %cst_301 = arith.constant 5.000000e-01 : f32
    %957 = vector.broadcast %cst_301 : f32 to vector<4x96xf32>
    %958 = arith.mulf %957, %956 : vector<4x96xf32>
    %cst_302 = arith.constant 5.000000e-01 : f32
    %959 = vector.broadcast %cst_302 : f32 to vector<4x96xf32>
    %960 = arith.addf %958, %959 : vector<4x96xf32>
    %961 = vector.extract_strided_slice %952 {offsets = [0, 96], sizes = [4, 32], strides = [1, 1]} : vector<4x128xf32> to vector<4x32xf32>
    %962 = math.tanh %961 : vector<4x32xf32>
    %963 = vector.extract_strided_slice %960 {offsets = [0, 32], sizes = [4, 32], strides = [1, 1]} : vector<4x96xf32> to vector<4x32xf32>
    %964 = arith.mulf %963, %945 : vector<4x32xf32>
    %965 = vector.extract_strided_slice %960 {offsets = [0, 0], sizes = [4, 32], strides = [1, 1]} : vector<4x96xf32> to vector<4x32xf32>
    %966 = arith.mulf %965, %962 : vector<4x32xf32>
    %967 = arith.addf %964, %966 : vector<4x32xf32>
    %968 = vector.extract_strided_slice %960 {offsets = [0, 64], sizes = [4, 32], strides = [1, 1]} : vector<4x96xf32> to vector<4x32xf32>
    %969 = math.tanh %967 : vector<4x32xf32>
    %970 = arith.mulf %968, %969 : vector<4x32xf32>
    %c36_303 = arith.constant 36 : index
    %c0_304 = arith.constant 0 : index
    %971 = vector.load %arg10[%c36_303, %c0_304] : memref<64x256xf32, #tpu.memory_space<vmem>>, vector<4x128xf32>
    %972 = arith.truncf %970 : vector<4x32xf32> to vector<4x32xbf16>
    %cst_305 = arith.constant dense<0.000000e+00> : vector<4x128xf32>
    %973 = tpu.matmul %972, %770, %cst_305 {dimension_numbers = #tpu.dot_dimension_numbers<[1], [0], [0], [1], [0, 0, 1, 1], [], []>} : vector<4x32xbf16>, vector<32x128xbf16>, vector<4x128xf32> -> vector<4x128xf32>
    %974 = arith.addf %971, %973 : vector<4x128xf32>
    %975 = vector.extract_strided_slice %974 {offsets = [0, 0], sizes = [4, 96], strides = [1, 1]} : vector<4x128xf32> to vector<4x96xf32>
    %cst_306 = arith.constant 5.000000e-01 : f32
    %976 = vector.broadcast %cst_306 : f32 to vector<4x96xf32>
    %977 = arith.mulf %976, %975 : vector<4x96xf32>
    %978 = math.tanh %977 : vector<4x96xf32>
    %cst_307 = arith.constant 5.000000e-01 : f32
    %979 = vector.broadcast %cst_307 : f32 to vector<4x96xf32>
    %980 = arith.mulf %979, %978 : vector<4x96xf32>
    %cst_308 = arith.constant 5.000000e-01 : f32
    %981 = vector.broadcast %cst_308 : f32 to vector<4x96xf32>
    %982 = arith.addf %980, %981 : vector<4x96xf32>
    %983 = vector.extract_strided_slice %974 {offsets = [0, 96], sizes = [4, 32], strides = [1, 1]} : vector<4x128xf32> to vector<4x32xf32>
    %984 = math.tanh %983 : vector<4x32xf32>
    %985 = vector.extract_strided_slice %982 {offsets = [0, 32], sizes = [4, 32], strides = [1, 1]} : vector<4x96xf32> to vector<4x32xf32>
    %986 = arith.mulf %985, %967 : vector<4x32xf32>
    %987 = vector.extract_strided_slice %982 {offsets = [0, 0], sizes = [4, 32], strides = [1, 1]} : vector<4x96xf32> to vector<4x32xf32>
    %988 = arith.mulf %987, %984 : vector<4x32xf32>
    %989 = arith.addf %986, %988 : vector<4x32xf32>
    %990 = vector.extract_strided_slice %982 {offsets = [0, 64], sizes = [4, 32], strides = [1, 1]} : vector<4x96xf32> to vector<4x32xf32>
    %991 = math.tanh %989 : vector<4x32xf32>
    %992 = arith.mulf %990, %991 : vector<4x32xf32>
    %c40_309 = arith.constant 40 : index
    %c0_310 = arith.constant 0 : index
    %993 = vector.load %arg10[%c40_309, %c0_310] : memref<64x256xf32, #tpu.memory_space<vmem>>, vector<4x128xf32>
    %994 = arith.truncf %992 : vector<4x32xf32> to vector<4x32xbf16>
    %cst_311 = arith.constant dense<0.000000e+00> : vector<4x128xf32>
    %995 = tpu.matmul %994, %770, %cst_311 {dimension_numbers = #tpu.dot_dimension_numbers<[1], [0], [0], [1], [0, 0, 1, 1], [], []>} : vector<4x32xbf16>, vector<32x128xbf16>, vector<4x128xf32> -> vector<4x128xf32>
    %996 = arith.addf %993, %995 : vector<4x128xf32>
    %997 = vector.extract_strided_slice %996 {offsets = [0, 0], sizes = [4, 96], strides = [1, 1]} : vector<4x128xf32> to vector<4x96xf32>
    %cst_312 = arith.constant 5.000000e-01 : f32
    %998 = vector.broadcast %cst_312 : f32 to vector<4x96xf32>
    %999 = arith.mulf %998, %997 : vector<4x96xf32>
    %1000 = math.tanh %999 : vector<4x96xf32>
    %cst_313 = arith.constant 5.000000e-01 : f32
    %1001 = vector.broadcast %cst_313 : f32 to vector<4x96xf32>
    %1002 = arith.mulf %1001, %1000 : vector<4x96xf32>
    %cst_314 = arith.constant 5.000000e-01 : f32
    %1003 = vector.broadcast %cst_314 : f32 to vector<4x96xf32>
    %1004 = arith.addf %1002, %1003 : vector<4x96xf32>
    %1005 = vector.extract_strided_slice %996 {offsets = [0, 96], sizes = [4, 32], strides = [1, 1]} : vector<4x128xf32> to vector<4x32xf32>
    %1006 = math.tanh %1005 : vector<4x32xf32>
    %1007 = vector.extract_strided_slice %1004 {offsets = [0, 32], sizes = [4, 32], strides = [1, 1]} : vector<4x96xf32> to vector<4x32xf32>
    %1008 = arith.mulf %1007, %989 : vector<4x32xf32>
    %1009 = vector.extract_strided_slice %1004 {offsets = [0, 0], sizes = [4, 32], strides = [1, 1]} : vector<4x96xf32> to vector<4x32xf32>
    %1010 = arith.mulf %1009, %1006 : vector<4x32xf32>
    %1011 = arith.addf %1008, %1010 : vector<4x32xf32>
    %1012 = vector.extract_strided_slice %1004 {offsets = [0, 64], sizes = [4, 32], strides = [1, 1]} : vector<4x96xf32> to vector<4x32xf32>
    %1013 = math.tanh %1011 : vector<4x32xf32>
    %1014 = arith.mulf %1012, %1013 : vector<4x32xf32>
    %c44_315 = arith.constant 44 : index
    %c0_316 = arith.constant 0 : index
    %1015 = vector.load %arg10[%c44_315, %c0_316] : memref<64x256xf32, #tpu.memory_space<vmem>>, vector<4x128xf32>
    %1016 = arith.truncf %1014 : vector<4x32xf32> to vector<4x32xbf16>
    %cst_317 = arith.constant dense<0.000000e+00> : vector<4x128xf32>
    %1017 = tpu.matmul %1016, %770, %cst_317 {dimension_numbers = #tpu.dot_dimension_numbers<[1], [0], [0], [1], [0, 0, 1, 1], [], []>} : vector<4x32xbf16>, vector<32x128xbf16>, vector<4x128xf32> -> vector<4x128xf32>
    %1018 = arith.addf %1015, %1017 : vector<4x128xf32>
    %1019 = vector.extract_strided_slice %1018 {offsets = [0, 0], sizes = [4, 96], strides = [1, 1]} : vector<4x128xf32> to vector<4x96xf32>
    %cst_318 = arith.constant 5.000000e-01 : f32
    %1020 = vector.broadcast %cst_318 : f32 to vector<4x96xf32>
    %1021 = arith.mulf %1020, %1019 : vector<4x96xf32>
    %1022 = math.tanh %1021 : vector<4x96xf32>
    %cst_319 = arith.constant 5.000000e-01 : f32
    %1023 = vector.broadcast %cst_319 : f32 to vector<4x96xf32>
    %1024 = arith.mulf %1023, %1022 : vector<4x96xf32>
    %cst_320 = arith.constant 5.000000e-01 : f32
    %1025 = vector.broadcast %cst_320 : f32 to vector<4x96xf32>
    %1026 = arith.addf %1024, %1025 : vector<4x96xf32>
    %1027 = vector.extract_strided_slice %1018 {offsets = [0, 96], sizes = [4, 32], strides = [1, 1]} : vector<4x128xf32> to vector<4x32xf32>
    %1028 = math.tanh %1027 : vector<4x32xf32>
    %1029 = vector.extract_strided_slice %1026 {offsets = [0, 32], sizes = [4, 32], strides = [1, 1]} : vector<4x96xf32> to vector<4x32xf32>
    %1030 = arith.mulf %1029, %1011 : vector<4x32xf32>
    %1031 = vector.extract_strided_slice %1026 {offsets = [0, 0], sizes = [4, 32], strides = [1, 1]} : vector<4x96xf32> to vector<4x32xf32>
    %1032 = arith.mulf %1031, %1028 : vector<4x32xf32>
    %1033 = arith.addf %1030, %1032 : vector<4x32xf32>
    %1034 = vector.extract_strided_slice %1026 {offsets = [0, 64], sizes = [4, 32], strides = [1, 1]} : vector<4x96xf32> to vector<4x32xf32>
    %1035 = math.tanh %1033 : vector<4x32xf32>
    %1036 = arith.mulf %1034, %1035 : vector<4x32xf32>
    %c48_321 = arith.constant 48 : index
    %c0_322 = arith.constant 0 : index
    %1037 = vector.load %arg10[%c48_321, %c0_322] : memref<64x256xf32, #tpu.memory_space<vmem>>, vector<4x128xf32>
    %1038 = arith.truncf %1036 : vector<4x32xf32> to vector<4x32xbf16>
    %cst_323 = arith.constant dense<0.000000e+00> : vector<4x128xf32>
    %1039 = tpu.matmul %1038, %770, %cst_323 {dimension_numbers = #tpu.dot_dimension_numbers<[1], [0], [0], [1], [0, 0, 1, 1], [], []>} : vector<4x32xbf16>, vector<32x128xbf16>, vector<4x128xf32> -> vector<4x128xf32>
    %1040 = arith.addf %1037, %1039 : vector<4x128xf32>
    %1041 = vector.extract_strided_slice %1040 {offsets = [0, 0], sizes = [4, 96], strides = [1, 1]} : vector<4x128xf32> to vector<4x96xf32>
    %cst_324 = arith.constant 5.000000e-01 : f32
    %1042 = vector.broadcast %cst_324 : f32 to vector<4x96xf32>
    %1043 = arith.mulf %1042, %1041 : vector<4x96xf32>
    %1044 = math.tanh %1043 : vector<4x96xf32>
    %cst_325 = arith.constant 5.000000e-01 : f32
    %1045 = vector.broadcast %cst_325 : f32 to vector<4x96xf32>
    %1046 = arith.mulf %1045, %1044 : vector<4x96xf32>
    %cst_326 = arith.constant 5.000000e-01 : f32
    %1047 = vector.broadcast %cst_326 : f32 to vector<4x96xf32>
    %1048 = arith.addf %1046, %1047 : vector<4x96xf32>
    %1049 = vector.extract_strided_slice %1040 {offsets = [0, 96], sizes = [4, 32], strides = [1, 1]} : vector<4x128xf32> to vector<4x32xf32>
    %1050 = math.tanh %1049 : vector<4x32xf32>
    %1051 = vector.extract_strided_slice %1048 {offsets = [0, 32], sizes = [4, 32], strides = [1, 1]} : vector<4x96xf32> to vector<4x32xf32>
    %1052 = arith.mulf %1051, %1033 : vector<4x32xf32>
    %1053 = vector.extract_strided_slice %1048 {offsets = [0, 0], sizes = [4, 32], strides = [1, 1]} : vector<4x96xf32> to vector<4x32xf32>
    %1054 = arith.mulf %1053, %1050 : vector<4x32xf32>
    %1055 = arith.addf %1052, %1054 : vector<4x32xf32>
    %1056 = vector.extract_strided_slice %1048 {offsets = [0, 64], sizes = [4, 32], strides = [1, 1]} : vector<4x96xf32> to vector<4x32xf32>
    %1057 = math.tanh %1055 : vector<4x32xf32>
    %1058 = arith.mulf %1056, %1057 : vector<4x32xf32>
    %c52_327 = arith.constant 52 : index
    %c0_328 = arith.constant 0 : index
    %1059 = vector.load %arg10[%c52_327, %c0_328] : memref<64x256xf32, #tpu.memory_space<vmem>>, vector<4x128xf32>
    %1060 = arith.truncf %1058 : vector<4x32xf32> to vector<4x32xbf16>
    %cst_329 = arith.constant dense<0.000000e+00> : vector<4x128xf32>
    %1061 = tpu.matmul %1060, %770, %cst_329 {dimension_numbers = #tpu.dot_dimension_numbers<[1], [0], [0], [1], [0, 0, 1, 1], [], []>} : vector<4x32xbf16>, vector<32x128xbf16>, vector<4x128xf32> -> vector<4x128xf32>
    %1062 = arith.addf %1059, %1061 : vector<4x128xf32>
    %1063 = vector.extract_strided_slice %1062 {offsets = [0, 0], sizes = [4, 96], strides = [1, 1]} : vector<4x128xf32> to vector<4x96xf32>
    %cst_330 = arith.constant 5.000000e-01 : f32
    %1064 = vector.broadcast %cst_330 : f32 to vector<4x96xf32>
    %1065 = arith.mulf %1064, %1063 : vector<4x96xf32>
    %1066 = math.tanh %1065 : vector<4x96xf32>
    %cst_331 = arith.constant 5.000000e-01 : f32
    %1067 = vector.broadcast %cst_331 : f32 to vector<4x96xf32>
    %1068 = arith.mulf %1067, %1066 : vector<4x96xf32>
    %cst_332 = arith.constant 5.000000e-01 : f32
    %1069 = vector.broadcast %cst_332 : f32 to vector<4x96xf32>
    %1070 = arith.addf %1068, %1069 : vector<4x96xf32>
    %1071 = vector.extract_strided_slice %1062 {offsets = [0, 96], sizes = [4, 32], strides = [1, 1]} : vector<4x128xf32> to vector<4x32xf32>
    %1072 = math.tanh %1071 : vector<4x32xf32>
    %1073 = vector.extract_strided_slice %1070 {offsets = [0, 32], sizes = [4, 32], strides = [1, 1]} : vector<4x96xf32> to vector<4x32xf32>
    %1074 = arith.mulf %1073, %1055 : vector<4x32xf32>
    %1075 = vector.extract_strided_slice %1070 {offsets = [0, 0], sizes = [4, 32], strides = [1, 1]} : vector<4x96xf32> to vector<4x32xf32>
    %1076 = arith.mulf %1075, %1072 : vector<4x32xf32>
    %1077 = arith.addf %1074, %1076 : vector<4x32xf32>
    %1078 = vector.extract_strided_slice %1070 {offsets = [0, 64], sizes = [4, 32], strides = [1, 1]} : vector<4x96xf32> to vector<4x32xf32>
    %1079 = math.tanh %1077 : vector<4x32xf32>
    %1080 = arith.mulf %1078, %1079 : vector<4x32xf32>
    %c56_333 = arith.constant 56 : index
    %c0_334 = arith.constant 0 : index
    %1081 = vector.load %arg10[%c56_333, %c0_334] : memref<64x256xf32, #tpu.memory_space<vmem>>, vector<4x128xf32>
    %1082 = arith.truncf %1080 : vector<4x32xf32> to vector<4x32xbf16>
    %cst_335 = arith.constant dense<0.000000e+00> : vector<4x128xf32>
    %1083 = tpu.matmul %1082, %770, %cst_335 {dimension_numbers = #tpu.dot_dimension_numbers<[1], [0], [0], [1], [0, 0, 1, 1], [], []>} : vector<4x32xbf16>, vector<32x128xbf16>, vector<4x128xf32> -> vector<4x128xf32>
    %1084 = arith.addf %1081, %1083 : vector<4x128xf32>
    %1085 = vector.extract_strided_slice %1084 {offsets = [0, 0], sizes = [4, 96], strides = [1, 1]} : vector<4x128xf32> to vector<4x96xf32>
    %cst_336 = arith.constant 5.000000e-01 : f32
    %1086 = vector.broadcast %cst_336 : f32 to vector<4x96xf32>
    %1087 = arith.mulf %1086, %1085 : vector<4x96xf32>
    %1088 = math.tanh %1087 : vector<4x96xf32>
    %cst_337 = arith.constant 5.000000e-01 : f32
    %1089 = vector.broadcast %cst_337 : f32 to vector<4x96xf32>
    %1090 = arith.mulf %1089, %1088 : vector<4x96xf32>
    %cst_338 = arith.constant 5.000000e-01 : f32
    %1091 = vector.broadcast %cst_338 : f32 to vector<4x96xf32>
    %1092 = arith.addf %1090, %1091 : vector<4x96xf32>
    %1093 = vector.extract_strided_slice %1084 {offsets = [0, 96], sizes = [4, 32], strides = [1, 1]} : vector<4x128xf32> to vector<4x32xf32>
    %1094 = math.tanh %1093 : vector<4x32xf32>
    %1095 = vector.extract_strided_slice %1092 {offsets = [0, 32], sizes = [4, 32], strides = [1, 1]} : vector<4x96xf32> to vector<4x32xf32>
    %1096 = arith.mulf %1095, %1077 : vector<4x32xf32>
    %1097 = vector.extract_strided_slice %1092 {offsets = [0, 0], sizes = [4, 32], strides = [1, 1]} : vector<4x96xf32> to vector<4x32xf32>
    %1098 = arith.mulf %1097, %1094 : vector<4x32xf32>
    %1099 = arith.addf %1096, %1098 : vector<4x32xf32>
    %1100 = vector.extract_strided_slice %1092 {offsets = [0, 64], sizes = [4, 32], strides = [1, 1]} : vector<4x96xf32> to vector<4x32xf32>
    %1101 = math.tanh %1099 : vector<4x32xf32>
    %1102 = arith.mulf %1100, %1101 : vector<4x32xf32>
    %c60_339 = arith.constant 60 : index
    %c0_340 = arith.constant 0 : index
    %1103 = vector.load %arg10[%c60_339, %c0_340] : memref<64x256xf32, #tpu.memory_space<vmem>>, vector<4x128xf32>
    %1104 = arith.truncf %1102 : vector<4x32xf32> to vector<4x32xbf16>
    %cst_341 = arith.constant dense<0.000000e+00> : vector<4x128xf32>
    %1105 = tpu.matmul %1104, %770, %cst_341 {dimension_numbers = #tpu.dot_dimension_numbers<[1], [0], [0], [1], [0, 0, 1, 1], [], []>} : vector<4x32xbf16>, vector<32x128xbf16>, vector<4x128xf32> -> vector<4x128xf32>
    %1106 = arith.addf %1103, %1105 : vector<4x128xf32>
    %1107 = vector.extract_strided_slice %1106 {offsets = [0, 0], sizes = [4, 96], strides = [1, 1]} : vector<4x128xf32> to vector<4x96xf32>
    %cst_342 = arith.constant 5.000000e-01 : f32
    %1108 = vector.broadcast %cst_342 : f32 to vector<4x96xf32>
    %1109 = arith.mulf %1108, %1107 : vector<4x96xf32>
    %1110 = math.tanh %1109 : vector<4x96xf32>
    %cst_343 = arith.constant 5.000000e-01 : f32
    %1111 = vector.broadcast %cst_343 : f32 to vector<4x96xf32>
    %1112 = arith.mulf %1111, %1110 : vector<4x96xf32>
    %cst_344 = arith.constant 5.000000e-01 : f32
    %1113 = vector.broadcast %cst_344 : f32 to vector<4x96xf32>
    %1114 = arith.addf %1112, %1113 : vector<4x96xf32>
    %1115 = vector.extract_strided_slice %1106 {offsets = [0, 96], sizes = [4, 32], strides = [1, 1]} : vector<4x128xf32> to vector<4x32xf32>
    %1116 = math.tanh %1115 : vector<4x32xf32>
    %1117 = vector.extract_strided_slice %1114 {offsets = [0, 32], sizes = [4, 32], strides = [1, 1]} : vector<4x96xf32> to vector<4x32xf32>
    %1118 = arith.mulf %1117, %1099 : vector<4x32xf32>
    %1119 = vector.extract_strided_slice %1114 {offsets = [0, 0], sizes = [4, 32], strides = [1, 1]} : vector<4x96xf32> to vector<4x32xf32>
    %1120 = arith.mulf %1119, %1116 : vector<4x32xf32>
    %1121 = arith.addf %1118, %1120 : vector<4x32xf32>
    %1122 = vector.extract_strided_slice %1114 {offsets = [0, 64], sizes = [4, 32], strides = [1, 1]} : vector<4x96xf32> to vector<4x32xf32>
    %1123 = math.tanh %1121 : vector<4x32xf32>
    %1124 = arith.mulf %1122, %1123 : vector<4x32xf32>
    %c60_345 = arith.constant 60 : index
    %c128_346 = arith.constant 128 : index
    %1125 = vector.load %arg10[%c60_345, %c128_346] : memref<64x256xf32, #tpu.memory_space<vmem>>, vector<4x128xf32>
    %cst_347 = arith.constant 0.000000e+00 : f32
    %1126 = vector.broadcast %cst_347 : f32 to vector<4x32xf32>
    %1127 = vector.extract_strided_slice %1125 {offsets = [0, 0], sizes = [4, 96], strides = [1, 1]} : vector<4x128xf32> to vector<4x96xf32>
    %cst_348 = arith.constant 5.000000e-01 : f32
    %1128 = vector.broadcast %cst_348 : f32 to vector<4x96xf32>
    %1129 = arith.mulf %1128, %1127 : vector<4x96xf32>
    %1130 = math.tanh %1129 : vector<4x96xf32>
    %cst_349 = arith.constant 5.000000e-01 : f32
    %1131 = vector.broadcast %cst_349 : f32 to vector<4x96xf32>
    %1132 = arith.mulf %1131, %1130 : vector<4x96xf32>
    %cst_350 = arith.constant 5.000000e-01 : f32
    %1133 = vector.broadcast %cst_350 : f32 to vector<4x96xf32>
    %1134 = arith.addf %1132, %1133 : vector<4x96xf32>
    %1135 = vector.extract_strided_slice %1125 {offsets = [0, 96], sizes = [4, 32], strides = [1, 1]} : vector<4x128xf32> to vector<4x32xf32>
    %1136 = math.tanh %1135 : vector<4x32xf32>
    %1137 = vector.extract_strided_slice %1134 {offsets = [0, 32], sizes = [4, 32], strides = [1, 1]} : vector<4x96xf32> to vector<4x32xf32>
    %1138 = arith.mulf %1137, %1126 : vector<4x32xf32>
    %1139 = vector.extract_strided_slice %1134 {offsets = [0, 0], sizes = [4, 32], strides = [1, 1]} : vector<4x96xf32> to vector<4x32xf32>
    %1140 = arith.mulf %1139, %1136 : vector<4x32xf32>
    %1141 = arith.addf %1138, %1140 : vector<4x32xf32>
    %1142 = vector.extract_strided_slice %1134 {offsets = [0, 64], sizes = [4, 32], strides = [1, 1]} : vector<4x96xf32> to vector<4x32xf32>
    %1143 = math.tanh %1141 : vector<4x32xf32>
    %1144 = arith.mulf %1142, %1143 : vector<4x32xf32>
    %1145 = tpu.concatenate %1124, %1144 in 1 : vector<4x32xf32>, vector<4x32xf32> -> vector<4x64xf32>
    %1146 = arith.truncf %1145 : vector<4x64xf32> to vector<4x64xbf16>
    %c0_351 = arith.constant 0 : index
    %c0_352 = arith.constant 0 : index
    %1147 = vector.load %arg7[%c0_351, %c0_352] : memref<64x5xbf16, #tpu.memory_space<vmem>>, vector<64x5xbf16>
    %cst_353 = arith.constant dense<0.000000e+00> : vector<4x5xf32>
    %1148 = tpu.matmul %1146, %1147, %cst_353 {dimension_numbers = #tpu.dot_dimension_numbers<[1], [0], [0], [1], [0, 0, 1, 1], [], []>} : vector<4x64xbf16>, vector<64x5xbf16>, vector<4x5xf32> -> vector<4x5xf32>
    %c0_354 = arith.constant 0 : index
    %c0_355 = arith.constant 0 : index
    %1149 = vector.load %arg8[%c0_354, %c0_355] : memref<1x5xf32, #tpu.memory_space<vmem>>, vector<1x5xf32>
    %1150 = vector.broadcast %1149 : vector<1x5xf32> to vector<4x5xf32>
    %1151 = arith.addf %1148, %1150 : vector<4x5xf32>
    %c0_356 = arith.constant 0 : index
    %c0_357 = arith.constant 0 : index
    %1152 = vector.load %arg9[%c0_356, %c0_357] : memref<4x5xf32, #tpu.memory_space<vmem>>, vector<4x5xf32>
    tpu.vector_store %arg9[%c0_356, %c0_357], %1151 {strides = array<i32>} : memref<4x5xf32, #tpu.memory_space<vmem>>, vector<4x5xf32>,
    return
  }
}

</mosaic_0001>

<bundles_post_ra>
// kernel: lstm_model_forward.1
= control target key start
LH: loop header
LB: loop body
LE: loop exit
PB: predicated region body
PF: predicated region fallthrough
CT: control target
= control target key end

     0   :  { %14 = vsyncpa [#allocation5], 0  ;;  %s5448_s0 = inlined_call_operand.vmem [shape: bf16[64,8], index: 0, kind: input, shape index: {}]   ;;  %s5449_s1 = inlined_call_operand.hbm [shape: bf16[8,256], index: 1, kind: input, shape index: {}]   ;;  %s5450_s2 = inlined_call_operand.hbm [shape: f32[1,256], index: 2, kind: input, shape index: {}]   ;;  %s5451_s3 = inlined_call_operand.vmem [shape: bf16[64,256], index: 3, kind: input, shape index: {}]   ;;  %s5452_s4 = inlined_call_operand.vmem [shape: bf16[64,256], index: 4, kind: input, shape index: {}]   ;;  %s5453_s5 = inlined_call_operand.hbm [shape: f32[1,256], index: 5, kind: input, shape index: {}]   ;;  %s5454_s6 = inlined_call_operand.vmem [shape: bf16[32,128], index: 6, kind: input, shape index: {}]   ;;  %s5455_s7 = inlined_call_operand.vmem [shape: bf16[64,5], index: 7, kind: input, shape index: {}]   ;;  %s5456_s8 = inlined_call_operand.hbm [shape: f32[1,5], index: 8, kind: input, shape index: {}]   ;;  %s5457_s9 = inlined_call_operand.hbm [shape: f32[4,5], index: 9, kind: output, shape index: {}]  }
   0x1   :  { %15 = vsyncpa [#allocation8], 0 }
   0x2   :  { %16 = vsyncpa [#allocation11], 0 }
   0x3   :  { %17 = vsyncpa [#allocation6], 0  ;;  %s4419_s30 = smov [#allocation7]   ;;  %s4420_s11 = smov [#allocation4]  }
   0x4   :  { %s36_s10 = sshll.u32 %s4419_s30, 4  ;;  %s26_s12 = sshll.u32 %s4420_s11, 4  ;;  %s37_s10 = int_to_ptr.vmem [resolvable:$true] %s36_s10  ;;  %s27_s12 = int_to_ptr.vmem [resolvable:$true] %s26_s12 }
   0x5   :  { %s4319_s13 = scalar_lea.vmem %s37_s10, 32  ;;  %p4324_p1 = scmp.lt.s32.totalorder %s37_s10, %s37_s10 }
   0x6   :  { %p4320_p0 = scmp.ne.s32.totalorder %s37_s10, %s4319_s13  ;;  %p4325_p2 = scmp.lt.s32.totalorder %s4319_s13, %s4319_s13 }
   0x8   :  { %p4326_p3 = por %p4325_p2, %p4324_p1 }
   0xa   :  { %p4327_p4 = pnand %p4326_p3, %p4320_p0 }
   0xc   :  { %4330 = shalt.err (!%p4327_p4)
}
   0xd   :  { %39 = dma.hbm_to_vmem [thread:$0]  %s5450_s2, 32, %s37_s10, [#allocation8]  }
   0xe   :  { %s4339_s16 = scalar_lea.vmem %s27_s12, 128  ;;  %p4344_p6 = scmp.lt.s32.totalorder %s27_s12, %s27_s12 }
   0xf   :  { %p4340_p5 = scmp.ne.s32.totalorder %s27_s12, %s4339_s16  ;;  %p4345_p7 = scmp.lt.s32.totalorder %s4339_s16, %s4339_s16 }
  0x11   :  { %p4346_p8 = por %p4345_p7, %p4344_p6 }
  0x13   :  { %p4347_p9 = pnand %p4346_p8, %p4340_p5 }
  0x15   :  { %4350 = shalt.err (!%p4347_p9)
}
  0x16   :  { %29 = dma.hbm_to_vmem [thread:$0]  %s5449_s1, 128, %s27_s12, [#allocation5]  }
  0x17   :  { %s4421_s19 = smov [#allocation9]   ;;  %s4422_s21 = smov [#allocation10]  }
  0x18   :  { %s50_s20 = sshll.u32 %s4421_s19, 4  ;;  %s64_s22 = sshll.u32 %s4422_s21, 4  ;;  %s51_s20 = int_to_ptr.vmem [resolvable:$true] %s50_s20  ;;  %s65_s22 = int_to_ptr.vmem [resolvable:$true] %s64_s22 }
  0x19   :  { %s4359_s23 = scalar_lea.vmem %s51_s20, 32  ;;  %p4364_p11 = scmp.lt.s32.totalorder %s51_s20, %s51_s20 }
  0x1a   :  { %p4360_p10 = scmp.ne.s32.totalorder %s51_s20, %s4359_s23  ;;  %p4365_p12 = scmp.lt.s32.totalorder %s4359_s23, %s4359_s23 }
  0x1c   :  { %p4366_p13 = por %p4365_p12, %p4364_p11 }
  0x1e   :  { %p4367_p0 = pnand %p4366_p13, %p4360_p10 }
  0x20   :  { %4370 = shalt.err (!%p4367_p0)
}
  0x21   :  { %53 = dma.hbm_to_vmem [thread:$0]  %s5453_s5, 32, %s51_s20, [#allocation8]  }
  0x22   :  { %s4379_s25 = scalar_lea.vmem %s65_s22, 16  ;;  %s4383_s1 = scalar_lea.vmem %s65_s22, 32 }
  0x23   :  { %p4380_p1 = scmp.ne.s32.totalorder %s65_s22, %s4379_s25  ;;  %p4384_p2 = scmp.lt.s32.totalorder %s65_s22, %s65_s22 }
  0x24   :  { %p4385_p3 = scmp.lt.s32.totalorder %s4383_s1, %s4379_s25 }
  0x26   :  { %p4386_p4 = por %p4385_p3, %p4384_p2 }
  0x28   :  { %p4387_p5 = pnand %p4386_p4, %p4380_p1 }
  0x2a   :  { %4390 = shalt.err (!%p4387_p5)
}
  0x2b   :  { %67 = dma.hbm_to_vmem [thread:$0]  %s5456_s8, 16, %s65_s22, [#allocation11]  }
  0x2c   :  { %4411 = dma.done.wait [#allocation5], 128  }
  0x2d   :  { %4412 = vsyncadd [#allocation5], 4294967168 }
  0x2e   :  { %4413 = dma.done.wait [#allocation8], 64  }
  0x2f   :  { %4414 = vsyncadd [#allocation8], 4294967232 }
  0x30   :  { %4415 = dma.done.wait [#allocation11], 16  }
  0x31   :  { %4416 = vsyncadd [#allocation11], 4294967280  ;;  %v4423_v0 = vmov 0   ;;  %v89_v1 = vld [vmem:[#allocation4] sm:$0xff]  ;;  %vm140_vm0 = vcmask 1043456   ;;  %v3973_v6 = vld [vmem:[%s5448_s0 + $0x10] sm:$0xff]   ;;  %v92_v16 = vlaneseq }
  0x32   :  { %199 = vmatprep.mubr.bf16.mxu1 %v4423_v0  ;;  %179 = vmatprep.mubr.bf16.mxu0 %v4423_v0  ;;  %v3701_v2 = vcombine.high %v89_v1, %v89_v1  ;;  %v3700_v3 = vcombine.low %v89_v1, %v89_v1  ;;  %v4497_v4 = vld [vmem:[%s5451_s3 + $0x34] ss:$8 sps:$4 sm:$0xff]   ;;  %vm127_vm1 = vcmask 64512   ;;  %v4505_v7 = vld [vmem:[%s5451_s3 + $0x30] ss:$8 sps:$4 sm:$0xff]   ;;  %v3984_v9 = vld [vmem:[%s5448_s0] sm:$0xff]  }
  0x33   :  { %v4511_v8 = vld [vmem:[%s5451_s3 + $0x24] ss:$8 sps:$4 sm:$0xff]   ;;  %v4522_v10 = vld [vmem:[%s5451_s3 + $0x20] ss:$8 sps:$4 sm:$0xff]   ;;  %v4528_v11 = vld [vmem:[%s5451_s3 + $0x14] ss:$8 sps:$4 sm:$0xff]  }
  0x34   :  { %3958 = vmatprep.subr.msk.bf16.mxu1 %vm140_vm0, %v3701_v2  ;;  %v142_v5 = vsel %vm140_vm0, %v3700_v3, 0  ;;  %3702 = vmatprep.subr.msk.bf16.mxu0 %vm140_vm0, %v3701_v2  ;;  %v3980_v12 = vld [vmem:[%s5448_s0 + $0x18] sm:$0xff]   ;;  %v4545_v14 = vld [vmem:[%s5451_s3 + $0x4] ss:$8 sps:$4 sm:$0xff]   ;;  %v4557_v15 = vld [vmem:[%s5451_s3] ss:$8 sps:$4 sm:$0xff]  }
  0x35   :  { %3959 = vmatpush1.bf16.msra.mxu1 %v142_v5  ;;  %162 = vmatpush1.bf16.msra.mxu0 %v142_v5  ;;  %v4538_v13 = vld [vmem:[%s5451_s3 + $0x10] ss:$8 sps:$4 sm:$0xff]   ;;  %v4577_v17 = vshrl.u32 %v92_v16, 7  ;;  %v90_v19 = vld [vmem:[#allocation7] sm:$0x3]  ;;  %s4424_s1 = smov 32  }
  0x36   :  { %296 = vmatprep.subr.bf16.mxu1 %v4497_v4  ;;  %531 = vmatprep.subr.bf16.mxu0 %v4497_v4  ;;  %s4425_s26 = smov 96   ;;  %s4426_s27 = smov 64   ;;  %vm389_vm2 = vcmask 261120   ;;  %vm391_vm3 = vcmask 257024   ;;  %vm284_vm4 = vcmask 523264   ;;  %vm510_vm5 = vcmask 261124  }
  0x37   :  { %v94_v18 = vsub.s32 0, %v4577_v17  ;;  %v98_v20 = vsub.s32 1, %v4577_v17  ;;  %vm396_vm6 = vcmask 523524   ;;  %vm4428_vm7 = vmmov 0  }
  0x38   :  { %3705 = vmatmul.mubr.msk.bf16.vlgmr.msra.gmra.mxu1 %vm127_vm1, %v3973_v6  ;;  %3703 = vmatmul.mubr.msk.bf16.vlgmr.msra.gmra.mxu0 %vm127_vm1, %v3984_v9  ;;  %vm515_vm8 = vcmask 519424   ;;  %vm3677_vm9 = vcmask 35840  }
  0x39   :  { %297 = vmatpush1.bf16.msra.mxu1 %v4505_v7  ;;  %209 = vmatprep.mubr.bf16.mxu1 %v4423_v0  ;;  %v4583_v21 = vrot.slane %v90_v19, %v94_v18  ;;  %v4587_v22 = vrot.slane %v90_v19, %v98_v20 }
  0x3a   :  { %298 = vmatprep.subr.bf16.mxu1 %v4511_v8  ;;  %532 = vmatpush1.bf16.msra.mxu0 %v4505_v7 }
  0x3b   :  { %189 = vmatprep.mubr.bf16.mxu0 %v4423_v0  ;;  %533 = vmatprep.subr.bf16.mxu0 %v4511_v8 }
  0x3d   :  { %299 = vmatpush1.bf16.msra.mxu1 %v4522_v10 }
  0x3e   :  { %300 = vmatprep.subr.bf16.mxu1 %v4528_v11  ;;  %534 = vmatpush1.bf16.msra.mxu0 %v4522_v10 }
  0x3f   :  { %535 = vmatprep.subr.bf16.mxu0 %v4528_v11 }
  0x40   :  { %3706 = vmatmul.mubr.msk.bf16.gmra.mxu1 %vm127_vm1, %v3980_v12 }
  0x41   :  { %301 = vmatpush1.bf16.msra.mxu1 %v4538_v13  ;;  %320 = vmatprep.mubr.bf16.mxu1 %v4423_v0 }
  0x42   :  { %302 = vmatprep.subr.bf16.mxu1 %v4545_v14  ;;  %536 = vmatpush1.bf16.msra.mxu0 %v4538_v13 }
  0x43   :  { %537 = vmatprep.subr.bf16.mxu0 %v4545_v14 }
  0x45   :  { %303 = vmatpush1.bf16.msra.mxu1 %v4557_v15 }
  0x46   :  { %410 = vmatprep.subr.bf16.mxu1 %v4497_v4  ;;  %538 = vmatpush1.bf16.msra.mxu0 %v4557_v15 }
  0x47   :  { %767 = vmatprep.subr.bf16.mxu0 %v4497_v4 }
  0x48   :  { %321 = vmatmul.mubr.bf16.vlgmr.msra.gmra.mxu1 %v4423_v0 }
  0x49   :  { %411 = vmatpush1.bf16.msra.mxu1 %v4505_v7  ;;  %434 = vmatprep.mubr.bf16.mxu1 %v4423_v0 }
  0x4a   :  { %412 = vmatprep.subr.bf16.mxu1 %v4511_v8 }
  0x4d   :  { %413 = vmatpush1.bf16.msra.mxu1 %v4522_v10 }
  0x4e   :  { %414 = vmatprep.subr.bf16.mxu1 %v4528_v11 }
  0x51   :  { %415 = vmatpush1.bf16.msra.mxu1 %v4538_v13 }
  0x52   :  { %416 = vmatprep.subr.bf16.mxu1 %v4545_v14 }
  0x55   :  { %417 = vmatpush1.bf16.msra.mxu1 %v4557_v15 }
  0x56   :  { %648 = vmatprep.subr.bf16.mxu1 %v4497_v4 }
  0xf8   :  { %v201_v23 = vpop.f32.mrf.mxu1  ;;  %v181_v26 = vpop.f32.mrf.mxu0 }
  0xf9   :  { %v202_v24 = vadd.f32 %v201_v23, %v4583_v21  ;;  %v182_v28 = vadd.f32 %v181_v26, %v4583_v21 }
  0xfa   :  { %v203_v25 = vpop.f32.mrf.mxu1  ;;  %v183_v30 = vpop.f32.mrf.mxu0 }
  0xfb   :  { %228 = vst [vmem:[#allocation2 + $0x40] sm:$0xff] %v202_v24  ;;  %v204_v27 = vadd.f32 %v203_v25, %v4587_v22  ;;  %220 = vst [vmem:[#allocation2 + $0x30] sm:$0xff] %v182_v28  ;;  %v184_v32 = vadd.f32 %v183_v30, %v4587_v22 }
  0xfc   :  { %v205_v29 = vpop.f32.mrf.mxu1  ;;  %v185_v34 = vpop.f32.mrf.mxu0 }
  0xfd   :  { %229 = vst [vmem:[#allocation2 + $0x20] sm:$0xff] %v204_v27  ;;  %v206_v31 = vadd.f32 %v205_v29, %v4583_v21  ;;  %221 = vst [vmem:[#allocation2] sm:$0xff] %v184_v32  ;;  %v186_v36 = vadd.f32 %v185_v34, %v4583_v21 }
  0xfe   :  { %v207_v33 = vpop.f32.mrf.mxu1  ;;  %v187_v38 = vpop.f32.mrf.mxu0 }
  0xff   :  { %230 = vst [vmem:[#allocation2 + $0x10] sm:$0xff] %v206_v31  ;;  %v208_v35 = vadd.f32 %v207_v33, %v4587_v22  ;;  %222 = vst [vmem:[#allocation2 + $0x58] sm:$0xff] %v186_v36  ;;  %v188_v40 = vadd.f32 %v187_v38, %v4587_v22 }
 0x100   :  { %v211_v37 = vpop.f32.mrf.mxu1 }
 0x101   :  { %231 = vst [vmem:[#allocation2 + $0x38] sm:$0xff] %v208_v35  ;;  %v212_v39 = vadd.f32 %v211_v37, %v4583_v21  ;;  %223 = vst [vmem:[#allocation2 + $0x18] sm:$0xff] %v188_v40 }
 0x102   :  { %v213_v41 = vpop.f32.mrf.mxu1  ;;  %v329_v52 = vld [vmem:[#allocation2 + $0x30] sm:$0xf] }
 0x103   :  { %232 = vst [vmem:[#allocation2 + $0x60] sm:$0xff] %v212_v39  ;;  %v214_v42 = vadd.f32 %v213_v41, %v4587_v22  ;;  %v443_v39 = vld [vmem:[#allocation2 + $0x30] sm:$0xf0] }
 0x104   :  { %v215_v43 = vpop.f32.mrf.mxu1 }
 0x105   :  { %233 = vst [vmem:[#allocation2 + $0x70] sm:$0xff] %v214_v42  ;;  %v216_v44 = vadd.f32 %v215_v43, %v4583_v21 }
 0x106   :  { %v217_v45 = vpop.f32.mrf.mxu1 }
 0x107   :  { %234 = vst [vmem:[#allocation2 + $0x78] sm:$0xff] %v216_v44  ;;  %v218_v46 = vadd.f32 %v217_v45, %v4587_v22 }
 0x108   :  { %v322_v47 = vpop.f32.mrf.mxu1 }
 0x109   :  { %235 = vst [vmem:[#allocation2 + $0x28] sm:$0xff] %v218_v46  ;;  %v330_v55 = vadd.f32 %v329_v52, %v322_v47 }
 0x10a   :  { %v324_v48 = vpop.f32.mrf.mxu1 }
 0x10b   :  { %v333_v51 = vrot.slane %v324_v48, 4  ;;  %v336_v59 = vmul.f32 0.5, %v330_v55 }
 0x10c   :  { %v326_v49 = vpop.f32.mrf.mxu1 }
 0x10e   :  { %v327_v50 = vpop.f32.mrf.mxu1 }
 0x110   :  { %v331_v53 = vld [vmem:[#allocation2 + $0x28] sm:$0xf0]  ;;  %v448_v41 = vld [vmem:[#allocation2 + $0x28] sm:$0xf] }
 0x111   :  { %v335_v54 = vadd.f32 %v333_v51, %v331_v53 }
 0x113   :  { %4007 = vtanh.f32 %v335_v54  ;;  %v358_v58 = vmul.f32 0.5, %v335_v54 }
 0x114   :  { %4009 = vtanh.f32 %v330_v55 }
 0x115   :  { %4011 = vtanh.f32 %v358_v58 }
 0x116   :  { %4013 = vtanh.f32 %v336_v59 }
 0x120   :  { %v4008_v56 = vpop.eup %4007 }
 0x121   :  { %365 = vrot.lane.b32.xlu0 %v4008_v56, %s4424_s1  ;;  %v4010_v57 = vpop.eup %4009 }
 0x122   :  { %v4012_v60 = vpop.eup %4011 }
 0x123   :  { %v360_v61 = vmul.f32 0.5, %v4012_v60  ;;  %v4014_v62 = vpop.eup %4013 }
 0x124   :  { %v338_v63 = vmul.f32 0.5, %v4014_v62 }
 0x125   :  { %343 = vrot.lane.b32.xlu0 %v4010_v57, %s4424_s1  ;;  %v361_v1 = vadd.f32 0.5, %v360_v61 }
 0x126   :  { %v339_v5 = vadd.f32 0.5, %v338_v63 }
 0x127   :  { %v363_v12 = vmul.f32 0.0, %v361_v1 }
 0x128   :  { %v341_v23 = vmul.f32 0.0, %v339_v5 }
 0x193   :  { %v366_v2 = vpop.permute.xlu0 %365 }
 0x194   :  { %v368_v3 = vmul.f32 %v366_v2, %v361_v1 }
 0x196   :  { %370 = vrot.lane.b32.xlu1 %v368_v3, %s4424_s1 }
 0x197   :  { %v344_v6 = vpop.permute.xlu0 %343 }
 0x198   :  { %v346_v9 = vmul.f32 %v344_v6, %v339_v5  ;;  %v3988_v6 = vld [vmem:[%s5448_s0 + $0x8] sm:$0xff]  }
 0x199   :  { %3704 = vmatmul.mubr.msk.bf16.gmra.mxu0 %vm127_vm1, %v3988_v6 }
 0x19a   :  { %348 = vrot.lane.b32.xlu1 %v346_v9, %s4424_s1  ;;  %555 = vmatprep.mubr.bf16.mxu0 %v4423_v0 }
 0x208   :  { %v371_v16 = vpop.permute.xlu1 %370 }
 0x209   :  { %v4605_v19 = vadd.f32 %v371_v16, %v363_v12 }
 0x20b   :  { %4015 = vtanh.f32 %v4605_v19  ;;  %v481_v61 = vrot.slane %v4605_v19, 4 }
 0x20c   :  { %v349_v24 = vpop.permute.xlu1 %348 }
 0x20d   :  { %v4608_v25 = vadd.f32 %v349_v24, %v341_v23 }
 0x20f   :  { %4017 = vtanh.f32 %v4608_v25  ;;  %v456_v60 = vrot.slane %v4608_v25, 4 }
 0x218   :  { %v4016_v26 = vpop.eup %4015 }
 0x219   :  { %376 = vrot.lane.b32.xlu0 %v4016_v26, %s4424_s1 }
 0x21c   :  { %v4018_v27 = vpop.eup %4017 }
 0x21d   :  { %354 = vrot.lane.b32.xlu1 %v4018_v27, %s4424_s1 }
 0x259   :  { %v191_v26 = vpop.f32.mrf.mxu0 }
 0x25a   :  { %v192_v27 = vadd.f32 %v191_v26, %v4583_v21 }
 0x25c   :  { %224 = vst [vmem:[#allocation2 + $0x50] sm:$0xff] %v192_v27 }
 0x28b   :  { %v377_v28 = vpop.permute.xlu0 %376 }
 0x28c   :  { %v4613_v29 = vmul.f32 %v377_v28, %v361_v1  ;;  %v193_v28 = vpop.f32.mrf.mxu0 }
 0x28e   :  { %v385_v30 = vrot.slane %v4613_v29, 4 }
 0x28f   :  { %v355_v31 = vpop.permute.xlu1 %354 }
 0x290   :  { %v357_v32 = vmul.f32 %v355_v31, %v339_v5  ;;  %386 = vrot.lane.b32.xlu1 %v385_v30, %s4425_s26  ;;  %v194_v30 = vadd.f32 %v193_v28, %v4587_v22  ;;  %v195_v31 = vpop.f32.mrf.mxu0 }
 0x292   :  { %381 = vrot.lane.b32.xlu0 %v357_v32, %s4426_s27  ;;  %225 = vst [vmem:[#allocation2 + $0x68] sm:$0xff] %v194_v30  ;;  %v196_v32 = vadd.f32 %v195_v31, %v4583_v21 }
 0x294   :  { %226 = vst [vmem:[#allocation2 + $0x8] sm:$0xff] %v196_v32 }
 0x302   :  { %v387_v33 = vpop.permute.xlu1 %386 }
 0x304   :  { %v382_v34 = vpop.permute.xlu0 %381 }
 0x305   :  { %v390_v35 = vsel %vm389_vm2, %v382_v34, %v387_v33  ;;  %392 = vst.msk [vmem:[#allocation3] sm:$0xf] %vm391_vm3, %v382_v34  ;;  %v197_v33 = vpop.f32.mrf.mxu0 }
 0x306   :  { %v398_v36 = vpack.c.bf16 %v390_v35, %v390_v35  ;;  %v198_v34 = vadd.f32 %v197_v33, %v4587_v22  ;;  %v564_v22 = vld [vmem:[#allocation2 + $0x58] sm:$0xf] }
 0x308   :  { %3715 = vmatmul.mubr.msk.bf16.vlgmr.msra.gmra.mxu1 %vm284_vm4, %v398_v36  ;;  %227 = vst [vmem:[#allocation2 + $0x48] sm:$0xff] %v198_v34  ;;  %v681_v34 = vld [vmem:[#allocation2 + $0x58] sm:$0xf0] }
 0x309   :  { %649 = vmatpush1.bf16.msra.mxu1 %v4505_v7  ;;  %672 = vmatprep.mubr.bf16.mxu1 %v4423_v0 }
 0x30a   :  { %650 = vmatprep.subr.bf16.mxu1 %v4511_v8 }
 0x30d   :  { %651 = vmatpush1.bf16.msra.mxu1 %v4522_v10 }
 0x30e   :  { %652 = vmatprep.subr.bf16.mxu1 %v4528_v11 }
 0x311   :  { %653 = vmatpush1.bf16.msra.mxu1 %v4538_v13 }
 0x312   :  { %654 = vmatprep.subr.bf16.mxu1 %v4545_v14 }
 0x315   :  { %655 = vmatpush1.bf16.msra.mxu1 %v4557_v15 }
 0x316   :  { %884 = vmatprep.subr.bf16.mxu1 %v4497_v4 }
 0x3c8   :  { %v436_v37 = vpop.f32.mrf.mxu1 }
 0x3c9   :  { %v445_v38 = vrot.slane %v436_v37, 4 }
 0x3ca   :  { %v438_v40 = vpop.f32.mrf.mxu1 }
 0x3cb   :  { %v447_v42 = vadd.f32 %v445_v38, %v443_v39  ;;  %v449_v43 = vadd.f32 %v448_v41, %v438_v40 }
 0x3cc   :  { %v440_v44 = vpop.f32.mrf.mxu1 }
 0x3cd   :  { %4019 = vtanh.f32 %v447_v42  ;;  %v450_v48 = vmul.f32 0.5, %v447_v42  ;;  %v475_v49 = vmul.f32 0.5, %v449_v43 }
 0x3ce   :  { %4021 = vtanh.f32 %v449_v43  ;;  %v441_v45 = vpop.f32.mrf.mxu1  ;;  %v566_v43 = vld [vmem:[#allocation2 + $0x70] sm:$0xf0] }
 0x3cf   :  { %4023 = vtanh.f32 %v450_v48 }
 0x3d0   :  { %4025 = vtanh.f32 %v475_v49 }
 0x3da   :  { %v4020_v46 = vpop.eup %4019 }
 0x3db   :  { %v4022_v47 = vpop.eup %4021  ;;  %460 = vrot.lane.b32.xlu1 %v4020_v46, %s4424_s1 }
 0x3dc   :  { %485 = vrot.lane.b32.xlu0 %v4022_v47, %s4424_s1  ;;  %v4024_v50 = vpop.eup %4023 }
 0x3dd   :  { %v4026_v51 = vpop.eup %4025  ;;  %v452_v52 = vmul.f32 0.5, %v4024_v50 }
 0x3de   :  { %v477_v53 = vmul.f32 0.5, %v4026_v51 }
 0x3df   :  { %v453_v54 = vadd.f32 0.5, %v452_v52 }
 0x3e0   :  { %v478_v56 = vadd.f32 0.5, %v477_v53 }
 0x3e1   :  { %v458_v62 = vmul.f32 %v456_v60, %v453_v54 }
 0x3e2   :  { %v483_v1 = vmul.f32 %v481_v61, %v478_v56 }
 0x44d   :  { %v461_v55 = vpop.permute.xlu1 %460 }
 0x44e   :  { %v463_v57 = vmul.f32 %v461_v55, %v453_v54  ;;  %v486_v58 = vpop.permute.xlu0 %485 }
 0x44f   :  { %v488_v59 = vmul.f32 %v486_v58, %v478_v56 }
 0x450   :  { %465 = vrot.lane.b32.xlu1 %v463_v57, %s4424_s1 }
 0x451   :  { %490 = vrot.lane.b32.xlu0 %v488_v59, %s4424_s1 }
 0x4c2   :  { %v466_v63 = vpop.permute.xlu1 %465 }
 0x4c3   :  { %v4636_v2 = vadd.f32 %v466_v63, %v458_v62  ;;  %v491_v3 = vpop.permute.xlu0 %490 }
 0x4c4   :  { %v4638_v5 = vadd.f32 %v491_v3, %v483_v1 }
 0x4c5   :  { %4027 = vtanh.f32 %v4636_v2  ;;  %v577_v61 = vrot.slane %v4636_v2, 4 }
 0x4c6   :  { %4029 = vtanh.f32 %v4638_v5  ;;  %v602_v1 = vrot.slane %v4638_v5, 4 }
 0x4d2   :  { %v4028_v9 = vpop.eup %4027 }
 0x4d3   :  { %v4030_v12 = vpop.eup %4029  ;;  %471 = vrot.lane.b32.xlu1 %v4028_v9, %s4424_s1 }
 0x4d4   :  { %496 = vrot.lane.b32.xlu0 %v4030_v12, %s4424_s1 }
 0x545   :  { %v472_v16 = vpop.permute.xlu1 %471 }
 0x546   :  { %v474_v19 = vmul.f32 %v472_v16, %v453_v54  ;;  %v497_v23 = vpop.permute.xlu0 %496 }
 0x547   :  { %v4649_v24 = vmul.f32 %v497_v23, %v478_v56 }
 0x548   :  { %501 = vrot.lane.b32.xlu0 %v474_v19, %s4426_s27 }
 0x549   :  { %v505_v25 = vrot.slane %v4649_v24, 4 }
 0x54b   :  { %506 = vrot.lane.b32.xlu1 %v505_v25, %s4425_s26 }
 0x5ba   :  { %v502_v35 = vpop.permute.xlu0 %501 }
 0x5bb   :  { %511 = vst.msk [vmem:[#allocation3] sm:$0xf0] %vm510_vm5, %v502_v35 }
 0x5bd   :  { %v507_v36 = vpop.permute.xlu1 %506 }
 0x5be   :  { %v509_v37 = vsel %vm389_vm2, %v502_v35, %v507_v36  ;;  %v686_v36 = vld [vmem:[#allocation2 + $0x70] sm:$0xf] }
 0x5bf   :  { %v517_v38 = vpack.c.bf16 %v509_v37, %v509_v37 }
 0x5c1   :  { %v519_v39 = vrot.slane %v517_v38, 2 }
 0x5c3   :  { %3716 = vmatmul.mubr.msk.bf16.vlgmr.msra.gmra.mxu0 %vm284_vm4, %v519_v39 }
 0x5c4   :  { %768 = vmatpush1.bf16.msra.mxu0 %v4505_v7  ;;  %791 = vmatprep.mubr.bf16.mxu0 %v4423_v0 }
 0x5c5   :  { %769 = vmatprep.subr.bf16.mxu0 %v4511_v8 }
 0x5c8   :  { %770 = vmatpush1.bf16.msra.mxu0 %v4522_v10 }
 0x5c9   :  { %771 = vmatprep.subr.bf16.mxu0 %v4528_v11 }
 0x5cc   :  { %772 = vmatpush1.bf16.msra.mxu0 %v4538_v13 }
 0x5cd   :  { %773 = vmatprep.subr.bf16.mxu0 %v4545_v14 }
 0x5d0   :  { %774 = vmatpush1.bf16.msra.mxu0 %v4557_v15 }
 0x5d1   :  { %1003 = vmatprep.subr.bf16.mxu0 %v4497_v4 }
 0x683   :  { %v557_v21 = vpop.f32.mrf.mxu0 }
 0x684   :  { %v565_v40 = vadd.f32 %v564_v22, %v557_v21 }
 0x685   :  { %v559_v41 = vpop.f32.mrf.mxu0 }
 0x686   :  { %4031 = vtanh.f32 %v565_v40  ;;  %v568_v42 = vrot.slane %v559_v41, 4  ;;  %v571_v49 = vmul.f32 0.5, %v565_v40 }
 0x687   :  { %v561_v44 = vpop.f32.mrf.mxu0 }
 0x688   :  { %v570_v45 = vadd.f32 %v568_v42, %v566_v43 }
 0x689   :  { %v562_v46 = vpop.f32.mrf.mxu0 }
 0x68a   :  { %4033 = vtanh.f32 %v570_v45  ;;  %v596_v50 = vmul.f32 0.5, %v570_v45 }
 0x68b   :  { %4035 = vtanh.f32 %v571_v49 }
 0x68c   :  { %4037 = vtanh.f32 %v596_v50 }
 0x693   :  { %v4032_v47 = vpop.eup %4031 }
 0x694   :  { %581 = vrot.lane.b32.xlu1 %v4032_v47, %s4424_s1 }
 0x697   :  { %v4034_v48 = vpop.eup %4033 }
 0x698   :  { %606 = vrot.lane.b32.xlu0 %v4034_v48, %s4424_s1  ;;  %v4036_v51 = vpop.eup %4035 }
 0x699   :  { %v573_v52 = vmul.f32 0.5, %v4036_v51  ;;  %v4038_v53 = vpop.eup %4037 }
 0x69a   :  { %v598_v55 = vmul.f32 0.5, %v4038_v53 }
 0x69b   :  { %v574_v54 = vadd.f32 0.5, %v573_v52 }
 0x69c   :  { %v599_v58 = vadd.f32 0.5, %v598_v55 }
 0x69d   :  { %v579_v62 = vmul.f32 %v577_v61, %v574_v54 }
 0x69e   :  { %v604_v6 = vmul.f32 %v602_v1, %v599_v58 }
 0x706   :  { %v582_v56 = vpop.permute.xlu1 %581 }
 0x707   :  { %v584_v57 = vmul.f32 %v582_v56, %v574_v54 }
 0x709   :  { %586 = vrot.lane.b32.xlu1 %v584_v57, %s4424_s1 }
 0x70a   :  { %v607_v59 = vpop.permute.xlu0 %606 }
 0x70b   :  { %v609_v60 = vmul.f32 %v607_v59, %v599_v58 }
 0x70d   :  { %611 = vrot.lane.b32.xlu0 %v609_v60, %s4424_s1 }
 0x77b   :  { %v587_v63 = vpop.permute.xlu1 %586 }
 0x77c   :  { %v4676_v3 = vadd.f32 %v587_v63, %v579_v62 }
 0x77e   :  { %4039 = vtanh.f32 %v4676_v3  ;;  %v694_v53 = vrot.slane %v4676_v3, 4 }
 0x77f   :  { %v612_v9 = vpop.permute.xlu0 %611 }
 0x780   :  { %v4679_v12 = vadd.f32 %v612_v9, %v604_v6 }
 0x782   :  { %4041 = vtanh.f32 %v4679_v12 }
 0x78b   :  { %v4040_v16 = vpop.eup %4039 }
 0x78c   :  { %592 = vrot.lane.b32.xlu1 %v4040_v16, %s4424_s1 }
 0x78f   :  { %v4042_v19 = vpop.eup %4041 }
 0x790   :  { %617 = vrot.lane.b32.xlu0 %v4042_v19, %s4424_s1 }
 0x7fe   :  { %v593_v2 = vpop.permute.xlu1 %592 }
 0x7ff   :  { %v595_v23 = vmul.f32 %v593_v2, %v574_v54  ;;  %v719_v54 = vrot.slane %v4679_v12, 4 }
 0x801   :  { %622 = vrot.lane.b32.xlu0 %v595_v23, %s4426_s27 }
 0x802   :  { %v618_v5 = vpop.permute.xlu0 %617 }
 0x803   :  { %v4685_v25 = vmul.f32 %v618_v5, %v599_v58 }
 0x805   :  { %v626_v26 = vrot.slane %v4685_v25, 4 }
 0x807   :  { %627 = vrot.lane.b32.xlu1 %v626_v26, %s4425_s26  ;;  %v800_v26 = vld [vmem:[#allocation2 + $0x50] sm:$0xf] }
 0x873   :  { %v623_v27 = vpop.permute.xlu0 %622 }
 0x874   :  { %631 = vst.msk [vmem:[#allocation3 + $0x8] sm:$0xf] %vm391_vm3, %v623_v27 }
 0x879   :  { %v628_v28 = vpop.permute.xlu1 %627 }
 0x87a   :  { %v630_v30 = vsel %vm389_vm2, %v623_v27, %v628_v28 }
 0x87b   :  { %v636_v31 = vpack.c.bf16 %v630_v30, %v630_v30 }
 0x87d   :  { %3717 = vmatmul.mubr.msk.bf16.vlgmr.msra.gmra.mxu1 %vm284_vm4, %v636_v31  ;;  %v802_v31 = vld [vmem:[#allocation2 + $0x38] sm:$0xf0] }
 0x87e   :  { %885 = vmatpush1.bf16.msra.mxu1 %v4505_v7  ;;  %908 = vmatprep.mubr.bf16.mxu1 %v4423_v0 }
 0x87f   :  { %886 = vmatprep.subr.bf16.mxu1 %v4511_v8 }
 0x882   :  { %887 = vmatpush1.bf16.msra.mxu1 %v4522_v10 }
 0x883   :  { %888 = vmatprep.subr.bf16.mxu1 %v4528_v11 }
 0x886   :  { %889 = vmatpush1.bf16.msra.mxu1 %v4538_v13 }
 0x887   :  { %890 = vmatprep.subr.bf16.mxu1 %v4545_v14 }
 0x88a   :  { %891 = vmatpush1.bf16.msra.mxu1 %v4557_v15 }
 0x88b   :  { %1120 = vmatprep.subr.bf16.mxu1 %v4497_v4 }
 0x93d   :  { %v674_v32 = vpop.f32.mrf.mxu1 }
 0x93e   :  { %v683_v33 = vrot.slane %v674_v32, 4 }
 0x93f   :  { %v676_v35 = vpop.f32.mrf.mxu1 }
 0x940   :  { %v685_v37 = vadd.f32 %v683_v33, %v681_v34  ;;  %v687_v38 = vadd.f32 %v686_v36, %v676_v35 }
 0x941   :  { %v678_v39 = vpop.f32.mrf.mxu1 }
 0x942   :  { %4043 = vtanh.f32 %v685_v37  ;;  %v688_v41 = vmul.f32 0.5, %v685_v37  ;;  %v713_v42 = vmul.f32 0.5, %v687_v38 }
 0x943   :  { %4045 = vtanh.f32 %v687_v38  ;;  %v679_v21 = vpop.f32.mrf.mxu1 }
 0x944   :  { %4047 = vtanh.f32 %v688_v41 }
 0x945   :  { %4049 = vtanh.f32 %v713_v42 }
 0x94f   :  { %v4044_v22 = vpop.eup %4043 }
 0x950   :  { %v4046_v40 = vpop.eup %4045  ;;  %698 = vrot.lane.b32.xlu1 %v4044_v22, %s4424_s1 }
 0x951   :  { %723 = vrot.lane.b32.xlu0 %v4046_v40, %s4424_s1  ;;  %v4048_v43 = vpop.eup %4047 }
 0x952   :  { %v4050_v44 = vpop.eup %4049  ;;  %v690_v45 = vmul.f32 0.5, %v4048_v43 }
 0x953   :  { %v715_v46 = vmul.f32 0.5, %v4050_v44 }
 0x954   :  { %v691_v47 = vadd.f32 0.5, %v690_v45 }
 0x955   :  { %v716_v49 = vadd.f32 0.5, %v715_v46 }
 0x956   :  { %v696_v55 = vmul.f32 %v694_v53, %v691_v47 }
 0x957   :  { %v721_v57 = vmul.f32 %v719_v54, %v716_v49 }
 0x9c2   :  { %v699_v48 = vpop.permute.xlu1 %698 }
 0x9c3   :  { %v701_v50 = vmul.f32 %v699_v48, %v691_v47  ;;  %v724_v51 = vpop.permute.xlu0 %723 }
 0x9c4   :  { %v726_v52 = vmul.f32 %v724_v51, %v716_v49 }
 0x9c5   :  { %703 = vrot.lane.b32.xlu1 %v701_v50, %s4424_s1 }
 0x9c6   :  { %728 = vrot.lane.b32.xlu0 %v726_v52, %s4424_s1 }
 0xa37   :  { %v704_v56 = vpop.permute.xlu1 %703 }
 0xa38   :  { %v4707_v58 = vadd.f32 %v704_v56, %v696_v55  ;;  %v729_v59 = vpop.permute.xlu0 %728 }
 0xa39   :  { %v4709_v60 = vadd.f32 %v729_v59, %v721_v57 }
 0xa3a   :  { %4051 = vtanh.f32 %v4707_v58 }
 0xa3b   :  { %4053 = vtanh.f32 %v4709_v60  ;;  %v838_v50 = vrot.slane %v4709_v60, 4 }
 0xa47   :  { %v4052_v61 = vpop.eup %4051 }
 0xa48   :  { %v4054_v62 = vpop.eup %4053  ;;  %709 = vrot.lane.b32.xlu1 %v4052_v61, %s4424_s1 }
 0xa49   :  { %734 = vrot.lane.b32.xlu0 %v4054_v62, %s4424_s1 }
 0xaba   :  { %v710_v63 = vpop.permute.xlu1 %709 }
 0xabb   :  { %v712_v1 = vmul.f32 %v710_v63, %v691_v47  ;;  %v735_v3 = vpop.permute.xlu0 %734  ;;  %v813_v47 = vrot.slane %v4707_v58, 4 }
 0xabc   :  { %v4715_v6 = vmul.f32 %v735_v3, %v716_v49 }
 0xabd   :  { %739 = vrot.lane.b32.xlu0 %v712_v1, %s4426_s27 }
 0xabe   :  { %v743_v9 = vrot.slane %v4715_v6, 4 }
 0xac0   :  { %744 = vrot.lane.b32.xlu1 %v743_v9, %s4425_s26 }
 0xb2f   :  { %v740_v12 = vpop.permute.xlu0 %739 }
 0xb30   :  { %748 = vst.msk [vmem:[#allocation3 + $0x8] sm:$0xf0] %vm510_vm5, %v740_v12 }
 0xb32   :  { %v745_v16 = vpop.permute.xlu1 %744 }
 0xb33   :  { %v747_v19 = vsel %vm389_vm2, %v740_v12, %v745_v16  ;;  %v917_v16 = vld [vmem:[#allocation2 + $0x50] sm:$0xf0] }
 0xb34   :  { %v753_v2 = vpack.c.bf16 %v747_v19, %v747_v19  ;;  %v922_v19 = vld [vmem:[#allocation2 + $0x38] sm:$0xf] }
 0xb36   :  { %v755_v23 = vrot.slane %v753_v2, 2 }
 0xb38   :  { %3718 = vmatmul.mubr.msk.bf16.vlgmr.msra.gmra.mxu0 %vm284_vm4, %v755_v23 }
 0xb39   :  { %1004 = vmatpush1.bf16.msra.mxu0 %v4505_v7  ;;  %1027 = vmatprep.mubr.bf16.mxu0 %v4423_v0 }
 0xb3a   :  { %1005 = vmatprep.subr.bf16.mxu0 %v4511_v8 }
 0xb3d   :  { %1006 = vmatpush1.bf16.msra.mxu0 %v4522_v10 }
 0xb3e   :  { %1007 = vmatprep.subr.bf16.mxu0 %v4528_v11 }
 0xb41   :  { %1008 = vmatpush1.bf16.msra.mxu0 %v4538_v13 }
 0xb42   :  { %1009 = vmatprep.subr.bf16.mxu0 %v4545_v14 }
 0xb45   :  { %1010 = vmatpush1.bf16.msra.mxu0 %v4557_v15 }
 0xb46   :  { %1239 = vmatprep.subr.bf16.mxu0 %v4497_v4 }
 0xbf8   :  { %v793_v5 = vpop.f32.mrf.mxu0 }
 0xbf9   :  { %v801_v27 = vadd.f32 %v800_v26, %v793_v5 }
 0xbfa   :  { %v795_v28 = vpop.f32.mrf.mxu0 }
 0xbfb   :  { %4055 = vtanh.f32 %v801_v27  ;;  %v804_v30 = vrot.slane %v795_v28, 4  ;;  %v807_v37 = vmul.f32 0.5, %v801_v27 }
 0xbfc   :  { %v797_v32 = vpop.f32.mrf.mxu0 }
 0xbfd   :  { %v806_v33 = vadd.f32 %v804_v30, %v802_v31 }
 0xbfe   :  { %v798_v34 = vpop.f32.mrf.mxu0 }
 0xbff   :  { %4057 = vtanh.f32 %v806_v33  ;;  %v832_v38 = vmul.f32 0.5, %v806_v33 }
 0xc00   :  { %4059 = vtanh.f32 %v807_v37 }
 0xc01   :  { %4061 = vtanh.f32 %v832_v38 }
 0xc08   :  { %v4056_v35 = vpop.eup %4055 }
 0xc09   :  { %817 = vrot.lane.b32.xlu1 %v4056_v35, %s4424_s1 }
 0xc0c   :  { %v4058_v36 = vpop.eup %4057 }
 0xc0d   :  { %842 = vrot.lane.b32.xlu0 %v4058_v36, %s4424_s1  ;;  %v4060_v39 = vpop.eup %4059 }
 0xc0e   :  { %v809_v21 = vmul.f32 0.5, %v4060_v39  ;;  %v4062_v22 = vpop.eup %4061 }
 0xc0f   :  { %v834_v41 = vmul.f32 0.5, %v4062_v22 }
 0xc10   :  { %v810_v40 = vadd.f32 0.5, %v809_v21 }
 0xc11   :  { %v835_v44 = vadd.f32 0.5, %v834_v41 }
 0xc12   :  { %v815_v48 = vmul.f32 %v813_v47, %v810_v40 }
 0xc13   :  { %v840_v52 = vmul.f32 %v838_v50, %v835_v44 }
 0xc7b   :  { %v818_v42 = vpop.permute.xlu1 %817 }
 0xc7c   :  { %v820_v43 = vmul.f32 %v818_v42, %v810_v40 }
 0xc7e   :  { %822 = vrot.lane.b32.xlu1 %v820_v43, %s4424_s1 }
 0xc7f   :  { %v843_v45 = vpop.permute.xlu0 %842 }
 0xc80   :  { %v845_v46 = vmul.f32 %v843_v45, %v835_v44 }
 0xc82   :  { %847 = vrot.lane.b32.xlu0 %v845_v46, %s4424_s1 }
 0xcf0   :  { %v823_v49 = vpop.permute.xlu1 %822 }
 0xcf1   :  { %v4738_v51 = vadd.f32 %v823_v49, %v815_v48 }
 0xcf3   :  { %4063 = vtanh.f32 %v4738_v51  ;;  %v930_v37 = vrot.slane %v4738_v51, 4 }
 0xcf4   :  { %v848_v53 = vpop.permute.xlu0 %847 }
 0xcf5   :  { %v4741_v54 = vadd.f32 %v848_v53, %v840_v52 }
 0xcf7   :  { %4065 = vtanh.f32 %v4741_v54  ;;  %v955_v38 = vrot.slane %v4741_v54, 4 }
 0xd00   :  { %v4064_v55 = vpop.eup %4063 }
 0xd01   :  { %828 = vrot.lane.b32.xlu1 %v4064_v55, %s4424_s1  ;;  %v4788_v55 = vld [vmem:[%s5451_s3 + $0x30] ss:$8 sps:$4 sm:$0xff]  }
 0xd04   :  { %v4066_v56 = vpop.eup %4065 }
 0xd05   :  { %853 = vrot.lane.b32.xlu0 %v4066_v56, %s4424_s1  ;;  %v4795_v56 = vld [vmem:[%s5451_s3 + $0x24] ss:$8 sps:$4 sm:$0xff]  }
 0xd73   :  { %v829_v57 = vpop.permute.xlu1 %828 }
 0xd74   :  { %v831_v58 = vmul.f32 %v829_v57, %v810_v40  ;;  %v4801_v57 = vld [vmem:[%s5451_s3 + $0x20] ss:$8 sps:$4 sm:$0xff]  }
 0xd76   :  { %858 = vrot.lane.b32.xlu0 %v831_v58, %s4426_s27  ;;  %v4807_v58 = vld [vmem:[%s5451_s3 + $0x14] ss:$8 sps:$4 sm:$0xff]  }
 0xd77   :  { %v854_v59 = vpop.permute.xlu0 %853 }
 0xd78   :  { %v4747_v60 = vmul.f32 %v854_v59, %v835_v44  ;;  %v4813_v59 = vld [vmem:[%s5451_s3 + $0x10] ss:$8 sps:$4 sm:$0xff]  }
 0xd7a   :  { %v862_v61 = vrot.slane %v4747_v60, 4 }
 0xd7c   :  { %863 = vrot.lane.b32.xlu1 %v862_v61, %s4425_s26  ;;  %v4821_v61 = vld [vmem:[%s5451_s3 + $0x34] ss:$8 sps:$4 sm:$0xff]  }
 0xde8   :  { %v859_v62 = vpop.permute.xlu0 %858 }
 0xde9   :  { %867 = vst.msk [vmem:[#allocation3 + $0x10] sm:$0xf] %vm391_vm3, %v859_v62 }
 0xdee   :  { %v864_v63 = vpop.permute.xlu1 %863 }
 0xdef   :  { %v866_v1 = vsel %vm389_vm2, %v859_v62, %v864_v63  ;;  %v1036_v63 = vld [vmem:[#allocation2 + $0x8] sm:$0xf] }
 0xdf0   :  { %v872_v3 = vpack.c.bf16 %v866_v1, %v866_v1 }
 0xdf2   :  { %3719 = vmatmul.mubr.msk.bf16.vlgmr.msra.gmra.mxu1 %vm284_vm4, %v872_v3 }
 0xdf3   :  { %1121 = vmatpush1.bf16.msra.mxu1 %v4505_v7  ;;  %1144 = vmatprep.mubr.bf16.mxu1 %v4423_v0 }
 0xdf4   :  { %1122 = vmatprep.subr.bf16.mxu1 %v4511_v8 }
 0xdf7   :  { %1123 = vmatpush1.bf16.msra.mxu1 %v4522_v10 }
 0xdf8   :  { %1124 = vmatprep.subr.bf16.mxu1 %v4528_v11 }
 0xdfb   :  { %1125 = vmatpush1.bf16.msra.mxu1 %v4538_v13 }
 0xdfc   :  { %1126 = vmatprep.subr.bf16.mxu1 %v4545_v14 }
 0xdff   :  { %1127 = vmatpush1.bf16.msra.mxu1 %v4557_v15 }
 0xe00   :  { %1356 = vmatprep.subr.bf16.mxu1 %v4497_v4 }
 0xeb2   :  { %v910_v9 = vpop.f32.mrf.mxu1 }
 0xeb3   :  { %v919_v12 = vrot.slane %v910_v9, 4 }
 0xeb4   :  { %v912_v7 = vpop.f32.mrf.mxu1 }
 0xeb5   :  { %v921_v2 = vadd.f32 %v919_v12, %v917_v16  ;;  %v923_v23 = vadd.f32 %v922_v19, %v912_v7  ;;  %v1038_v12 = vld [vmem:[#allocation2 + $0x20] sm:$0xf0] }
 0xeb6   :  { %v914_v8 = vpop.f32.mrf.mxu1 }
 0xeb7   :  { %4067 = vtanh.f32 %v921_v2  ;;  %v924_v13 = vmul.f32 0.5, %v921_v2  ;;  %v949_v26 = vmul.f32 0.5, %v923_v23 }
 0xeb8   :  { %4069 = vtanh.f32 %v923_v23  ;;  %v915_v10 = vpop.f32.mrf.mxu1 }
 0xeb9   :  { %4071 = vtanh.f32 %v924_v13 }
 0xeba   :  { %4073 = vtanh.f32 %v949_v26 }
 0xec4   :  { %v4068_v11 = vpop.eup %4067 }
 0xec5   :  { %v4070_v5 = vpop.eup %4069  ;;  %934 = vrot.lane.b32.xlu1 %v4068_v11, %s4424_s1 }
 0xec6   :  { %959 = vrot.lane.b32.xlu0 %v4070_v5, %s4424_s1  ;;  %v4072_v4 = vpop.eup %4071 }
 0xec7   :  { %v4074_v27 = vpop.eup %4073  ;;  %v926_v28 = vmul.f32 0.5, %v4072_v4 }
 0xec8   :  { %v951_v30 = vmul.f32 0.5, %v4074_v27 }
 0xec9   :  { %v927_v31 = vadd.f32 0.5, %v926_v28 }
 0xeca   :  { %v952_v33 = vadd.f32 0.5, %v951_v30 }
 0xecb   :  { %v932_v39 = vmul.f32 %v930_v37, %v927_v31 }
 0xecc   :  { %v957_v22 = vmul.f32 %v955_v38, %v952_v33 }
 0xf37   :  { %v935_v32 = vpop.permute.xlu1 %934 }
 0xf38   :  { %v937_v34 = vmul.f32 %v935_v32, %v927_v31  ;;  %v960_v35 = vpop.permute.xlu0 %959 }
 0xf39   :  { %v962_v36 = vmul.f32 %v960_v35, %v952_v33 }
 0xf3a   :  { %939 = vrot.lane.b32.xlu1 %v937_v34, %s4424_s1 }
 0xf3b   :  { %964 = vrot.lane.b32.xlu0 %v962_v36, %s4424_s1 }
 0xfac   :  { %v940_v21 = vpop.permute.xlu1 %939 }
 0xfad   :  { %v4769_v40 = vadd.f32 %v940_v21, %v932_v39  ;;  %v965_v41 = vpop.permute.xlu0 %964 }
 0xfae   :  { %v4771_v42 = vadd.f32 %v965_v41, %v957_v22 }
 0xfaf   :  { %4075 = vtanh.f32 %v4769_v40 }
 0xfb0   :  { %4077 = vtanh.f32 %v4771_v42  ;;  %v1074_v34 = vrot.slane %v4771_v42, 4 }
 0xfbc   :  { %v4076_v43 = vpop.eup %4075 }
 0xfbd   :  { %v4078_v44 = vpop.eup %4077  ;;  %945 = vrot.lane.b32.xlu1 %v4076_v43, %s4424_s1 }
 0xfbe   :  { %970 = vrot.lane.b32.xlu0 %v4078_v44, %s4424_s1 }
0x102f   :  { %v946_v45 = vpop.permute.xlu1 %945 }
0x1030   :  { %v948_v46 = vmul.f32 %v946_v45, %v927_v31  ;;  %v971_v47 = vpop.permute.xlu0 %970  ;;  %v1049_v31 = vrot.slane %v4769_v40, 4 }
0x1031   :  { %v4777_v48 = vmul.f32 %v971_v47, %v952_v33 }
0x1032   :  { %975 = vrot.lane.b32.xlu0 %v948_v46, %s4426_s27 }
0x1033   :  { %v979_v49 = vrot.slane %v4777_v48, 4 }
0x1035   :  { %980 = vrot.lane.b32.xlu1 %v979_v49, %s4425_s26  ;;  %v4855_v49 = vld [vmem:[%s5451_s3 + $0x4] ss:$8 sps:$4 sm:$0xff]  }
0x10a4   :  { %v976_v50 = vpop.permute.xlu0 %975 }
0x10a5   :  { %984 = vst.msk [vmem:[#allocation3 + $0x10] sm:$0xf0] %vm510_vm5, %v976_v50 }
0x10a7   :  { %v981_v51 = vpop.permute.xlu1 %980 }
0x10a8   :  { %v983_v52 = vsel %vm389_vm2, %v976_v50, %v981_v51  ;;  %v4861_v50 = vld [vmem:[%s5451_s3] ss:$8 sps:$4 sm:$0xff]  }
0x10a9   :  { %v989_v53 = vpack.c.bf16 %v983_v52, %v983_v52 }
0x10ab   :  { %v991_v54 = vrot.slane %v989_v53, 2  ;;  %v1153_v53 = vld [vmem:[#allocation2 + $0x8] sm:$0xf0] }
0x10ad   :  { %3720 = vmatmul.mubr.msk.bf16.vlgmr.msra.gmra.mxu0 %vm284_vm4, %v991_v54 }
0x10ae   :  { %1240 = vmatpush1.bf16.msra.mxu0 %v4788_v55  ;;  %1263 = vmatprep.mubr.bf16.mxu0 %v4423_v0 }
0x10af   :  { %1241 = vmatprep.subr.bf16.mxu0 %v4795_v56 }
0x10b2   :  { %1242 = vmatpush1.bf16.msra.mxu0 %v4801_v57 }
0x10b3   :  { %1243 = vmatprep.subr.bf16.mxu0 %v4807_v58 }
0x10b6   :  { %1244 = vmatpush1.bf16.msra.mxu0 %v4813_v59 }
0x10b7   :  { %1245 = vmatprep.subr.bf16.mxu0 %v4545_v14 }
0x10ba   :  { %1246 = vmatpush1.bf16.msra.mxu0 %v4557_v15 }
0x10bb   :  { %1475 = vmatprep.subr.bf16.mxu0 %v4821_v61 }
0x116d   :  { %v1029_v62 = vpop.f32.mrf.mxu0 }
0x116e   :  { %v1037_v1 = vadd.f32 %v1036_v63, %v1029_v62  ;;  %v1158_v62 = vld [vmem:[#allocation2 + $0x20] sm:$0xf] }
0x116f   :  { %v1031_v3 = vpop.f32.mrf.mxu0 }
0x1170   :  { %4079 = vtanh.f32 %v1037_v1  ;;  %v1040_v9 = vrot.slane %v1031_v3, 4  ;;  %v1043_v2 = vmul.f32 0.5, %v1037_v1 }
0x1171   :  { %v1033_v16 = vpop.f32.mrf.mxu0 }
0x1172   :  { %v1042_v7 = vadd.f32 %v1040_v9, %v1038_v12 }
0x1173   :  { %v1034_v19 = vpop.f32.mrf.mxu0 }
0x1174   :  { %4081 = vtanh.f32 %v1042_v7  ;;  %v1068_v23 = vmul.f32 0.5, %v1042_v7 }
0x1175   :  { %4083 = vtanh.f32 %v1043_v2 }
0x1176   :  { %4085 = vtanh.f32 %v1068_v23 }
0x117d   :  { %v4080_v14 = vpop.eup %4079 }
0x117e   :  { %1053 = vrot.lane.b32.xlu1 %v4080_v14, %s4424_s1 }
0x1181   :  { %v4082_v15 = vpop.eup %4081 }
0x1182   :  { %1078 = vrot.lane.b32.xlu0 %v4082_v15, %s4424_s1  ;;  %v4084_v8 = vpop.eup %4083 }
0x1183   :  { %v1045_v10 = vmul.f32 0.5, %v4084_v8  ;;  %v4086_v11 = vpop.eup %4085 }
0x1184   :  { %v1070_v13 = vmul.f32 0.5, %v4086_v11 }
0x1185   :  { %v1046_v5 = vadd.f32 0.5, %v1045_v10 }
0x1186   :  { %v1071_v27 = vadd.f32 0.5, %v1070_v13 }
0x1187   :  { %v1051_v32 = vmul.f32 %v1049_v31, %v1046_v5 }
0x1188   :  { %v1076_v36 = vmul.f32 %v1074_v34, %v1071_v27 }
0x11f0   :  { %v1054_v26 = vpop.permute.xlu1 %1053 }
0x11f1   :  { %v1056_v4 = vmul.f32 %v1054_v26, %v1046_v5 }
0x11f3   :  { %1058 = vrot.lane.b32.xlu1 %v1056_v4, %s4424_s1 }
0x11f4   :  { %v1079_v28 = vpop.permute.xlu0 %1078 }
0x11f5   :  { %v1081_v30 = vmul.f32 %v1079_v28, %v1071_v27 }
0x11f7   :  { %1083 = vrot.lane.b32.xlu0 %v1081_v30, %s4424_s1 }
0x1265   :  { %v1059_v33 = vpop.permute.xlu1 %1058 }
0x1266   :  { %v4830_v35 = vadd.f32 %v1059_v33, %v1051_v32 }
0x1268   :  { %4087 = vtanh.f32 %v4830_v35  ;;  %v1166_v4 = vrot.slane %v4830_v35, 4 }
0x1269   :  { %v1084_v37 = vpop.permute.xlu0 %1083 }
0x126a   :  { %v4833_v38 = vadd.f32 %v1084_v37, %v1076_v36 }
0x126c   :  { %4089 = vtanh.f32 %v4833_v38 }
0x1275   :  { %v4088_v39 = vpop.eup %4087 }
0x1276   :  { %1064 = vrot.lane.b32.xlu1 %v4088_v39, %s4424_s1 }
0x1279   :  { %v4090_v21 = vpop.eup %4089 }
0x127a   :  { %1089 = vrot.lane.b32.xlu0 %v4090_v21, %s4424_s1 }
0x12e8   :  { %v1065_v22 = vpop.permute.xlu1 %1064 }
0x12e9   :  { %v1067_v40 = vmul.f32 %v1065_v22, %v1046_v5 }
0x12eb   :  { %1094 = vrot.lane.b32.xlu0 %v1067_v40, %s4426_s27 }
0x12ec   :  { %v1090_v41 = vpop.permute.xlu0 %1089 }
0x12ed   :  { %v4839_v42 = vmul.f32 %v1090_v41, %v1071_v27  ;;  %v1191_v27 = vrot.slane %v4833_v38, 4 }
0x12ef   :  { %v1098_v43 = vrot.slane %v4839_v42, 4 }
0x12f1   :  { %1099 = vrot.lane.b32.xlu1 %v1098_v43, %s4425_s26 }
0x135d   :  { %v1095_v44 = vpop.permute.xlu0 %1094 }
0x135e   :  { %1103 = vst.msk [vmem:[#allocation3 + $0x18] sm:$0xf] %vm391_vm3, %v1095_v44 }
0x1363   :  { %v1100_v45 = vpop.permute.xlu1 %1099 }
0x1364   :  { %v1102_v46 = vsel %vm389_vm2, %v1095_v44, %v1100_v45 }
0x1365   :  { %v1108_v47 = vpack.c.bf16 %v1102_v46, %v1102_v46 }
0x1367   :  { %3721 = vmatmul.mubr.msk.bf16.vlgmr.msra.gmra.mxu1 %vm284_vm4, %v1108_v47  ;;  %v1272_v47 = vld [vmem:[#allocation2 + $0x40] sm:$0xf] }
0x1368   :  { %1357 = vmatpush1.bf16.msra.mxu1 %v4788_v55  ;;  %1380 = vmatprep.mubr.bf16.mxu1 %v4423_v0 }
0x1369   :  { %1358 = vmatprep.subr.bf16.mxu1 %v4795_v56 }
0x136c   :  { %1359 = vmatpush1.bf16.msra.mxu1 %v4801_v57 }
0x136d   :  { %1360 = vmatprep.subr.bf16.mxu1 %v4807_v58 }
0x1370   :  { %1361 = vmatpush1.bf16.msra.mxu1 %v4813_v59 }
0x1371   :  { %1362 = vmatprep.subr.bf16.mxu1 %v4855_v49 }
0x1374   :  { %1363 = vmatpush1.bf16.msra.mxu1 %v4861_v50 }
0x1375   :  { %1592 = vmatprep.subr.bf16.mxu1 %v4821_v61 }
0x1427   :  { %v1146_v51 = vpop.f32.mrf.mxu1 }
0x1428   :  { %v1155_v52 = vrot.slane %v1146_v51, 4 }
0x1429   :  { %v1148_v54 = vpop.f32.mrf.mxu1 }
0x142a   :  { %v1157_v63 = vadd.f32 %v1155_v52, %v1153_v53  ;;  %v1159_v1 = vadd.f32 %v1158_v62, %v1148_v54  ;;  %v1274_v54 = vld [vmem:[#allocation2 + $0x48] sm:$0xf0] }
0x142b   :  { %v1150_v3 = vpop.f32.mrf.mxu1 }
0x142c   :  { %4091 = vtanh.f32 %v1157_v63  ;;  %v1160_v7 = vmul.f32 0.5, %v1157_v63  ;;  %v1185_v19 = vmul.f32 0.5, %v1159_v1 }
0x142d   :  { %4093 = vtanh.f32 %v1159_v1  ;;  %v1151_v9 = vpop.f32.mrf.mxu1 }
0x142e   :  { %4095 = vtanh.f32 %v1160_v7 }
0x142f   :  { %4097 = vtanh.f32 %v1185_v19 }
0x1439   :  { %v4092_v12 = vpop.eup %4091 }
0x143a   :  { %v4094_v16 = vpop.eup %4093  ;;  %1170 = vrot.lane.b32.xlu1 %v4092_v12, %s4424_s1 }
0x143b   :  { %1195 = vrot.lane.b32.xlu0 %v4094_v16, %s4424_s1  ;;  %v4096_v14 = vpop.eup %4095 }
0x143c   :  { %v4098_v15 = vpop.eup %4097  ;;  %v1162_v2 = vmul.f32 0.5, %v4096_v14 }
0x143d   :  { %v1187_v23 = vmul.f32 0.5, %v4098_v15 }
0x143e   :  { %v1163_v8 = vadd.f32 0.5, %v1162_v2 }
0x143f   :  { %v1188_v11 = vadd.f32 0.5, %v1187_v23 }
0x1440   :  { %v1168_v28 = vmul.f32 %v1166_v4, %v1163_v8 }
0x1441   :  { %v1193_v31 = vmul.f32 %v1191_v27, %v1188_v11 }
0x14ac   :  { %v1171_v10 = vpop.permute.xlu1 %1170 }
0x14ad   :  { %v1173_v5 = vmul.f32 %v1171_v10, %v1163_v8  ;;  %v1196_v13 = vpop.permute.xlu0 %1195 }
0x14ae   :  { %v1198_v26 = vmul.f32 %v1196_v13, %v1188_v11 }
0x14af   :  { %1175 = vrot.lane.b32.xlu1 %v1173_v5, %s4424_s1 }
0x14b0   :  { %1200 = vrot.lane.b32.xlu0 %v1198_v26, %s4424_s1 }
0x1521   :  { %v1176_v30 = vpop.permute.xlu1 %1175 }
0x1522   :  { %v4871_v32 = vadd.f32 %v1176_v30, %v1168_v28  ;;  %v1201_v33 = vpop.permute.xlu0 %1200 }
0x1523   :  { %v4873_v34 = vadd.f32 %v1201_v33, %v1193_v31 }
0x1524   :  { %4099 = vtanh.f32 %v4871_v32  ;;  %v1285_v13 = vrot.slane %v4871_v32, 4 }
0x1525   :  { %4101 = vtanh.f32 %v4873_v34  ;;  %v1310_v27 = vrot.slane %v4873_v34, 4 }
0x1531   :  { %v4100_v36 = vpop.eup %4099 }
0x1532   :  { %v4102_v37 = vpop.eup %4101  ;;  %1181 = vrot.lane.b32.xlu1 %v4100_v36, %s4424_s1 }
0x1533   :  { %1206 = vrot.lane.b32.xlu0 %v4102_v37, %s4424_s1 }
0x15a4   :  { %v1182_v35 = vpop.permute.xlu1 %1181 }
0x15a5   :  { %v1184_v38 = vmul.f32 %v1182_v35, %v1163_v8  ;;  %v1207_v39 = vpop.permute.xlu0 %1206 }
0x15a6   :  { %v4879_v21 = vmul.f32 %v1207_v39, %v1188_v11 }
0x15a7   :  { %1211 = vrot.lane.b32.xlu0 %v1184_v38, %s4426_s27 }
0x15a8   :  { %v1215_v22 = vrot.slane %v4879_v21, 4 }
0x15aa   :  { %1216 = vrot.lane.b32.xlu1 %v1215_v22, %s4425_s26 }
0x1619   :  { %v1212_v40 = vpop.permute.xlu0 %1211 }
0x161a   :  { %1220 = vst.msk [vmem:[#allocation3 + $0x18] sm:$0xf0] %vm510_vm5, %v1212_v40 }
0x161c   :  { %v1217_v41 = vpop.permute.xlu1 %1216 }
0x161d   :  { %v1219_v43 = vsel %vm389_vm2, %v1212_v40, %v1217_v41 }
0x161e   :  { %v1225_v44 = vpack.c.bf16 %v1219_v43, %v1219_v43 }
0x1620   :  { %v1227_v45 = vrot.slane %v1225_v44, 2 }
0x1622   :  { %3722 = vmatmul.mubr.msk.bf16.vlgmr.msra.gmra.mxu0 %vm284_vm4, %v1227_v45 }
0x1623   :  { %1476 = vmatpush1.bf16.msra.mxu0 %v4788_v55  ;;  %1499 = vmatprep.mubr.bf16.mxu0 %v4423_v0 }
0x1624   :  { %1477 = vmatprep.subr.bf16.mxu0 %v4795_v56 }
0x1627   :  { %1478 = vmatpush1.bf16.msra.mxu0 %v4801_v57 }
0x1628   :  { %1479 = vmatprep.subr.bf16.mxu0 %v4807_v58 }
0x162b   :  { %1480 = vmatpush1.bf16.msra.mxu0 %v4813_v59 }
0x162c   :  { %1481 = vmatprep.subr.bf16.mxu0 %v4855_v49 }
0x162f   :  { %1482 = vmatpush1.bf16.msra.mxu0 %v4861_v50 }
0x1630   :  { %1711 = vmatprep.subr.bf16.mxu0 %v4821_v61 }
0x16e2   :  { %v1265_v46 = vpop.f32.mrf.mxu0 }
0x16e3   :  { %v1273_v51 = vadd.f32 %v1272_v47, %v1265_v46  ;;  %v1389_v46 = vld [vmem:[#allocation2 + $0x40] sm:$0xf0] }
0x16e4   :  { %v1267_v52 = vpop.f32.mrf.mxu0 }
0x16e5   :  { %4103 = vtanh.f32 %v1273_v51  ;;  %v1276_v53 = vrot.slane %v1267_v52, 4  ;;  %v1279_v12 = vmul.f32 0.5, %v1273_v51  ;;  %v1394_v51 = vld [vmem:[#allocation2 + $0x48] sm:$0xf] }
0x16e6   :  { %v1269_v62 = vpop.f32.mrf.mxu0 }
0x16e7   :  { %v1278_v63 = vadd.f32 %v1276_v53, %v1274_v54 }
0x16e8   :  { %v1270_v1 = vpop.f32.mrf.mxu0 }
0x16e9   :  { %4105 = vtanh.f32 %v1278_v63  ;;  %v1304_v16 = vmul.f32 0.5, %v1278_v63 }
0x16ea   :  { %4107 = vtanh.f32 %v1279_v12 }
0x16eb   :  { %4109 = vtanh.f32 %v1304_v16 }
0x16f2   :  { %v4104_v3 = vpop.eup %4103 }
0x16f3   :  { %1289 = vrot.lane.b32.xlu1 %v4104_v3, %s4424_s1 }
0x16f6   :  { %v4106_v9 = vpop.eup %4105 }
0x16f7   :  { %1314 = vrot.lane.b32.xlu0 %v4106_v9, %s4424_s1  ;;  %v4108_v7 = vpop.eup %4107 }
0x16f8   :  { %v1281_v19 = vmul.f32 0.5, %v4108_v7  ;;  %v4110_v14 = vpop.eup %4109 }
0x16f9   :  { %v1306_v2 = vmul.f32 0.5, %v4110_v14 }
0x16fa   :  { %v1282_v15 = vadd.f32 0.5, %v1281_v19 }
0x16fb   :  { %v1307_v10 = vadd.f32 0.5, %v1306_v2 }
0x16fc   :  { %v1287_v26 = vmul.f32 %v1285_v13, %v1282_v15 }
0x16fd   :  { %v1312_v30 = vmul.f32 %v1310_v27, %v1307_v10 }
0x1765   :  { %v1290_v23 = vpop.permute.xlu1 %1289 }
0x1766   :  { %v1292_v8 = vmul.f32 %v1290_v23, %v1282_v15 }
0x1768   :  { %1294 = vrot.lane.b32.xlu1 %v1292_v8, %s4424_s1 }
0x1769   :  { %v1315_v11 = vpop.permute.xlu0 %1314 }
0x176a   :  { %v1317_v5 = vmul.f32 %v1315_v11, %v1307_v10 }
0x176c   :  { %1319 = vrot.lane.b32.xlu0 %v1317_v5, %s4424_s1 }
0x17da   :  { %v1295_v4 = vpop.permute.xlu1 %1294 }
0x17db   :  { %v4902_v28 = vadd.f32 %v1295_v4, %v1287_v26 }
0x17dd   :  { %4111 = vtanh.f32 %v4902_v28  ;;  %v1402_v11 = vrot.slane %v4902_v28, 4 }
0x17de   :  { %v1320_v31 = vpop.permute.xlu0 %1319 }
0x17df   :  { %v4905_v33 = vadd.f32 %v1320_v31, %v1312_v30 }
0x17e1   :  { %4113 = vtanh.f32 %v4905_v33  ;;  %v1427_v5 = vrot.slane %v4905_v33, 4 }
0x17ea   :  { %v4112_v36 = vpop.eup %4111 }
0x17eb   :  { %1300 = vrot.lane.b32.xlu1 %v4112_v36, %s4424_s1 }
0x17ee   :  { %v4114_v37 = vpop.eup %4113 }
0x17ef   :  { %1325 = vrot.lane.b32.xlu0 %v4114_v37, %s4424_s1 }
0x185d   :  { %v1301_v32 = vpop.permute.xlu1 %1300 }
0x185e   :  { %v1303_v35 = vmul.f32 %v1301_v32, %v1282_v15 }
0x1860   :  { %1330 = vrot.lane.b32.xlu0 %v1303_v35, %s4426_s27 }
0x1861   :  { %v1326_v34 = vpop.permute.xlu0 %1325 }
0x1862   :  { %v4911_v38 = vmul.f32 %v1326_v34, %v1307_v10 }
0x1864   :  { %v1334_v39 = vrot.slane %v4911_v38, 4 }
0x1866   :  { %1335 = vrot.lane.b32.xlu1 %v1334_v39, %s4425_s26 }
0x18d2   :  { %v4915_v22 = vpop.permute.xlu0 %1330 }
0x18d8   :  { %v1336_v40 = vpop.permute.xlu1 %1335 }
0x18d9   :  { %v1338_v41 = vsel %vm389_vm2, %v4915_v22, %v1336_v40 }
0x18da   :  { %v1344_v43 = vpack.c.bf16 %v1338_v41, %v1338_v41 }
0x18dc   :  { %3723 = vmatmul.mubr.msk.bf16.vlgmr.msra.gmra.mxu1 %vm284_vm4, %v1344_v43 }
0x18dd   :  { %1593 = vmatpush1.bf16.msra.mxu1 %v4788_v55  ;;  %1616 = vmatprep.mubr.bf16.mxu1 %v4423_v0 }
0x18de   :  { %1594 = vmatprep.subr.bf16.mxu1 %v4795_v56 }
0x18e1   :  { %1595 = vmatpush1.bf16.msra.mxu1 %v4801_v57 }
0x18e2   :  { %1596 = vmatprep.subr.bf16.mxu1 %v4807_v58 }
0x18e5   :  { %1597 = vmatpush1.bf16.msra.mxu1 %v4813_v59 }
0x18e6   :  { %1598 = vmatprep.subr.bf16.mxu1 %v4855_v49 }
0x18e9   :  { %1599 = vmatpush1.bf16.msra.mxu1 %v4861_v50 }
0x18ea   :  { %1828 = vmatprep.subr.bf16.mxu1 %v4821_v61 }
0x199c   :  { %v1382_v44 = vpop.f32.mrf.mxu1 }
0x199d   :  { %v1391_v45 = vrot.slane %v1382_v44, 4 }
0x199e   :  { %v1384_v47 = vpop.f32.mrf.mxu1 }
0x199f   :  { %v1393_v52 = vadd.f32 %v1391_v45, %v1389_v46  ;;  %v1395_v53 = vadd.f32 %v1394_v51, %v1384_v47  ;;  %v1508_v46 = vld [vmem:[#allocation2 + $0x10] sm:$0xf] }
0x19a0   :  { %v1386_v54 = vpop.f32.mrf.mxu1 }
0x19a1   :  { %4115 = vtanh.f32 %v1393_v52  ;;  %v1396_v3 = vmul.f32 0.5, %v1393_v52  ;;  %v1421_v9 = vmul.f32 0.5, %v1395_v53 }
0x19a2   :  { %4117 = vtanh.f32 %v1395_v53  ;;  %v1387_v62 = vpop.f32.mrf.mxu1  ;;  %v1510_v53 = vld [vmem:[#allocation2 + $0x68] sm:$0xf0] }
0x19a3   :  { %4119 = vtanh.f32 %v1396_v3 }
0x19a4   :  { %4121 = vtanh.f32 %v1421_v9 }
0x19ae   :  { %v4116_v63 = vpop.eup %4115 }
0x19af   :  { %v4118_v1 = vpop.eup %4117  ;;  %1406 = vrot.lane.b32.xlu1 %v4116_v63, %s4424_s1 }
0x19b0   :  { %1431 = vrot.lane.b32.xlu0 %v4118_v1, %s4424_s1  ;;  %v4120_v12 = vpop.eup %4119 }
0x19b1   :  { %v4122_v16 = vpop.eup %4121  ;;  %v1398_v7 = vmul.f32 0.5, %v4120_v12 }
0x19b2   :  { %v1423_v19 = vmul.f32 0.5, %v4122_v16 }
0x19b3   :  { %v1399_v14 = vadd.f32 0.5, %v1398_v7 }
0x19b4   :  { %v1424_v2 = vadd.f32 0.5, %v1423_v19 }
0x19b5   :  { %v1404_v13 = vmul.f32 %v1402_v11, %v1399_v14 }
0x19b6   :  { %v1429_v4 = vmul.f32 %v1427_v5, %v1424_v2 }
0x1a21   :  { %v1407_v15 = vpop.permute.xlu1 %1406 }
0x1a22   :  { %v1409_v23 = vmul.f32 %v1407_v15, %v1399_v14  ;;  %v1432_v8 = vpop.permute.xlu0 %1431 }
0x1a23   :  { %v1434_v10 = vmul.f32 %v1432_v8, %v1424_v2 }
0x1a24   :  { %1411 = vrot.lane.b32.xlu1 %v1409_v23, %s4424_s1 }
0x1a25   :  { %1436 = vrot.lane.b32.xlu0 %v1434_v10, %s4424_s1 }
0x1a96   :  { %v1412_v26 = vpop.permute.xlu1 %1411 }
0x1a97   :  { %v4935_v27 = vadd.f32 %v1412_v26, %v1404_v13  ;;  %v1437_v30 = vpop.permute.xlu0 %1436 }
0x1a98   :  { %v4937_v31 = vadd.f32 %v1437_v30, %v1429_v4 }
0x1a99   :  { %4123 = vtanh.f32 %v4935_v27  ;;  %v1521_v5 = vrot.slane %v4935_v27, 4 }
0x1a9a   :  { %4125 = vtanh.f32 %v4937_v31  ;;  %v1546_v4 = vrot.slane %v4937_v31, 4 }
0x1aa6   :  { %v4124_v36 = vpop.eup %4123 }
0x1aa7   :  { %v4126_v37 = vpop.eup %4125  ;;  %1417 = vrot.lane.b32.xlu1 %v4124_v36, %s4424_s1 }
0x1aa8   :  { %1442 = vrot.lane.b32.xlu0 %v4126_v37, %s4424_s1 }
0x1b19   :  { %v1418_v28 = vpop.permute.xlu1 %1417 }
0x1b1a   :  { %v1420_v33 = vmul.f32 %v1418_v28, %v1399_v14  ;;  %v1443_v32 = vpop.permute.xlu0 %1442 }
0x1b1b   :  { %v4943_v35 = vmul.f32 %v1443_v32, %v1424_v2 }
0x1b1c   :  { %1447 = vrot.lane.b32.xlu0 %v1420_v33, %s4426_s27 }
0x1b1d   :  { %v1451_v34 = vrot.slane %v4943_v35, 4 }
0x1b1f   :  { %1452 = vrot.lane.b32.xlu1 %v1451_v34, %s4425_s26 }
0x1b8e   :  { %v4948_v39 = vpop.permute.xlu0 %1447 }
0x1b91   :  { %v1453_v40 = vpop.permute.xlu1 %1452 }
0x1b92   :  { %v1455_v41 = vsel %vm389_vm2, %v4948_v39, %v1453_v40 }
0x1b93   :  { %v1461_v43 = vpack.c.bf16 %v1455_v41, %v1455_v41 }
0x1b95   :  { %v1463_v44 = vrot.slane %v1461_v43, 2 }
0x1b97   :  { %3724 = vmatmul.mubr.msk.bf16.vlgmr.msra.gmra.mxu0 %vm284_vm4, %v1463_v44 }
0x1b98   :  { %1712 = vmatpush1.bf16.msra.mxu0 %v4788_v55  ;;  %1735 = vmatprep.mubr.bf16.mxu0 %v4423_v0 }
0x1b99   :  { %1713 = vmatprep.subr.bf16.mxu0 %v4795_v56 }
0x1b9c   :  { %1714 = vmatpush1.bf16.msra.mxu0 %v4801_v57 }
0x1b9d   :  { %1715 = vmatprep.subr.bf16.mxu0 %v4807_v58 }
0x1ba0   :  { %1716 = vmatpush1.bf16.msra.mxu0 %v4813_v59 }
0x1ba1   :  { %1717 = vmatprep.subr.bf16.mxu0 %v4855_v49 }
0x1ba4   :  { %1718 = vmatpush1.bf16.msra.mxu0 %v4861_v50 }
0x1ba5   :  { %1947 = vmatprep.subr.bf16.mxu0 %v4821_v61 }
0x1c57   :  { %v1501_v45 = vpop.f32.mrf.mxu0 }
0x1c58   :  { %v1509_v47 = vadd.f32 %v1508_v46, %v1501_v45 }
0x1c59   :  { %v1503_v51 = vpop.f32.mrf.mxu0 }
0x1c5a   :  { %4127 = vtanh.f32 %v1509_v47  ;;  %v1512_v52 = vrot.slane %v1503_v51, 4  ;;  %v1515_v9 = vmul.f32 0.5, %v1509_v47 }
0x1c5b   :  { %v1505_v54 = vpop.f32.mrf.mxu0 }
0x1c5c   :  { %v1514_v62 = vadd.f32 %v1512_v52, %v1510_v53  ;;  %v1625_v52 = vld [vmem:[#allocation2 + $0x10] sm:$0xf0]  ;;  %v1630_v54 = vld [vmem:[#allocation2 + $0x68] sm:$0xf] }
0x1c5d   :  { %v1506_v63 = vpop.f32.mrf.mxu0 }
0x1c5e   :  { %4129 = vtanh.f32 %v1514_v62  ;;  %v1540_v12 = vmul.f32 0.5, %v1514_v62 }
0x1c5f   :  { %4131 = vtanh.f32 %v1515_v9 }
0x1c60   :  { %4133 = vtanh.f32 %v1540_v12 }
0x1c67   :  { %v4128_v1 = vpop.eup %4127 }
0x1c68   :  { %1525 = vrot.lane.b32.xlu1 %v4128_v1, %s4424_s1 }
0x1c6b   :  { %v4130_v3 = vpop.eup %4129 }
0x1c6c   :  { %1550 = vrot.lane.b32.xlu0 %v4130_v3, %s4424_s1  ;;  %v4132_v16 = vpop.eup %4131 }
0x1c6d   :  { %v1517_v7 = vmul.f32 0.5, %v4132_v16  ;;  %v4134_v19 = vpop.eup %4133 }
0x1c6e   :  { %v1542_v15 = vmul.f32 0.5, %v4134_v19 }
0x1c6f   :  { %v1518_v14 = vadd.f32 0.5, %v1517_v7 }
0x1c70   :  { %v1543_v8 = vadd.f32 0.5, %v1542_v15 }
0x1c71   :  { %v1523_v13 = vmul.f32 %v1521_v5, %v1518_v14 }
0x1c72   :  { %v1548_v36 = vmul.f32 %v1546_v4, %v1543_v8 }
0x1cda   :  { %v1526_v2 = vpop.permute.xlu1 %1525 }
0x1cdb   :  { %v1528_v23 = vmul.f32 %v1526_v2, %v1518_v14 }
0x1cdd   :  { %1530 = vrot.lane.b32.xlu1 %v1528_v23, %s4424_s1 }
0x1cde   :  { %v1551_v10 = vpop.permute.xlu0 %1550 }
0x1cdf   :  { %v1553_v11 = vmul.f32 %v1551_v10, %v1543_v8 }
0x1ce1   :  { %1555 = vrot.lane.b32.xlu0 %v1553_v11, %s4424_s1 }
0x1d4f   :  { %v1531_v26 = vpop.permute.xlu1 %1530 }
0x1d50   :  { %v4968_v30 = vadd.f32 %v1531_v26, %v1523_v13 }
0x1d52   :  { %4135 = vtanh.f32 %v4968_v30  ;;  %v1638_v13 = vrot.slane %v4968_v30, 4 }
0x1d53   :  { %v1556_v37 = vpop.permute.xlu0 %1555 }
0x1d54   :  { %v4971_v28 = vadd.f32 %v1556_v37, %v1548_v36 }
0x1d56   :  { %4137 = vtanh.f32 %v4971_v28  ;;  %v1663_v26 = vrot.slane %v4971_v28, 4 }
0x1d5f   :  { %v4136_v33 = vpop.eup %4135 }
0x1d60   :  { %1536 = vrot.lane.b32.xlu1 %v4136_v33, %s4424_s1 }
0x1d63   :  { %v4138_v32 = vpop.eup %4137 }
0x1d64   :  { %1561 = vrot.lane.b32.xlu0 %v4138_v32, %s4424_s1 }
0x1dd2   :  { %v1537_v27 = vpop.permute.xlu1 %1536 }
0x1dd3   :  { %v1539_v34 = vmul.f32 %v1537_v27, %v1518_v14 }
0x1dd5   :  { %1566 = vrot.lane.b32.xlu0 %v1539_v34, %s4426_s27 }
0x1dd6   :  { %v1562_v31 = vpop.permute.xlu0 %1561 }
0x1dd7   :  { %v4977_v40 = vmul.f32 %v1562_v31, %v1543_v8 }
0x1dd9   :  { %v1570_v41 = vrot.slane %v4977_v40, 4 }
0x1ddb   :  { %1571 = vrot.lane.b32.xlu1 %v1570_v41, %s4425_s26 }
0x1e47   :  { %v4981_v43 = vpop.permute.xlu0 %1566 }
0x1e4d   :  { %v1572_v44 = vpop.permute.xlu1 %1571 }
0x1e4e   :  { %v1574_v45 = vsel %vm389_vm2, %v4981_v43, %v1572_v44 }
0x1e4f   :  { %v1580_v46 = vpack.c.bf16 %v1574_v45, %v1574_v45 }
0x1e51   :  { %3725 = vmatmul.mubr.msk.bf16.vlgmr.msra.gmra.mxu1 %vm284_vm4, %v1580_v46 }
0x1e52   :  { %1829 = vmatpush1.bf16.msra.mxu1 %v4788_v55  ;;  %1852 = vmatprep.mubr.bf16.mxu1 %v4423_v0 }
0x1e53   :  { %1830 = vmatprep.subr.bf16.mxu1 %v4795_v56 }
0x1e56   :  { %1831 = vmatpush1.bf16.msra.mxu1 %v4801_v57 }
0x1e57   :  { %1832 = vmatprep.subr.bf16.mxu1 %v4807_v58 }
0x1e5a   :  { %1833 = vmatpush1.bf16.msra.mxu1 %v4813_v59 }
0x1e5b   :  { %1834 = vmatprep.subr.bf16.mxu1 %v4855_v49 }
0x1e5e   :  { %1835 = vmatpush1.bf16.msra.mxu1 %v4861_v50 }
0x1e5f   :  { %2064 = vmatprep.subr.bf16.mxu1 %v4821_v61 }
0x1f11   :  { %v1618_v47 = vpop.f32.mrf.mxu1 }
0x1f12   :  { %v1627_v51 = vrot.slane %v1618_v47, 4 }
0x1f13   :  { %v1620_v53 = vpop.f32.mrf.mxu1 }
0x1f14   :  { %v1629_v62 = vadd.f32 %v1627_v51, %v1625_v52  ;;  %v1631_v63 = vadd.f32 %v1630_v54, %v1620_v53 }
0x1f15   :  { %v1622_v1 = vpop.f32.mrf.mxu1 }
0x1f16   :  { %4139 = vtanh.f32 %v1629_v62  ;;  %v1632_v16 = vmul.f32 0.5, %v1629_v62  ;;  %v1657_v7 = vmul.f32 0.5, %v1631_v63  ;;  %v1744_v62 = vld [vmem:[#allocation2 + $0x60] sm:$0xf] }
0x1f17   :  { %4141 = vtanh.f32 %v1631_v63  ;;  %v1623_v3 = vpop.f32.mrf.mxu1 }
0x1f18   :  { %4143 = vtanh.f32 %v1632_v16 }
0x1f19   :  { %4145 = vtanh.f32 %v1657_v7 }
0x1f23   :  { %v4140_v9 = vpop.eup %4139 }
0x1f24   :  { %v4142_v12 = vpop.eup %4141  ;;  %1642 = vrot.lane.b32.xlu1 %v4140_v9, %s4424_s1  ;;  %v1746_v9 = vld [vmem:[#allocation2 + $0x18] sm:$0xf0] }
0x1f25   :  { %1667 = vrot.lane.b32.xlu0 %v4142_v12, %s4424_s1  ;;  %v4144_v61 = vpop.eup %4143 }
0x1f26   :  { %v4146_v19 = vpop.eup %4145  ;;  %v1634_v14 = vmul.f32 0.5, %v4144_v61 }
0x1f27   :  { %v1659_v15 = vmul.f32 0.5, %v4146_v19 }
0x1f28   :  { %v1635_v2 = vadd.f32 0.5, %v1634_v14 }
0x1f29   :  { %v1660_v8 = vadd.f32 0.5, %v1659_v15 }
0x1f2a   :  { %v1640_v4 = vmul.f32 %v1638_v13, %v1635_v2 }
0x1f2b   :  { %v1665_v37 = vmul.f32 %v1663_v26, %v1660_v8 }
0x1f96   :  { %v1643_v23 = vpop.permute.xlu1 %1642 }
0x1f97   :  { %v1645_v10 = vmul.f32 %v1643_v23, %v1635_v2  ;;  %v1668_v11 = vpop.permute.xlu0 %1667 }
0x1f98   :  { %v1670_v5 = vmul.f32 %v1668_v11, %v1660_v8 }
0x1f99   :  { %1647 = vrot.lane.b32.xlu1 %v1645_v10, %s4424_s1 }
0x1f9a   :  { %1672 = vrot.lane.b32.xlu0 %v1670_v5, %s4424_s1 }
0x200b   :  { %v1648_v36 = vpop.permute.xlu1 %1647 }
0x200c   :  { %v5001_v33 = vadd.f32 %v1648_v36, %v1640_v4  ;;  %v1673_v32 = vpop.permute.xlu0 %1672 }
0x200d   :  { %v5003_v27 = vadd.f32 %v1673_v32, %v1665_v37 }
0x200e   :  { %4147 = vtanh.f32 %v5001_v33  ;;  %v1757_v37 = vrot.slane %v5001_v33, 4 }
0x200f   :  { %4149 = vtanh.f32 %v5003_v27 }
0x201b   :  { %v4148_v34 = vpop.eup %4147 }
0x201c   :  { %v4150_v31 = vpop.eup %4149  ;;  %1653 = vrot.lane.b32.xlu1 %v4148_v34, %s4424_s1 }
0x201d   :  { %1678 = vrot.lane.b32.xlu0 %v4150_v31, %s4424_s1  ;;  %v1782_v31 = vrot.slane %v5003_v27, 4 }
0x208e   :  { %v1654_v30 = vpop.permute.xlu1 %1653 }
0x208f   :  { %v1656_v28 = vmul.f32 %v1654_v30, %v1635_v2  ;;  %v1679_v41 = vpop.permute.xlu0 %1678 }
0x2090   :  { %v5009_v44 = vmul.f32 %v1679_v41, %v1660_v8 }
0x2091   :  { %1683 = vrot.lane.b32.xlu0 %v1656_v28, %s4426_s27 }
0x2092   :  { %v1687_v45 = vrot.slane %v5009_v44, 4 }
0x2094   :  { %1688 = vrot.lane.b32.xlu1 %v1687_v45, %s4425_s26 }
0x2103   :  { %v5014_v46 = vpop.permute.xlu0 %1683 }
0x2106   :  { %v1689_v47 = vpop.permute.xlu1 %1688 }
0x2107   :  { %v1691_v51 = vsel %vm389_vm2, %v5014_v46, %v1689_v47 }
0x2108   :  { %v1697_v52 = vpack.c.bf16 %v1691_v51, %v1691_v51 }
0x210a   :  { %v1699_v53 = vrot.slane %v1697_v52, 2 }
0x210c   :  { %3726 = vmatmul.mubr.msk.bf16.vlgmr.msra.gmra.mxu0 %vm284_vm4, %v1699_v53 }
0x210d   :  { %1948 = vmatpush1.bf16.msra.mxu0 %v4788_v55  ;;  %1971 = vmatprep.mubr.bf16.mxu0 %v4423_v0 }
0x210e   :  { %1949 = vmatprep.subr.bf16.mxu0 %v4795_v56 }
0x2111   :  { %1950 = vmatpush1.bf16.msra.mxu0 %v4801_v57 }
0x2112   :  { %1951 = vmatprep.subr.bf16.mxu0 %v4807_v58 }
0x2115   :  { %1952 = vmatpush1.bf16.msra.mxu0 %v4813_v59 }
0x2116   :  { %1953 = vmatprep.subr.bf16.mxu0 %v4855_v49 }
0x2119   :  { %1954 = vmatpush1.bf16.msra.mxu0 %v4861_v50 }
0x21cc   :  { %v1737_v54 = vpop.f32.mrf.mxu0 }
0x21cd   :  { %v1745_v63 = vadd.f32 %v1744_v62, %v1737_v54 }
0x21ce   :  { %v1739_v1 = vpop.f32.mrf.mxu0 }
0x21cf   :  { %4151 = vtanh.f32 %v1745_v63  ;;  %v1748_v3 = vrot.slane %v1739_v1, 4  ;;  %v1751_v14 = vmul.f32 0.5, %v1745_v63 }
0x21d0   :  { %v1741_v12 = vpop.f32.mrf.mxu0 }
0x21d1   :  { %v1750_v16 = vadd.f32 %v1748_v3, %v1746_v9 }
0x21d2   :  { %v1742_v7 = vpop.f32.mrf.mxu0 }
0x21d3   :  { %4153 = vtanh.f32 %v1750_v16  ;;  %v1776_v15 = vmul.f32 0.5, %v1750_v16  ;;  %v1861_v16 = vld [vmem:[#allocation2 + $0x60] sm:$0xf0] }
0x21d4   :  { %4155 = vtanh.f32 %v1751_v14 }
0x21d5   :  { %4157 = vtanh.f32 %v1776_v15 }
0x21dc   :  { %v4152_v61 = vpop.eup %4151 }
0x21dd   :  { %1761 = vrot.lane.b32.xlu1 %v4152_v61, %s4424_s1  ;;  %v1866_v61 = vld [vmem:[#allocation2 + $0x18] sm:$0xf] }
0x21e0   :  { %v4154_v19 = vpop.eup %4153 }
0x21e1   :  { %1786 = vrot.lane.b32.xlu0 %v4154_v19, %s4424_s1  ;;  %v4156_v2 = vpop.eup %4155 }
0x21e2   :  { %v1753_v23 = vmul.f32 0.5, %v4156_v2  ;;  %v4158_v8 = vpop.eup %4157 }
0x21e3   :  { %v1778_v11 = vmul.f32 0.5, %v4158_v8 }
0x21e4   :  { %v1754_v10 = vadd.f32 0.5, %v1753_v23 }
0x21e5   :  { %v1779_v26 = vadd.f32 0.5, %v1778_v11 }
0x21e6   :  { %v1759_v32 = vmul.f32 %v1757_v37, %v1754_v10 }
0x21e7   :  { %v1784_v28 = vmul.f32 %v1782_v31, %v1779_v26 }
0x224f   :  { %v1762_v5 = vpop.permute.xlu1 %1761 }
0x2250   :  { %v1764_v13 = vmul.f32 %v1762_v5, %v1754_v10 }
0x2252   :  { %1766 = vrot.lane.b32.xlu1 %v1764_v13, %s4424_s1 }
0x2253   :  { %v1787_v4 = vpop.permute.xlu0 %1786 }
0x2254   :  { %v1789_v36 = vmul.f32 %v1787_v4, %v1779_v26 }
0x2256   :  { %1791 = vrot.lane.b32.xlu0 %v1789_v36, %s4424_s1 }
0x22c4   :  { %v1767_v34 = vpop.permute.xlu1 %1766 }
0x22c5   :  { %v5033_v30 = vadd.f32 %v1767_v34, %v1759_v32 }
0x22c7   :  { %4159 = vtanh.f32 %v5033_v30  ;;  %v1874_v4 = vrot.slane %v5033_v30, 4 }
0x22c8   :  { %v1792_v41 = vpop.permute.xlu0 %1791 }
0x22c9   :  { %v1794_v45 = vadd.f32 %v1792_v41, %v1784_v28 }
0x22cb   :  { %4161 = vtanh.f32 %v1794_v45  ;;  %v1899_v36 = vrot.slane %v1794_v45, 4 }
0x22d4   :  { %v4160_v47 = vpop.eup %4159 }
0x22d5   :  { %1772 = vrot.lane.b32.xlu1 %v4160_v47, %s4424_s1 }
0x22d8   :  { %v4162_v51 = vpop.eup %4161 }
0x22d9   :  { %1797 = vrot.lane.b32.xlu0 %v4162_v51, %s4424_s1 }
0x2347   :  { %v1773_v52 = vpop.permute.xlu1 %1772 }
0x2348   :  { %v1775_v33 = vmul.f32 %v1773_v52, %v1754_v10 }
0x234a   :  { %1802 = vrot.lane.b32.xlu0 %v1775_v33, %s4426_s27 }
0x234b   :  { %v1798_v53 = vpop.permute.xlu0 %1797 }
0x234c   :  { %v5039_v27 = vmul.f32 %v1798_v53, %v1779_v26 }
0x234e   :  { %v1806_v54 = vrot.slane %v5039_v27, 4 }
0x2350   :  { %1807 = vrot.lane.b32.xlu1 %v1806_v54, %s4425_s26 }
0x23bc   :  { %v5043_v62 = vpop.permute.xlu0 %1802 }
0x23c2   :  { %v1808_v63 = vpop.permute.xlu1 %1807 }
0x23c3   :  { %v1810_v1 = vsel %vm389_vm2, %v5043_v62, %v1808_v63 }
0x23c4   :  { %v1816_v3 = vpack.c.bf16 %v1810_v1, %v1810_v1 }
0x23c6   :  { %3727 = vmatmul.mubr.msk.bf16.vlgmr.msra.gmra.mxu1 %vm284_vm4, %v1816_v3 }
0x23c7   :  { %2065 = vmatpush1.bf16.msra.mxu1 %v4788_v55  ;;  %2088 = vmatprep.mubr.bf16.mxu1 %v4423_v0 }
0x23c8   :  { %2066 = vmatprep.subr.bf16.mxu1 %v4795_v56 }
0x23cb   :  { %2067 = vmatpush1.bf16.msra.mxu1 %v4801_v57 }
0x23cc   :  { %2068 = vmatprep.subr.bf16.mxu1 %v4807_v58 }
0x23cf   :  { %2069 = vmatpush1.bf16.msra.mxu1 %v4813_v59 }
0x23d0   :  { %2070 = vmatprep.subr.bf16.mxu1 %v4855_v49 }
0x23d3   :  { %2071 = vmatpush1.bf16.msra.mxu1 %v4861_v50 }
0x2486   :  { %v1854_v9 = vpop.f32.mrf.mxu1 }
0x2487   :  { %v1863_v12 = vrot.slane %v1854_v9, 4 }
0x2488   :  { %v1856_v7 = vpop.f32.mrf.mxu1 }
0x2489   :  { %v1865_v55 = vadd.f32 %v1863_v12, %v1861_v16  ;;  %v1867_v19 = vadd.f32 %v1866_v61, %v1856_v7  ;;  %v1980_v16 = vld [vmem:[#allocation2 + $0x78] sm:$0xf] }
0x248a   :  { %v1858_v14 = vpop.f32.mrf.mxu1 }
0x248b   :  { %4163 = vtanh.f32 %v1865_v55  ;;  %v1868_v58 = vmul.f32 0.5, %v1865_v55  ;;  %v1893_v59 = vmul.f32 0.5, %v1867_v19 }
0x248c   :  { %4165 = vtanh.f32 %v1867_v19  ;;  %v1859_v56 = vpop.f32.mrf.mxu1  ;;  %v1982_v19 = vld [vmem:[#allocation2] sm:$0xf0] }
0x248d   :  { %4167 = vtanh.f32 %v1868_v58 }
0x248e   :  { %4169 = vtanh.f32 %v1893_v59 }
0x2498   :  { %v4164_v57 = vpop.eup %4163 }
0x2499   :  { %v4166_v15 = vpop.eup %4165  ;;  %1878 = vrot.lane.b32.xlu1 %v4164_v57, %s4424_s1 }
0x249a   :  { %1903 = vrot.lane.b32.xlu0 %v4166_v15, %s4424_s1  ;;  %v4168_v49 = vpop.eup %4167 }
0x249b   :  { %v4170_v50 = vpop.eup %4169  ;;  %v1870_v2 = vmul.f32 0.5, %v4168_v49 }
0x249c   :  { %v1895_v23 = vmul.f32 0.5, %v4170_v50 }
0x249d   :  { %v1871_v8 = vadd.f32 0.5, %v1870_v2 }
0x249e   :  { %v1896_v11 = vadd.f32 0.5, %v1895_v23 }
0x249f   :  { %v1876_v37 = vmul.f32 %v1874_v4, %v1871_v8 }
0x24a0   :  { %v1901_v34 = vmul.f32 %v1899_v36, %v1896_v11 }
0x250b   :  { %v1879_v10 = vpop.permute.xlu1 %1878 }
0x250c   :  { %v1881_v5 = vmul.f32 %v1879_v10, %v1871_v8  ;;  %v1904_v13 = vpop.permute.xlu0 %1903 }
0x250d   :  { %v1906_v26 = vmul.f32 %v1904_v13, %v1896_v11 }
0x250e   :  { %1883 = vrot.lane.b32.xlu1 %v1881_v5, %s4424_s1 }
0x250f   :  { %1908 = vrot.lane.b32.xlu0 %v1906_v26, %s4424_s1 }
0x2580   :  { %v1884_v32 = vpop.permute.xlu1 %1883 }
0x2581   :  { %v1886_v31 = vadd.f32 %v1884_v32, %v1876_v37  ;;  %v1909_v28 = vpop.permute.xlu0 %1908 }
0x2582   :  { %v1911_v41 = vadd.f32 %v1909_v28, %v1901_v34 }
0x2583   :  { %4171 = vtanh.f32 %v1886_v31  ;;  %v1993_v36 = vrot.slane %v1886_v31, 4 }
0x2584   :  { %4173 = vtanh.f32 %v1911_v41  ;;  %v2018_v34 = vrot.slane %v1911_v41, 4 }
0x2590   :  { %v4172_v47 = vpop.eup %4171 }
0x2591   :  { %v4174_v51 = vpop.eup %4173  ;;  %1889 = vrot.lane.b32.xlu1 %v4172_v47, %s4424_s1 }
0x2592   :  { %1914 = vrot.lane.b32.xlu0 %v4174_v51, %s4424_s1 }
0x2603   :  { %v1890_v52 = vpop.permute.xlu1 %1889 }
0x2604   :  { %v1892_v33 = vmul.f32 %v1890_v52, %v1871_v8  ;;  %v1915_v53 = vpop.permute.xlu0 %1914 }
0x2605   :  { %v5063_v54 = vmul.f32 %v1915_v53, %v1896_v11 }
0x2606   :  { %1919 = vrot.lane.b32.xlu0 %v1892_v33, %s4426_s27 }
0x2607   :  { %v1923_v30 = vrot.slane %v5063_v54, 4 }
0x2609   :  { %1924 = vrot.lane.b32.xlu1 %v1923_v30, %s4425_s26 }
0x2678   :  { %v5068_v45 = vpop.permute.xlu0 %1919 }
0x267b   :  { %v1925_v63 = vpop.permute.xlu1 %1924 }
0x267c   :  { %v1927_v1 = vsel %vm389_vm2, %v5068_v45, %v1925_v63 }
0x267d   :  { %v1933_v3 = vpack.c.bf16 %v1927_v1, %v1927_v1 }
0x267f   :  { %v1935_v9 = vrot.slane %v1933_v3, 2 }
0x2681   :  { %3728 = vmatmul.mubr.msk.bf16.vlgmr.msra.gmra.mxu0 %vm284_vm4, %v1935_v9 }
0x2682   :  { %2280 = vmatprep.mubr.bf16.mxu0 %v4423_v0 }
0x2741   :  { %v1973_v12 = vpop.f32.mrf.mxu0 }
0x2742   :  { %v1981_v7 = vadd.f32 %v1980_v16, %v1973_v12 }
0x2743   :  { %v1975_v61 = vpop.f32.mrf.mxu0 }
0x2744   :  { %4175 = vtanh.f32 %v1981_v7  ;;  %v1984_v55 = vrot.slane %v1975_v61, 4  ;;  %v1987_v59 = vmul.f32 0.5, %v1981_v7 }
0x2745   :  { %v1977_v14 = vpop.f32.mrf.mxu0 }
0x2746   :  { %v1986_v56 = vadd.f32 %v1984_v55, %v1982_v19  ;;  %v2102_v55 = vld [vmem:[#allocation2] sm:$0xf] }
0x2747   :  { %v1978_v57 = vpop.f32.mrf.mxu0 }
0x2748   :  { %4177 = vtanh.f32 %v1986_v56  ;;  %v2012_v49 = vmul.f32 0.5, %v1986_v56 }
0x2749   :  { %4179 = vtanh.f32 %v1987_v59 }
0x274a   :  { %4181 = vtanh.f32 %v2012_v49 }
0x2751   :  { %v4176_v15 = vpop.eup %4175 }
0x2752   :  { %1997 = vrot.lane.b32.xlu1 %v4176_v15, %s4424_s1 }
0x2755   :  { %v4178_v58 = vpop.eup %4177 }
0x2756   :  { %2022 = vrot.lane.b32.xlu0 %v4178_v58, %s4424_s1  ;;  %v4180_v50 = vpop.eup %4179 }
0x2757   :  { %v1989_v2 = vmul.f32 0.5, %v4180_v50  ;;  %v4182_v23 = vpop.eup %4181 }
0x2758   :  { %v2014_v10 = vmul.f32 0.5, %v4182_v23 }
0x2759   :  { %v1990_v8 = vadd.f32 0.5, %v1989_v2 }
0x275a   :  { %v2015_v13 = vadd.f32 0.5, %v2014_v10 }
0x275b   :  { %v1995_v37 = vmul.f32 %v1993_v36, %v1990_v8  ;;  %v3992_v36 = vld [vmem:[%s5452_s4 + $0x20] ss:$8 sps:$4 sm:$0xff]  }
0x275c   :  { %v2020_v47 = vmul.f32 %v2018_v34, %v2015_v13  ;;  %v3997_v34 = vld [vmem:[%s5452_s4 + $0x14] ss:$8 sps:$4 sm:$0xff]  }
0x27c4   :  { %v1998_v11 = vpop.permute.xlu1 %1997 }
0x27c5   :  { %v2000_v5 = vmul.f32 %v1998_v11, %v1990_v8 }
0x27c7   :  { %2002 = vrot.lane.b32.xlu1 %v2000_v5, %s4424_s1 }
0x27c8   :  { %v2023_v26 = vpop.permute.xlu0 %2022 }
0x27c9   :  { %v2025_v4 = vmul.f32 %v2023_v26, %v2015_v13  ;;  %v3989_v26 = vld [vmem:[%s5452_s4 + $0x30] ss:$8 sps:$4 sm:$0xff]  }
0x27cb   :  { %2027 = vrot.lane.b32.xlu0 %v2025_v4, %s4424_s1  ;;  %v3994_v4 = vld [vmem:[%s5452_s4 + $0x24] ss:$8 sps:$4 sm:$0xff]  }
0x2839   :  { %v2003_v32 = vpop.permute.xlu1 %2002 }
0x283a   :  { %v5078_v28 = vadd.f32 %v2003_v32, %v1995_v37  ;;  %v3995_v32 = vld [vmem:[%s5452_s4 + $0x10] ss:$8 sps:$4 sm:$0xff]  }
0x283c   :  { %4183 = vtanh.f32 %v5078_v28 }
0x283d   :  { %v2028_v51 = vpop.permute.xlu0 %2027 }
0x283e   :  { %v2030_v52 = vadd.f32 %v2028_v51, %v2020_v47  ;;  %v4000_v47 = vld [vmem:[%s5452_s4 + $0x4] ss:$8 sps:$4 sm:$0xff]  }
0x283f   :  { %v5126_v51 = vld [vmem:[%s5454_s6 + $0x8] sm:$0xff]  }
0x2840   :  { %4185 = vtanh.f32 %v2030_v52  ;;  %v2135_v23 = vrot.slane %v2030_v52, 4  ;;  %v4427_v52 = vmov 0.0  }
0x2841   :  { %3818 = vmatprep.subr.bf16.mxu1 %v4427_v52 }
0x2849   :  { %v4184_v33 = vpop.eup %4183 }
0x284a   :  { %2008 = vrot.lane.b32.xlu1 %v4184_v33, %s4424_s1  ;;  %v5138_v33 = vld [vmem:[%s5454_s6] sm:$0xff]  }
0x284d   :  { %v4186_v53 = vpop.eup %4185 }
0x284e   :  { %2033 = vrot.lane.b32.xlu0 %v4186_v53, %s4424_s1 }
0x28bc   :  { %v2009_v30 = vpop.permute.xlu1 %2008 }
0x28bd   :  { %v2011_v63 = vmul.f32 %v2009_v30, %v1990_v8 }
0x28bf   :  { %2038 = vrot.lane.b32.xlu0 %v2011_v63, %s4426_s27 }
0x28c0   :  { %v2034_v31 = vpop.permute.xlu0 %2033 }
0x28c1   :  { %v2036_v41 = vmul.f32 %v2034_v31, %v2015_v13 }
0x28c3   :  { %v2042_v1 = vrot.slane %v2036_v41, 4 }
0x28c5   :  { %2043 = vrot.lane.b32.xlu1 %v2042_v1, %s4425_s26 }
0x2931   :  { %v5085_v3 = vpop.permute.xlu0 %2038 }
0x2937   :  { %v2044_v9 = vpop.permute.xlu1 %2043 }
0x2938   :  { %v2046_v12 = vsel %vm389_vm2, %v5085_v3, %v2044_v9 }
0x2939   :  { %v2052_v16 = vpack.c.bf16 %v2046_v12, %v2046_v12 }
0x293b   :  { %3729 = vmatmul.mubr.msk.bf16.vlgmr.msra.gmra.mxu1 %vm284_vm4, %v2052_v16 }
0x293c   :  { %3819 = vmatpush3.bf16.msra.mxu1 %v5126_v51  ;;  %3822 = vmatprep.mubr.msk.bf16.mxu1 %vm4428_vm7, %v4427_v52 }
0x293d   :  { %3820 = vmatprep.subr.bf16.mxu1 %v4427_v52 }
0x2940   :  { %3821 = vmatpush3.bf16.msra.mxu1 %v5138_v33 }
0x2941   :  { %3826 = vmatprep.subr.bf16.mxu1 %v4427_v52 }
0x2943   :  { %3823 = vmatmul.mubr.bf16.vlgmr.msra.gmra.mxu1 %v4423_v0 }
0x2944   :  { %3827 = vmatpush3.bf16.msra.mxu1 %v5126_v51  ;;  %3830 = vmatprep.mubr.msk.bf16.mxu1 %vm4428_vm7, %v4427_v52 }
0x2945   :  { %3828 = vmatprep.subr.bf16.mxu1 %v4427_v52 }
0x2948   :  { %3829 = vmatpush3.bf16.msra.mxu1 %v5138_v33 }
0x2949   :  { %3834 = vmatprep.subr.bf16.mxu1 %v4427_v52 }
0x29fb   :  { %v5090_v7 = vpop.f32.mrf.mxu1 }
0x29fd   :  { %v2092_v61 = vpop.f32.mrf.mxu1 }
0x29fe   :  { %v2103_v19 = vadd.f32 %v2102_v55, %v2092_v61 }
0x29ff   :  { %v2094_v14 = vpop.f32.mrf.mxu1 }
0x2a00   :  { %4187 = vtanh.f32 %v2103_v19  ;;  %v2129_v15 = vmul.f32 0.5, %v2103_v19  ;;  %v2184_v19 = vld [vmem:[#allocation9] sm:$0x3] }
0x2a01   :  { %v2095_v56 = vpop.f32.mrf.mxu1  ;;  %v5162_v14 = vrot.slane %v2184_v19, %v94_v18 }
0x2a02   :  { %4189 = vtanh.f32 %v2129_v15  ;;  %v5166_v56 = vrot.slane %v2184_v19, %v98_v20 }
0x2a03   :  { %v2390_v12 = vpop.f32.mrf.mxu1 }
0x2a05   :  { %v3824_v16 = vpop.f32.mrf.mxu1 }
0x2a07   :  { %v2393_v61 = vpop.f32.mrf.mxu1 }
0x2a09   :  { %v3825_v55 = vpop.f32.mrf.mxu1 }
0x2a0d   :  { %v4188_v57 = vpop.eup %4187 }
0x2a0e   :  { %2139 = vrot.lane.b32.xlu0 %v4188_v57, %s4424_s1 }
0x2a0f   :  { %v4190_v58 = vpop.eup %4189 }
0x2a10   :  { %v2131_v59 = vmul.f32 0.5, %v4190_v58 }
0x2a12   :  { %v2132_v49 = vadd.f32 0.5, %v2131_v59 }
0x2a14   :  { %v2137_v8 = vmul.f32 %v2135_v23, %v2132_v49 }
0x2a80   :  { %v2140_v50 = vpop.permute.xlu0 %2139 }
0x2a81   :  { %v2142_v2 = vmul.f32 %v2140_v50, %v2132_v49 }
0x2a83   :  { %2144 = vrot.lane.b32.xlu1 %v2142_v2, %s4424_s1 }
0x2a87   :  { %1812 = vrot.lane.b32.xlu1 %v5039_v27, %s4425_s26  ;;  %v3991_v27 = vld [vmem:[%s5452_s4 + $0x34] ss:$8 sps:$4 sm:$0xff]  }
0x2a88   :  { %2256 = vmatprep.subr.bf16.mxu0 %v3991_v27 }
0x2a89   :  { %2257 = vmatpush1.bf16.msra.mxu0 %v3989_v26 }
0x2a8a   :  { %2258 = vmatprep.subr.bf16.mxu0 %v3994_v4 }
0x2a8b   :  { %2048 = vrot.lane.b32.xlu1 %v2036_v41, %s4425_s26 }
0x2a8d   :  { %2259 = vmatpush1.bf16.msra.mxu0 %v3992_v36 }
0x2a8e   :  { %2260 = vmatprep.subr.bf16.mxu0 %v3997_v34 }
0x2a91   :  { %2261 = vmatpush1.bf16.msra.mxu0 %v3995_v32 }
0x2a92   :  { %2262 = vmatprep.subr.bf16.mxu0 %v4000_v47 }
0x2af5   :  { %v2145_v10 = vpop.permute.xlu1 %2144 }
0x2af6   :  { %v2147_v11 = vadd.f32 %v2145_v10, %v2137_v8 }
0x2af8   :  { %4191 = vtanh.f32 %v2147_v11 }
0x2af9   :  { %v1813_v5 = vpop.permute.xlu1 %1812 }
0x2afa   :  { %1815 = vst.msk [vmem:[#allocation3 + $0x8] sm:$0xf0] %vm396_vm6, %v1813_v5 }
0x2afd   :  { %v2049_v13 = vpop.permute.xlu1 %2048 }
0x2afe   :  { %2051 = vst.msk [vmem:[#allocation3] sm:$0xf0] %vm396_vm6, %v2049_v13 }
0x2b05   :  { %v4192_v37 = vpop.eup %4191 }
0x2b06   :  { %2150 = vrot.lane.b32.xlu0 %v4192_v37, %s4424_s1 }
0x2b0a   :  { %1929 = vrot.lane.b32.xlu0 %v5063_v54, %s4425_s26  ;;  %v3998_v54 = vld [vmem:[%s5452_s4] ss:$8 sps:$4 sm:$0xff]  }
0x2b0b   :  { %2263 = vmatpush1.bf16.msra.mxu0 %v3998_v54 }
0x2b0c   :  { %3850 = vmatprep.subr.bf16.mxu0 %v4427_v52 }
0x2b78   :  { %v2151_v53 = vpop.permute.xlu0 %2150 }
0x2b79   :  { %v2153_v30 = vmul.f32 %v2151_v53, %v2132_v49 }
0x2b7b   :  { %2160 = vrot.lane.b32.xlu0 %v2153_v30, %s4425_s26 }
0x2b7c   :  { %v1930_v63 = vpop.permute.xlu0 %1929 }
0x2b7d   :  { %1932 = vst.msk [vmem:[#allocation3 + $0x8] sm:$0xf] %vm515_vm8, %v1930_v63 }
0x2b84   :  { %v2165_v1 = vld [vmem:[#allocation3 + $0x8] sm:$0xff] }
0x2bed   :  { %v2161_v31 = vpop.permute.xlu0 %2160 }
0x2bee   :  { %2163 = vst.msk [vmem:[#allocation3] sm:$0xf] %vm515_vm8, %v2161_v31 }
0x2bf5   :  { %v2164_v41 = vld [vmem:[#allocation3] sm:$0xff] }
0x2bf6   :  { %v2172_v9 = vpack.c.bf16 %v2165_v1, %v2164_v41 }
0x2bf8   :  { %3738 = vmatmul.mubr.msk.bf16.vlgmr.msra.gmra.mxu0 %vm284_vm4, %v2172_v9 }
0x2bf9   :  { %2290 = vmatprep.mubr.bf16.mxu0 %v4423_v0  ;;  %3851 = vmatpush3.bf16.msra.mxu0 %v5126_v51 }
0x2bfa   :  { %3852 = vmatprep.subr.bf16.mxu0 %v4427_v52 }
0x2bfd   :  { %3853 = vmatpush3.bf16.msra.mxu0 %v5138_v33 }
0x2bfe   :  { %3866 = vmatprep.subr.bf16.mxu0 %v4427_v52 }
0x2cb8   :  { %v2282_v57 = vpop.f32.mrf.mxu0 }
0x2cb9   :  { %v2283_v15 = vadd.f32 %v2282_v57, %v5162_v14 }
0x2cba   :  { %v2284_v58 = vpop.f32.mrf.mxu0 }
0x2cbb   :  { %2321 = vst [vmem:[#allocation2 + $0x30] sm:$0xff] %v2283_v15  ;;  %v2285_v59 = vadd.f32 %v2284_v58, %v5166_v56 }
0x2cbc   :  { %v2286_v49 = vpop.f32.mrf.mxu0 }
0x2cbd   :  { %2322 = vst [vmem:[#allocation2] sm:$0xff] %v2285_v59  ;;  %v2287_v50 = vadd.f32 %v2286_v49, %v5162_v14 }
0x2cbe   :  { %v2288_v2 = vpop.f32.mrf.mxu0 }
0x2cbf   :  { %2323 = vst [vmem:[#allocation2 + $0x58] sm:$0xff] %v2287_v50  ;;  %v2289_v18 = vadd.f32 %v2288_v2, %v5166_v56 }
0x2cc1   :  { %2324 = vst [vmem:[#allocation2 + $0x18] sm:$0xff] %v2289_v18 }
0x2cc2   :  { %v2341_v23 = vld [vmem:[#allocation2 + $0x30] sm:$0xf]  ;;  %v2419_v63 = vld [vmem:[#allocation2 + $0x30] sm:$0xf0] }
0x2cc3   :  { %v2396_v17 = vadd.f32 %v2390_v12, %v2341_v23 }
0x2cc5   :  { %4193 = vtanh.f32 %v2396_v17  ;;  %v2397_v8 = vmul.f32 0.5, %v2396_v17 }
0x2cc7   :  { %4195 = vtanh.f32 %v2397_v8 }
0x2cd2   :  { %v4194_v20 = vpop.eup %4193 }
0x2cd3   :  { %2404 = vrot.lane.b32.xlu1 %v4194_v20, %s4424_s1 }
0x2cd4   :  { %v4196_v10 = vpop.eup %4195 }
0x2cd5   :  { %v2399_v11 = vmul.f32 0.5, %v4196_v10  ;;  %v2496_v10 = vld [vmem:[#allocation2 + $0x58] sm:$0xf] }
0x2cd7   :  { %v2400_v5 = vadd.f32 0.5, %v2399_v11 }
0x2cd9   :  { %v2402_v27 = vmul.f32 0.0, %v2400_v5 }
0x2d45   :  { %v2405_v13 = vpop.permute.xlu1 %2404 }
0x2d46   :  { %v2407_v26 = vmul.f32 %v2405_v13, %v2400_v5 }
0x2d48   :  { %2409 = vrot.lane.b32.xlu0 %v2407_v26, %s4424_s1 }
0x2dba   :  { %v2410_v4 = vpop.permute.xlu0 %2409 }
0x2dbb   :  { %v2412_v36 = vadd.f32 %v2410_v4, %v2402_v27 }
0x2dbd   :  { %4197 = vtanh.f32 %v2412_v36  ;;  %v2477_v58 = vrot.slane %v2412_v36, 4 }
0x2dca   :  { %v4198_v37 = vpop.eup %4197 }
0x2dcb   :  { %2415 = vrot.lane.b32.xlu1 %v4198_v37, %s4424_s1 }
0x2e3d   :  { %v2416_v32 = vpop.permute.xlu1 %2415 }
0x2e3e   :  { %v2418_v34 = vmul.f32 %v2416_v32, %v2400_v5 }
0x2e40   :  { %v2420_v47 = vpack.c.bf16 %v2418_v34, %v2418_v34 }
0x2e42   :  { %2422 = vrot.lane.b32.xlu0 %v2420_v47, %s4426_s27 }
0x2eb4   :  { %v2423_v54 = vpop.permute.xlu0 %2422 }
0x2eb5   :  { %3831 = vmatmul.mubr.msk.bf16.vlgmr.msra.gmra.mxu1 %vm389_vm2, %v2423_v54 }
0x2eb6   :  { %3835 = vmatpush3.bf16.msra.mxu1 %v5126_v51  ;;  %3838 = vmatprep.mubr.msk.bf16.mxu1 %vm4428_vm7, %v4427_v52 }
0x2eb7   :  { %3836 = vmatprep.subr.bf16.mxu1 %v4427_v52 }
0x2eba   :  { %3837 = vmatpush3.bf16.msra.mxu1 %v5138_v33 }
0x2ebb   :  { %3842 = vmatprep.subr.bf16.mxu1 %v4427_v52 }
0x2f75   :  { %v2461_v53 = vpop.f32.mrf.mxu1 }
0x2f76   :  { %v2468_v30 = vrot.slane %v2461_v53, 4 }
0x2f77   :  { %v3832_v31 = vpop.f32.mrf.mxu1 }
0x2f78   :  { %v2470_v41 = vadd.f32 %v2468_v30, %v2419_v63  ;;  %v2099_v30 = vrot.slane %v5090_v7, 4 }
0x2f79   :  { %v2464_v1 = vpop.f32.mrf.mxu1 }
0x2f7a   :  { %4199 = vtanh.f32 %v2470_v41  ;;  %v2471_v16 = vmul.f32 0.5, %v2470_v41  ;;  %v2097_v1 = vld [vmem:[#allocation2 + $0x78] sm:$0xf0] }
0x2f7b   :  { %v3833_v9 = vpop.f32.mrf.mxu1 }
0x2f7c   :  { %4201 = vtanh.f32 %v2471_v16  ;;  %v2101_v9 = vadd.f32 %v2099_v30, %v2097_v1 }
0x2f87   :  { %v4200_v12 = vpop.eup %4199 }
0x2f88   :  { %2481 = vrot.lane.b32.xlu1 %v4200_v12, %s4424_s1 }
0x2f89   :  { %v4202_v61 = vpop.eup %4201 }
0x2f8a   :  { %v2473_v55 = vmul.f32 0.5, %v4202_v61  ;;  %v2104_v61 = vmul.f32 0.5, %v2101_v9 }
0x2f8c   :  { %v2474_v19 = vadd.f32 0.5, %v2473_v55 }
0x2f8e   :  { %v2479_v59 = vmul.f32 %v2477_v58, %v2474_v19 }
0x2ffa   :  { %v2482_v57 = vpop.permute.xlu1 %2481 }
0x2ffb   :  { %v2484_v15 = vmul.f32 %v2482_v57, %v2474_v19 }
0x2ffd   :  { %2486 = vrot.lane.b32.xlu0 %v2484_v15, %s4424_s1 }
0x306f   :  { %v2487_v49 = vpop.permute.xlu0 %2486 }
0x3070   :  { %v2489_v50 = vadd.f32 %v2487_v49, %v2479_v59 }
0x3072   :  { %4203 = vtanh.f32 %v2489_v50  ;;  %v2552_v53 = vrot.slane %v2489_v50, 4  ;;  %v2110_v50 = vrot.slane %v5078_v28, 4 }
0x307f   :  { %v4204_v2 = vpop.eup %4203 }
0x3080   :  { %2492 = vrot.lane.b32.xlu1 %v4204_v2, %s4424_s1 }
0x30f2   :  { %v2493_v18 = vpop.permute.xlu1 %2492 }
0x30f3   :  { %v2495_v23 = vmul.f32 %v2493_v18, %v2474_v19 }
0x30f5   :  { %v2497_v17 = vpack.c.bf16 %v2495_v23, %v2495_v23 }
0x30f7   :  { %v2499_v20 = vrot.slane %v2497_v17, 2 }
0x30f9   :  { %2500 = vrot.lane.b32.xlu0 %v2499_v20, %s4426_s27 }
0x316b   :  { %v2501_v8 = vpop.permute.xlu0 %2500 }
0x316c   :  { %3839 = vmatmul.mubr.msk.bf16.vlgmr.msra.gmra.mxu1 %vm389_vm2, %v2501_v8 }
0x316d   :  { %3843 = vmatpush3.bf16.msra.mxu1 %v5126_v51  ;;  %3846 = vmatprep.mubr.msk.bf16.mxu1 %vm4428_vm7, %v4427_v52 }
0x316e   :  { %3844 = vmatprep.subr.bf16.mxu1 %v4427_v52 }
0x3171   :  { %3845 = vmatpush3.bf16.msra.mxu1 %v5138_v33 }
0x3172   :  { %3858 = vmatprep.subr.bf16.mxu1 %v4427_v52 }
0x322c   :  { %v2539_v11 = vpop.f32.mrf.mxu1 }
0x322d   :  { %v2545_v5 = vadd.f32 %v2539_v11, %v2496_v10 }
0x322e   :  { %v3840_v13 = vpop.f32.mrf.mxu1 }
0x322f   :  { %4205 = vtanh.f32 %v2545_v5  ;;  %v2546_v36 = vmul.f32 0.5, %v2545_v5  ;;  %v2571_v5 = vld [vmem:[#allocation2 + $0x58] sm:$0xf0] }
0x3230   :  { %v2542_v26 = vpop.f32.mrf.mxu1 }
0x3231   :  { %4207 = vtanh.f32 %v2546_v36 }
0x3232   :  { %v3841_v27 = vpop.f32.mrf.mxu1 }
0x323c   :  { %v4206_v4 = vpop.eup %4205 }
0x323d   :  { %2556 = vrot.lane.b32.xlu1 %v4206_v4, %s4424_s1 }
0x323e   :  { %v4208_v37 = vpop.eup %4207 }
0x323f   :  { %v2548_v32 = vmul.f32 0.5, %v4208_v37 }
0x3241   :  { %v2549_v34 = vadd.f32 0.5, %v2548_v32 }
0x3243   :  { %v2554_v63 = vmul.f32 %v2552_v53, %v2549_v34 }
0x32af   :  { %v2557_v47 = vpop.permute.xlu1 %2556 }
0x32b0   :  { %v2559_v54 = vmul.f32 %v2557_v47, %v2549_v34 }
0x32b2   :  { %2561 = vrot.lane.b32.xlu0 %v2559_v54, %s4424_s1 }
0x3324   :  { %v2562_v31 = vpop.permute.xlu0 %2561 }
0x3325   :  { %v5197_v41 = vadd.f32 %v2562_v31, %v2554_v63 }
0x3327   :  { %4209 = vtanh.f32 %v5197_v41  ;;  %v2629_v54 = vrot.slane %v5197_v41, 4 }
0x3328   :  { %4211 = vtanh.f32 %v2101_v9 }
0x3329   :  { %4213 = vtanh.f32 %v2104_v61 }
0x3334   :  { %v4210_v12 = vpop.eup %4209 }
0x3335   :  { %2567 = vrot.lane.b32.xlu1 %v4210_v12, %s4424_s1  ;;  %v4212_v16 = vpop.eup %4211 }
0x3336   :  { %v4214_v55 = vpop.eup %4213 }
0x3337   :  { %v2106_v19 = vmul.f32 0.5, %v4214_v55 }
0x3339   :  { %2114 = vrot.lane.b32.xlu1 %v4212_v16, %s4424_s1  ;;  %v2107_v58 = vadd.f32 0.5, %v2106_v19 }
0x333b   :  { %v2112_v18 = vmul.f32 %v2110_v50, %v2107_v58 }
0x33a7   :  { %v2568_v7 = vpop.permute.xlu1 %2567 }
0x33a8   :  { %v2570_v57 = vmul.f32 %v2568_v7, %v2549_v34 }
0x33aa   :  { %v2572_v15 = vpack.c.bf16 %v2570_v57, %v2570_v57 }
0x33ab   :  { %v2115_v59 = vpop.permute.xlu1 %2114 }
0x33ac   :  { %v2117_v49 = vmul.f32 %v2115_v59, %v2107_v58  ;;  %2574 = vrot.lane.b32.xlu0 %v2572_v15, %s4426_s27 }
0x33ae   :  { %2119 = vrot.lane.b32.xlu1 %v2117_v49, %s4424_s1 }
0x341e   :  { %v2575_v2 = vpop.permute.xlu0 %2574 }
0x341f   :  { %3847 = vmatmul.mubr.msk.bf16.vlgmr.msra.gmra.mxu1 %vm389_vm2, %v2575_v2 }
0x3420   :  { %v2120_v23 = vpop.permute.xlu1 %2119  ;;  %3859 = vmatpush3.bf16.msra.mxu1 %v5126_v51  ;;  %3862 = vmatprep.mubr.msk.bf16.mxu1 %vm4428_vm7, %v4427_v52 }
0x3421   :  { %v2122_v17 = vadd.f32 %v2120_v23, %v2112_v18  ;;  %3860 = vmatprep.subr.bf16.mxu1 %v4427_v52 }
0x3423   :  { %4215 = vtanh.f32 %v2122_v17 }
0x3424   :  { %3861 = vmatpush3.bf16.msra.mxu1 %v5138_v33 }
0x3425   :  { %3874 = vmatprep.subr.bf16.mxu1 %v4427_v52 }
0x3430   :  { %v4216_v20 = vpop.eup %4215 }
0x3431   :  { %2125 = vrot.lane.b32.xlu1 %v4216_v20, %s4424_s1 }
0x3435   :  { %1340 = vrot.lane.b32.xlu1 %v4911_v38, %s4425_s26 }
0x3439   :  { %1576 = vrot.lane.b32.xlu1 %v4977_v40, %s4425_s26 }
0x343d   :  { %868 = vrot.lane.b32.xlu1 %v4747_v60, %s4425_s26 }
0x3441   :  { %1104 = vrot.lane.b32.xlu1 %v4839_v42, %s4425_s26 }
0x3445   :  { %393 = vrot.lane.b32.xlu1 %v4613_v29, %s4425_s26 }
0x3449   :  { %632 = vrot.lane.b32.xlu1 %v4685_v25, %s4425_s26 }
0x34a3   :  { %v2126_v28 = vpop.permute.xlu1 %2125 }
0x34a4   :  { %v2128_v8 = vmul.f32 %v2126_v28, %v2107_v58 }
0x34a6   :  { %2155 = vrot.lane.b32.xlu1 %v2128_v8, %s4426_s27 }
0x34a7   :  { %v1341_v38 = vpop.permute.xlu1 %1340 }
0x34a8   :  { %1343 = vst.msk [vmem:[#allocation3 + $0x18] sm:$0xf0] %vm396_vm6, %v1341_v38 }
0x34ab   :  { %v1577_v40 = vpop.permute.xlu1 %1576 }
0x34ac   :  { %1579 = vst.msk [vmem:[#allocation3 + $0x10] sm:$0xf0] %vm396_vm6, %v1577_v40 }
0x34af   :  { %v869_v60 = vpop.permute.xlu1 %868 }
0x34b0   :  { %871 = vst.msk [vmem:[#allocation3 + $0x28] sm:$0xf0] %vm396_vm6, %v869_v60 }
0x34b1   :  { %1692 = vst.msk [vmem:[#allocation3 + $0x28] sm:$0xf0] %vm510_vm5, %v5014_v46 }
0x34b3   :  { %v1105_v29 = vpop.permute.xlu1 %1104 }
0x34b4   :  { %1107 = vst.msk [vmem:[#allocation3 + $0x20] sm:$0xf0] %vm396_vm6, %v1105_v29 }
0x34b5   :  { %1456 = vst.msk [vmem:[#allocation3 + $0x20] sm:$0xf0] %vm510_vm5, %v4948_v39 }
0x34b7   :  { %v394_v25 = vpop.permute.xlu1 %393 }
0x34b8   :  { %397 = vst.msk [vmem:[#allocation3 + $0x38] sm:$0xf0] %vm396_vm6, %v394_v25 }
0x34bb   :  { %v633_v42 = vpop.permute.xlu1 %632 }
0x34bc   :  { %635 = vst.msk [vmem:[#allocation3 + $0x30] sm:$0xf0] %vm396_vm6, %v633_v42 }
0x34bd   :  { %1928 = vst.msk [vmem:[#allocation3 + $0x30] sm:$0xf0] %vm510_vm5, %v5068_v45 }
0x34df   :  { %v2613_v10 = vpop.f32.mrf.mxu1 }
0x34e0   :  { %v2620_v11 = vrot.slane %v2613_v10, 4 }
0x34e1   :  { %v3848_v13 = vpop.f32.mrf.mxu1 }
0x34e2   :  { %v2622_v46 = vadd.f32 %v2620_v11, %v2571_v5 }
0x34e3   :  { %v2616_v26 = vpop.f32.mrf.mxu1 }
0x34e4   :  { %4217 = vtanh.f32 %v2622_v46  ;;  %v2623_v36 = vmul.f32 0.5, %v2622_v46 }
0x34e5   :  { %v3849_v27 = vpop.f32.mrf.mxu1 }
0x34e6   :  { %4219 = vtanh.f32 %v2623_v36 }
0x34f1   :  { %v4218_v4 = vpop.eup %4217 }
0x34f2   :  { %2633 = vrot.lane.b32.xlu0 %v4218_v4, %s4424_s1 }
0x34f3   :  { %v4220_v37 = vpop.eup %4219 }
0x34f4   :  { %v2625_v32 = vmul.f32 0.5, %v4220_v37 }
0x34f6   :  { %v2626_v34 = vadd.f32 0.5, %v2625_v32 }
0x34f8   :  { %v2631_v53 = vmul.f32 %v2629_v54, %v2626_v34 }
0x3518   :  { %v2156_v39 = vpop.permute.xlu1 %2155 }
0x3519   :  { %2158 = vst.msk [vmem:[#allocation3 + $0x38] sm:$0xf0] %vm510_vm5, %v2156_v39 }
0x3564   :  { %v2634_v45 = vpop.permute.xlu0 %2633 }
0x3565   :  { %v2636_v47 = vmul.f32 %v2634_v45, %v2626_v34 }
0x3567   :  { %2638 = vrot.lane.b32.xlu0 %v2636_v47, %s4424_s1 }
0x35d9   :  { %v2639_v30 = vpop.permute.xlu0 %2638 }
0x35da   :  { %v5242_v63 = vadd.f32 %v2639_v30, %v2631_v53 }
0x35dc   :  { %4221 = vtanh.f32 %v5242_v63 }
0x35e9   :  { %v4222_v31 = vpop.eup %4221 }
0x35ea   :  { %2644 = vrot.lane.b32.xlu0 %v4222_v31, %s4424_s1 }
0x35ee   :  { %1457 = vrot.lane.b32.xlu0 %v4943_v35, %s4425_s26 }
0x35f2   :  { %1693 = vrot.lane.b32.xlu0 %v5009_v44, %s4425_s26 }
0x35f6   :  { %985 = vrot.lane.b32.xlu0 %v4777_v48, %s4425_s26 }
0x35fa   :  { %1221 = vrot.lane.b32.xlu0 %v4879_v21, %s4425_s26 }
0x35fe   :  { %512 = vrot.lane.b32.xlu0 %v4649_v24, %s4425_s26 }
0x3602   :  { %749 = vrot.lane.b32.xlu0 %v4715_v6, %s4425_s26 }
0x365c   :  { %v2645_v41 = vpop.permute.xlu0 %2644 }
0x365d   :  { %v2647_v1 = vmul.f32 %v2645_v41, %v2626_v34 }
0x365f   :  { %v2649_v9 = vpack.c.bf16 %v2647_v1, %v2647_v1 }
0x3660   :  { %v1458_v12 = vpop.permute.xlu0 %1457 }
0x3661   :  { %v2651_v35 = vrot.slane %v2649_v9, 2  ;;  %1460 = vst.msk [vmem:[#allocation3 + $0x18] sm:$0xf] %vm515_vm8, %v1458_v12 }
0x3663   :  { %2652 = vrot.lane.b32.xlu0 %v2651_v35, %s4426_s27 }
0x3664   :  { %v1694_v44 = vpop.permute.xlu0 %1693 }
0x3665   :  { %1696 = vst.msk [vmem:[#allocation3 + $0x10] sm:$0xf] %vm515_vm8, %v1694_v44 }
0x3668   :  { %v986_v48 = vpop.permute.xlu0 %985  ;;  %v2167_v21 = vld [vmem:[#allocation3 + $0x18] sm:$0xff] }
0x3669   :  { %988 = vst.msk [vmem:[#allocation3 + $0x28] sm:$0xf] %vm515_vm8, %v986_v48 }
0x366a   :  { %1575 = vst.msk [vmem:[#allocation3 + $0x28] sm:$0xf] %vm391_vm3, %v4981_v43 }
0x366c   :  { %v1222_v24 = vpop.permute.xlu0 %1221  ;;  %v2166_v6 = vld [vmem:[#allocation3 + $0x10] sm:$0xff] }
0x366d   :  { %1224 = vst.msk [vmem:[#allocation3 + $0x20] sm:$0xf] %vm515_vm8, %v1222_v24  ;;  %v2173_v16 = vpack.c.bf16 %v2167_v21, %v2166_v6 }
0x366e   :  { %1339 = vst.msk [vmem:[#allocation3 + $0x20] sm:$0xf] %vm391_vm3, %v4915_v22 }
0x366f   :  { %3739 = vmatmul.mubr.msk.bf16.gmra.mxu0 %vm284_vm4, %v2173_v16 }
0x3670   :  { %v513_v61 = vpop.permute.xlu0 %512  ;;  %2300 = vmatprep.mubr.bf16.mxu0 %v4423_v0 }
0x3671   :  { %516 = vst.msk [vmem:[#allocation3 + $0x38] sm:$0xf] %vm515_vm8, %v513_v61  ;;  %v2169_v19 = vld [vmem:[#allocation3 + $0x28] sm:$0xff] }
0x3672   :  { %2047 = vst.msk [vmem:[#allocation3 + $0x38] sm:$0xf] %vm391_vm3, %v5085_v3 }
0x3674   :  { %v750_v43 = vpop.permute.xlu0 %749 }
0x3675   :  { %752 = vst.msk [vmem:[#allocation3 + $0x30] sm:$0xf] %vm515_vm8, %v750_v43  ;;  %v2168_v55 = vld [vmem:[#allocation3 + $0x20] sm:$0xff] }
0x3676   :  { %1811 = vst.msk [vmem:[#allocation3 + $0x30] sm:$0xf] %vm391_vm3, %v5043_v62  ;;  %v2174_v7 = vpack.c.bf16 %v2169_v19, %v2168_v55 }
0x3678   :  { %3740 = vmatmul.mubr.msk.bf16.gmra.mxu0 %vm284_vm4, %v2174_v7 }
0x3679   :  { %2310 = vmatprep.mubr.bf16.mxu0 %v4423_v0  ;;  %v2171_v57 = vld [vmem:[#allocation3 + $0x38] sm:$0xff] }
0x367d   :  { %v2170_v22 = vld [vmem:[#allocation3 + $0x30] sm:$0xff] }
0x367e   :  { %v2175_v15 = vpack.c.bf16 %v2171_v57, %v2170_v22 }
0x3680   :  { %3741 = vmatmul.mubr.msk.bf16.gmra.mxu0 %vm284_vm4, %v2175_v15 }
0x3681   :  { %3854 = vmatprep.mubr.msk.bf16.mxu0 %vm4428_vm7, %v4427_v52 }
0x36d5   :  { %v2653_v3 = vpop.permute.xlu0 %2652 }
0x36d6   :  { %3855 = vmatmul.mubr.msk.bf16.vlgmr.msra.gmra.mxu0 %vm389_vm2, %v2653_v3 }
0x36d7   :  { %3867 = vmatpush3.bf16.msra.mxu0 %v5126_v51  ;;  %3870 = vmatprep.mubr.msk.bf16.mxu0 %vm4428_vm7, %v4427_v52 }
0x36d8   :  { %3868 = vmatprep.subr.bf16.mxu0 %v4427_v52 }
0x36db   :  { %3869 = vmatpush3.bf16.msra.mxu0 %v5138_v33 }
0x36dc   :  { %3882 = vmatprep.subr.bf16.mxu0 %v4427_v52 }
0x372f   :  { %v2292_v0 = vpop.f32.mrf.mxu0 }
0x3730   :  { %v2293_v62 = vadd.f32 %v2292_v0, %v5162_v14 }
0x3731   :  { %v2294_v58 = vpop.f32.mrf.mxu0 }
0x3732   :  { %2325 = vst [vmem:[#allocation2 + $0x50] sm:$0xff] %v2293_v62  ;;  %v2295_v59 = vadd.f32 %v2294_v58, %v5166_v56 }
0x3733   :  { %v2296_v49 = vpop.f32.mrf.mxu0 }
0x3734   :  { %2326 = vst [vmem:[#allocation2 + $0x68] sm:$0xff] %v2295_v59  ;;  %v2297_v50 = vadd.f32 %v2296_v49, %v5162_v14 }
0x3735   :  { %v2298_v2 = vpop.f32.mrf.mxu0 }
0x3736   :  { %2327 = vst [vmem:[#allocation2 + $0x8] sm:$0xff] %v2297_v50  ;;  %v2299_v18 = vadd.f32 %v2298_v2, %v5166_v56 }
0x3738   :  { %2328 = vst [vmem:[#allocation2 + $0x48] sm:$0xff] %v2299_v18  ;;  %v2302_v23 = vpop.f32.mrf.mxu0 }
0x3739   :  { %v2303_v17 = vadd.f32 %v2302_v23, %v5162_v14  ;;  %v2648_v26 = vld [vmem:[#allocation2 + $0x50] sm:$0xf]  ;;  %v2723_v24 = vld [vmem:[#allocation2 + $0x50] sm:$0xf0] }
0x373a   :  { %v2304_v20 = vpop.f32.mrf.mxu0 }
0x373b   :  { %2329 = vst [vmem:[#allocation2 + $0x40] sm:$0xff] %v2303_v17  ;;  %v2305_v28 = vadd.f32 %v2304_v20, %v5166_v56 }
0x373c   :  { %v2306_v8 = vpop.f32.mrf.mxu0 }
0x373d   :  { %2330 = vst [vmem:[#allocation2 + $0x20] sm:$0xff] %v2305_v28  ;;  %v2307_v38 = vadd.f32 %v2306_v8, %v5162_v14  ;;  %v2800_v17 = vld [vmem:[#allocation2 + $0x8] sm:$0xf] }
0x373e   :  { %v2308_v40 = vpop.f32.mrf.mxu0 }
0x373f   :  { %2331 = vst [vmem:[#allocation2 + $0x10] sm:$0xff] %v2307_v38  ;;  %v2309_v60 = vadd.f32 %v2308_v40, %v5166_v56 }
0x3740   :  { %v2312_v29 = vpop.f32.mrf.mxu0 }
0x3741   :  { %2332 = vst [vmem:[#allocation2 + $0x38] sm:$0xff] %v2309_v60  ;;  %v2313_v25 = vadd.f32 %v2312_v29, %v5162_v14 }
0x3742   :  { %v2314_v42 = vpop.f32.mrf.mxu0 }
0x3743   :  { %2333 = vst [vmem:[#allocation2 + $0x60] sm:$0xff] %v2313_v25  ;;  %v2315_v10 = vadd.f32 %v2314_v42, %v5166_v56 }
0x3744   :  { %v2316_v11 = vpop.f32.mrf.mxu0 }
0x3745   :  { %2334 = vst [vmem:[#allocation2 + $0x70] sm:$0xff] %v2315_v10  ;;  %v2317_v5 = vadd.f32 %v2316_v11, %v5162_v14 }
0x3746   :  { %v2318_v13 = vpop.f32.mrf.mxu0 }
0x3747   :  { %2335 = vst [vmem:[#allocation2 + $0x78] sm:$0xff] %v2317_v5  ;;  %v2319_v46 = vadd.f32 %v2318_v13, %v5166_v56  ;;  %v2704_v56 = vrot.slane %v5242_v63, 4 }
0x3749   :  { %2336 = vst [vmem:[#allocation2 + $0x28] sm:$0xff] %v2319_v46 }
0x3796   :  { %v2691_v27 = vpop.f32.mrf.mxu0 }
0x3797   :  { %v2697_v4 = vadd.f32 %v2691_v27, %v2648_v26 }
0x3798   :  { %v3856_v39 = vpop.f32.mrf.mxu0 }
0x3799   :  { %4223 = vtanh.f32 %v2697_v4  ;;  %v2698_v34 = vmul.f32 0.5, %v2697_v4 }
0x379a   :  { %v2694_v36 = vpop.f32.mrf.mxu0 }
0x379b   :  { %4225 = vtanh.f32 %v2698_v34 }
0x379c   :  { %v3857_v37 = vpop.f32.mrf.mxu0 }
0x37a6   :  { %v4224_v32 = vpop.eup %4223 }
0x37a7   :  { %2708 = vrot.lane.b32.xlu1 %v4224_v32, %s4424_s1 }
0x37a8   :  { %v4226_v45 = vpop.eup %4225 }
0x37a9   :  { %v2700_v47 = vmul.f32 0.5, %v4226_v45 }
0x37ab   :  { %v2701_v14 = vadd.f32 0.5, %v2700_v47  ;;  %v2875_v47 = vld [vmem:[#allocation2 + $0x8] sm:$0xf0] }
0x37ad   :  { %v2706_v30 = vmul.f32 %v2704_v56, %v2701_v14 }
0x3819   :  { %v2709_v54 = vpop.permute.xlu1 %2708 }
0x381a   :  { %v2711_v53 = vmul.f32 %v2709_v54, %v2701_v14 }
0x381c   :  { %2713 = vrot.lane.b32.xlu0 %v2711_v53, %s4424_s1 }
0x388e   :  { %v2714_v31 = vpop.permute.xlu0 %2713 }
0x388f   :  { %v2716_v41 = vadd.f32 %v2714_v31, %v2706_v30 }
0x3891   :  { %4227 = vtanh.f32 %v2716_v41  ;;  %v2781_v3 = vrot.slane %v2716_v41, 4 }
0x389e   :  { %v4228_v1 = vpop.eup %4227 }
0x389f   :  { %2719 = vrot.lane.b32.xlu1 %v4228_v1, %s4424_s1 }
0x3911   :  { %v2720_v9 = vpop.permute.xlu1 %2719 }
0x3912   :  { %v2722_v12 = vmul.f32 %v2720_v9, %v2701_v14 }
0x3914   :  { %v2724_v35 = vpack.c.bf16 %v2722_v12, %v2722_v12 }
0x3916   :  { %2726 = vrot.lane.b32.xlu0 %v2724_v35, %s4426_s27 }
0x3988   :  { %v2727_v44 = vpop.permute.xlu0 %2726 }
0x3989   :  { %3863 = vmatmul.mubr.msk.bf16.vlgmr.msra.gmra.mxu1 %vm389_vm2, %v2727_v44 }
0x398a   :  { %3875 = vmatpush3.bf16.msra.mxu1 %v5126_v51  ;;  %3878 = vmatprep.mubr.msk.bf16.mxu1 %vm4428_vm7, %v4427_v52 }
0x398b   :  { %3876 = vmatprep.subr.bf16.mxu1 %v4427_v52 }
0x398e   :  { %3877 = vmatpush3.bf16.msra.mxu1 %v5138_v33 }
0x398f   :  { %3890 = vmatprep.subr.bf16.mxu1 %v4427_v52 }
0x3a49   :  { %v2765_v63 = vpop.f32.mrf.mxu1 }
0x3a4a   :  { %v2772_v48 = vrot.slane %v2765_v63, 4 }
0x3a4b   :  { %v3864_v6 = vpop.f32.mrf.mxu1 }
0x3a4c   :  { %v2774_v21 = vadd.f32 %v2772_v48, %v2723_v24 }
0x3a4d   :  { %v2768_v16 = vpop.f32.mrf.mxu1 }
0x3a4e   :  { %4229 = vtanh.f32 %v2774_v21  ;;  %v2775_v55 = vmul.f32 0.5, %v2774_v21 }
0x3a4f   :  { %v3865_v61 = vpop.f32.mrf.mxu1 }
0x3a50   :  { %4231 = vtanh.f32 %v2775_v55 }
0x3a5b   :  { %v4230_v43 = vpop.eup %4229 }
0x3a5c   :  { %2785 = vrot.lane.b32.xlu1 %v4230_v43, %s4424_s1 }
0x3a5d   :  { %v4232_v19 = vpop.eup %4231 }
0x3a5e   :  { %v2777_v7 = vmul.f32 0.5, %v4232_v19  ;;  %v2952_v19 = vld [vmem:[#allocation2 + $0x40] sm:$0xf] }
0x3a60   :  { %v2778_v22 = vadd.f32 0.5, %v2777_v7 }
0x3a62   :  { %v2783_v0 = vmul.f32 %v2781_v3, %v2778_v22 }
0x3ace   :  { %v2786_v57 = vpop.permute.xlu1 %2785 }
0x3acf   :  { %v2788_v15 = vmul.f32 %v2786_v57, %v2778_v22 }
0x3ad1   :  { %2790 = vrot.lane.b32.xlu0 %v2788_v15, %s4424_s1 }
0x3b43   :  { %v2791_v62 = vpop.permute.xlu0 %2790 }
0x3b44   :  { %v2793_v58 = vadd.f32 %v2791_v62, %v2783_v0 }
0x3b46   :  { %4233 = vtanh.f32 %v2793_v58  ;;  %v2856_v13 = vrot.slane %v2793_v58, 4 }
0x3b53   :  { %v4234_v59 = vpop.eup %4233 }
0x3b54   :  { %2796 = vrot.lane.b32.xlu1 %v4234_v59, %s4424_s1 }
0x3bc6   :  { %v2797_v49 = vpop.permute.xlu1 %2796 }
0x3bc7   :  { %v2799_v50 = vmul.f32 %v2797_v49, %v2778_v22 }
0x3bc9   :  { %v2801_v2 = vpack.c.bf16 %v2799_v50, %v2799_v50 }
0x3bcb   :  { %v2803_v18 = vrot.slane %v2801_v2, 2 }
0x3bcd   :  { %2804 = vrot.lane.b32.xlu0 %v2803_v18, %s4426_s27 }
0x3c3f   :  { %v2805_v23 = vpop.permute.xlu0 %2804 }
0x3c40   :  { %3871 = vmatmul.mubr.msk.bf16.vlgmr.msra.gmra.mxu0 %vm389_vm2, %v2805_v23 }
0x3c41   :  { %3883 = vmatpush3.bf16.msra.mxu0 %v5126_v51  ;;  %3886 = vmatprep.mubr.msk.bf16.mxu0 %vm4428_vm7, %v4427_v52 }
0x3c42   :  { %3884 = vmatprep.subr.bf16.mxu0 %v4427_v52 }
0x3c45   :  { %3885 = vmatpush3.bf16.msra.mxu0 %v5138_v33 }
0x3c46   :  { %3898 = vmatprep.subr.bf16.mxu0 %v4427_v52 }
0x3d00   :  { %v2843_v20 = vpop.f32.mrf.mxu0 }
0x3d01   :  { %v2849_v28 = vadd.f32 %v2843_v20, %v2800_v17 }
0x3d02   :  { %v3872_v8 = vpop.f32.mrf.mxu0 }
0x3d03   :  { %4235 = vtanh.f32 %v2849_v28  ;;  %v2850_v29 = vmul.f32 0.5, %v2849_v28 }
0x3d04   :  { %v2846_v38 = vpop.f32.mrf.mxu0 }
0x3d05   :  { %4237 = vtanh.f32 %v2850_v29 }
0x3d06   :  { %v3873_v40 = vpop.f32.mrf.mxu0 }
0x3d10   :  { %v4236_v60 = vpop.eup %4235 }
0x3d11   :  { %2860 = vrot.lane.b32.xlu1 %v4236_v60, %s4424_s1 }
0x3d12   :  { %v4238_v25 = vpop.eup %4237 }
0x3d13   :  { %v2852_v42 = vmul.f32 0.5, %v4238_v25 }
0x3d15   :  { %v2853_v10 = vadd.f32 0.5, %v2852_v42  ;;  %v3027_v42 = vld [vmem:[#allocation2 + $0x40] sm:$0xf0] }
0x3d17   :  { %v2858_v46 = vmul.f32 %v2856_v13, %v2853_v10 }
0x3d83   :  { %v2861_v11 = vpop.permute.xlu1 %2860 }
0x3d84   :  { %v2863_v5 = vmul.f32 %v2861_v11, %v2853_v10 }
0x3d86   :  { %2865 = vrot.lane.b32.xlu0 %v2863_v5, %s4424_s1 }
0x3df8   :  { %v2866_v26 = vpop.permute.xlu0 %2865 }
0x3df9   :  { %v2868_v27 = vadd.f32 %v2866_v26, %v2858_v46 }
0x3dfb   :  { %4239 = vtanh.f32 %v2868_v27  ;;  %v2933_v44 = vrot.slane %v2868_v27, 4 }
0x3e08   :  { %v4240_v4 = vpop.eup %4239 }
0x3e09   :  { %2871 = vrot.lane.b32.xlu1 %v4240_v4, %s4424_s1 }
0x3e7b   :  { %v2872_v39 = vpop.permute.xlu1 %2871 }
0x3e7c   :  { %v2874_v36 = vmul.f32 %v2872_v39, %v2853_v10 }
0x3e7e   :  { %v2876_v37 = vpack.c.bf16 %v2874_v36, %v2874_v36 }
0x3e80   :  { %2878 = vrot.lane.b32.xlu0 %v2876_v37, %s4426_s27 }
0x3ef2   :  { %v2879_v32 = vpop.permute.xlu0 %2878 }
0x3ef3   :  { %3879 = vmatmul.mubr.msk.bf16.vlgmr.msra.gmra.mxu1 %vm389_vm2, %v2879_v32 }
0x3ef4   :  { %3891 = vmatpush3.bf16.msra.mxu1 %v5126_v51  ;;  %3894 = vmatprep.mubr.msk.bf16.mxu1 %vm4428_vm7, %v4427_v52 }
0x3ef5   :  { %3892 = vmatprep.subr.bf16.mxu1 %v4427_v52 }
0x3ef8   :  { %3893 = vmatpush3.bf16.msra.mxu1 %v5138_v33 }
0x3ef9   :  { %3906 = vmatprep.subr.bf16.mxu1 %v4427_v52 }
0x3fb3   :  { %v2917_v34 = vpop.f32.mrf.mxu1 }
0x3fb4   :  { %v2924_v45 = vrot.slane %v2917_v34, 4 }
0x3fb5   :  { %v3880_v14 = vpop.f32.mrf.mxu1 }
0x3fb6   :  { %v2926_v54 = vadd.f32 %v2924_v45, %v2875_v47 }
0x3fb7   :  { %v2920_v53 = vpop.f32.mrf.mxu1 }
0x3fb8   :  { %4241 = vtanh.f32 %v2926_v54  ;;  %v2927_v31 = vmul.f32 0.5, %v2926_v54 }
0x3fb9   :  { %v3881_v56 = vpop.f32.mrf.mxu1 }
0x3fba   :  { %4243 = vtanh.f32 %v2927_v31  ;;  %v5372_v31 = vld [vmem:[%s5454_s6] sm:$0xff]  }
0x3fc5   :  { %v4242_v30 = vpop.eup %4241 }
0x3fc6   :  { %2937 = vrot.lane.b32.xlu1 %v4242_v30, %s4424_s1  ;;  %v5363_v30 = vld [vmem:[%s5454_s6 + $0x8] sm:$0xff]  }
0x3fc7   :  { %v4244_v41 = vpop.eup %4243 }
0x3fc8   :  { %v2929_v1 = vmul.f32 0.5, %v4244_v41  ;;  %v3104_v41 = vld [vmem:[#allocation2 + $0x10] sm:$0xf] }
0x3fca   :  { %v2930_v9 = vadd.f32 0.5, %v2929_v1 }
0x3fcc   :  { %v2935_v63 = vmul.f32 %v2933_v44, %v2930_v9 }
0x4038   :  { %v2938_v12 = vpop.permute.xlu1 %2937 }
0x4039   :  { %v2940_v35 = vmul.f32 %v2938_v12, %v2930_v9 }
0x403b   :  { %2942 = vrot.lane.b32.xlu0 %v2940_v35, %s4424_s1 }
0x40ad   :  { %v2943_v48 = vpop.permute.xlu0 %2942 }
0x40ae   :  { %v2945_v24 = vadd.f32 %v2943_v48, %v2935_v63 }
0x40b0   :  { %4245 = vtanh.f32 %v2945_v24  ;;  %v3008_v18 = vrot.slane %v2945_v24, 4 }
0x40bd   :  { %v4246_v6 = vpop.eup %4245 }
0x40be   :  { %2948 = vrot.lane.b32.xlu1 %v4246_v6, %s4424_s1 }
0x4130   :  { %v2949_v21 = vpop.permute.xlu1 %2948 }
0x4131   :  { %v2951_v16 = vmul.f32 %v2949_v21, %v2930_v9 }
0x4133   :  { %v2953_v61 = vpack.c.bf16 %v2951_v16, %v2951_v16 }
0x4135   :  { %v2955_v43 = vrot.slane %v2953_v61, 2 }
0x4137   :  { %2956 = vrot.lane.b32.xlu0 %v2955_v43, %s4426_s27 }
0x41a9   :  { %v2957_v55 = vpop.permute.xlu0 %2956 }
0x41aa   :  { %3887 = vmatmul.mubr.msk.bf16.vlgmr.msra.gmra.mxu0 %vm389_vm2, %v2957_v55 }
0x41ab   :  { %3899 = vmatpush3.bf16.msra.mxu0 %v5126_v51  ;;  %3902 = vmatprep.mubr.msk.bf16.mxu0 %vm4428_vm7, %v4427_v52 }
0x41ac   :  { %3900 = vmatprep.subr.bf16.mxu0 %v4427_v52 }
0x41af   :  { %3901 = vmatpush3.bf16.msra.mxu0 %v5138_v33 }
0x41b0   :  { %3914 = vmatprep.subr.bf16.mxu0 %v4427_v52 }
0x426a   :  { %v2995_v7 = vpop.f32.mrf.mxu0 }
0x426b   :  { %v3001_v22 = vadd.f32 %v2995_v7, %v2952_v19 }
0x426c   :  { %v3888_v57 = vpop.f32.mrf.mxu0 }
0x426d   :  { %4247 = vtanh.f32 %v3001_v22  ;;  %v3002_v62 = vmul.f32 0.5, %v3001_v22 }
0x426e   :  { %v2998_v15 = vpop.f32.mrf.mxu0 }
0x426f   :  { %4249 = vtanh.f32 %v3002_v62 }
0x4270   :  { %v3889_v3 = vpop.f32.mrf.mxu0 }
0x427a   :  { %v4248_v0 = vpop.eup %4247 }
0x427b   :  { %3012 = vrot.lane.b32.xlu1 %v4248_v0, %s4424_s1 }
0x427c   :  { %v4250_v58 = vpop.eup %4249 }
0x427d   :  { %v3004_v59 = vmul.f32 0.5, %v4250_v58 }
0x427f   :  { %v3005_v49 = vadd.f32 0.5, %v3004_v59  ;;  %v3179_v59 = vld [vmem:[#allocation2 + $0x10] sm:$0xf0] }
0x4281   :  { %v3010_v23 = vmul.f32 %v3008_v18, %v3005_v49 }
0x42ed   :  { %v3013_v50 = vpop.permute.xlu1 %3012 }
0x42ee   :  { %v3015_v2 = vmul.f32 %v3013_v50, %v3005_v49 }
0x42f0   :  { %3017 = vrot.lane.b32.xlu0 %v3015_v2, %s4424_s1 }
0x4362   :  { %v3018_v17 = vpop.permute.xlu0 %3017 }
0x4363   :  { %v3020_v20 = vadd.f32 %v3018_v17, %v3010_v23 }
0x4365   :  { %4251 = vtanh.f32 %v3020_v20  ;;  %v3085_v36 = vrot.slane %v3020_v20, 4 }
0x4372   :  { %v4252_v28 = vpop.eup %4251 }
0x4373   :  { %3023 = vrot.lane.b32.xlu1 %v4252_v28, %s4424_s1 }
0x43e5   :  { %v3024_v8 = vpop.permute.xlu1 %3023 }
0x43e6   :  { %v3026_v38 = vmul.f32 %v3024_v8, %v3005_v49 }
0x43e8   :  { %v3028_v40 = vpack.c.bf16 %v3026_v38, %v3026_v38 }
0x43ea   :  { %3030 = vrot.lane.b32.xlu0 %v3028_v40, %s4426_s27 }
0x445c   :  { %v3031_v60 = vpop.permute.xlu0 %3030 }
0x445d   :  { %3895 = vmatmul.mubr.msk.bf16.vlgmr.msra.gmra.mxu1 %vm389_vm2, %v3031_v60 }
0x445e   :  { %3907 = vmatpush3.bf16.msra.mxu1 %v5126_v51  ;;  %3910 = vmatprep.mubr.msk.bf16.mxu1 %vm4428_vm7, %v4427_v52 }
0x445f   :  { %3908 = vmatprep.subr.bf16.mxu1 %v4427_v52 }
0x4462   :  { %3909 = vmatpush3.bf16.msra.mxu1 %v5138_v33 }
0x4463   :  { %3922 = vmatprep.subr.bf16.mxu1 %v4427_v52 }
0x451d   :  { %v3069_v29 = vpop.f32.mrf.mxu1 }
0x451e   :  { %v3076_v25 = vrot.slane %v3069_v29, 4 }
0x451f   :  { %v3896_v10 = vpop.f32.mrf.mxu1 }
0x4520   :  { %v3078_v11 = vadd.f32 %v3076_v25, %v3027_v42 }
0x4521   :  { %v3072_v5 = vpop.f32.mrf.mxu1 }
0x4522   :  { %4253 = vtanh.f32 %v3078_v11  ;;  %v3079_v51 = vmul.f32 0.5, %v3078_v11 }
0x4523   :  { %v3897_v13 = vpop.f32.mrf.mxu1 }
0x4524   :  { %4255 = vtanh.f32 %v3079_v51 }
0x452f   :  { %v4254_v46 = vpop.eup %4253 }
0x4530   :  { %3089 = vrot.lane.b32.xlu1 %v4254_v46, %s4424_s1 }
0x4531   :  { %v4256_v26 = vpop.eup %4255 }
0x4532   :  { %v3081_v27 = vmul.f32 0.5, %v4256_v26  ;;  %v3256_v26 = vld [vmem:[#allocation2 + $0x60] sm:$0xf] }
0x4534   :  { %v3082_v4 = vadd.f32 0.5, %v3081_v27 }
0x4536   :  { %v3087_v37 = vmul.f32 %v3085_v36, %v3082_v4 }
0x45a2   :  { %v3090_v39 = vpop.permute.xlu1 %3089 }
0x45a3   :  { %v3092_v33 = vmul.f32 %v3090_v39, %v3082_v4 }
0x45a5   :  { %3094 = vrot.lane.b32.xlu0 %v3092_v33, %s4424_s1 }
0x4617   :  { %v3095_v32 = vpop.permute.xlu0 %3094 }
0x4618   :  { %v3097_v34 = vadd.f32 %v3095_v32, %v3087_v37 }
0x461a   :  { %4257 = vtanh.f32 %v3097_v34  ;;  %v3160_v43 = vrot.slane %v3097_v34, 4 }
0x4627   :  { %v4258_v45 = vpop.eup %4257 }
0x4628   :  { %3100 = vrot.lane.b32.xlu1 %v4258_v45, %s4424_s1 }
0x469a   :  { %v3101_v47 = vpop.permute.xlu1 %3100 }
0x469b   :  { %v3103_v14 = vmul.f32 %v3101_v47, %v3082_v4 }
0x469d   :  { %v3105_v54 = vpack.c.bf16 %v3103_v14, %v3103_v14 }
0x469f   :  { %v3107_v53 = vrot.slane %v3105_v54, 2 }
0x46a1   :  { %3108 = vrot.lane.b32.xlu0 %v3107_v53, %s4426_s27 }
0x4713   :  { %v3109_v56 = vpop.permute.xlu0 %3108 }
0x4714   :  { %3903 = vmatmul.mubr.msk.bf16.vlgmr.msra.gmra.mxu0 %vm389_vm2, %v3109_v56 }
0x4715   :  { %3915 = vmatpush3.bf16.msra.mxu0 %v5363_v30  ;;  %3918 = vmatprep.mubr.msk.bf16.mxu0 %vm4428_vm7, %v4427_v52 }
0x4716   :  { %3916 = vmatprep.subr.bf16.mxu0 %v4427_v52 }
0x4719   :  { %3917 = vmatpush3.bf16.msra.mxu0 %v5372_v31 }
0x471a   :  { %3930 = vmatprep.subr.bf16.mxu0 %v4427_v52 }
0x47d4   :  { %v3147_v1 = vpop.f32.mrf.mxu0 }
0x47d5   :  { %v3153_v9 = vadd.f32 %v3147_v1, %v3104_v41 }
0x47d6   :  { %v3904_v12 = vpop.f32.mrf.mxu0 }
0x47d7   :  { %4259 = vtanh.f32 %v3153_v9  ;;  %v3154_v48 = vmul.f32 0.5, %v3153_v9 }
0x47d8   :  { %v3150_v35 = vpop.f32.mrf.mxu0 }
0x47d9   :  { %4261 = vtanh.f32 %v3154_v48 }
0x47da   :  { %v3905_v44 = vpop.f32.mrf.mxu0 }
0x47e4   :  { %v4260_v63 = vpop.eup %4259 }
0x47e5   :  { %3164 = vrot.lane.b32.xlu1 %v4260_v63, %s4424_s1 }
0x47e6   :  { %v4262_v24 = vpop.eup %4261 }
0x47e7   :  { %v3156_v6 = vmul.f32 0.5, %v4262_v24 }
0x47e9   :  { %v3157_v21 = vadd.f32 0.5, %v3156_v6  ;;  %v3331_v6 = vld [vmem:[#allocation2 + $0x60] sm:$0xf0] }
0x47eb   :  { %v3162_v55 = vmul.f32 %v3160_v43, %v3157_v21 }
0x4857   :  { %v3165_v16 = vpop.permute.xlu1 %3164 }
0x4858   :  { %v3167_v61 = vmul.f32 %v3165_v16, %v3157_v21 }
0x485a   :  { %3169 = vrot.lane.b32.xlu0 %v3167_v61, %s4424_s1 }
0x48cc   :  { %v3170_v19 = vpop.permute.xlu0 %3169 }
0x48cd   :  { %v3172_v7 = vadd.f32 %v3170_v19, %v3162_v55 }
0x48cf   :  { %4263 = vtanh.f32 %v3172_v7  ;;  %v3237_v60 = vrot.slane %v3172_v7, 4 }
0x48dc   :  { %v4264_v22 = vpop.eup %4263 }
0x48dd   :  { %3175 = vrot.lane.b32.xlu1 %v4264_v22, %s4424_s1 }
0x494f   :  { %v3176_v57 = vpop.permute.xlu1 %3175 }
0x4950   :  { %v3178_v15 = vmul.f32 %v3176_v57, %v3157_v21 }
0x4952   :  { %v3180_v3 = vpack.c.bf16 %v3178_v15, %v3178_v15 }
0x4954   :  { %3182 = vrot.lane.b32.xlu0 %v3180_v3, %s4426_s27 }
0x49c6   :  { %v3183_v0 = vpop.permute.xlu0 %3182 }
0x49c7   :  { %3911 = vmatmul.mubr.msk.bf16.vlgmr.msra.gmra.mxu1 %vm389_vm2, %v3183_v0 }
0x49c8   :  { %3923 = vmatpush3.bf16.msra.mxu1 %v5363_v30  ;;  %3926 = vmatprep.mubr.msk.bf16.mxu1 %vm4428_vm7, %v4427_v52 }
0x49c9   :  { %3924 = vmatprep.subr.bf16.mxu1 %v4427_v52 }
0x49cc   :  { %3925 = vmatpush3.bf16.msra.mxu1 %v5372_v31 }
0x49cd   :  { %3938 = vmatprep.subr.bf16.mxu1 %v4427_v52 }
0x4a87   :  { %v3221_v62 = vpop.f32.mrf.mxu1 }
0x4a88   :  { %v3228_v58 = vrot.slane %v3221_v62, 4 }
0x4a89   :  { %v3912_v49 = vpop.f32.mrf.mxu1 }
0x4a8a   :  { %v3230_v50 = vadd.f32 %v3228_v58, %v3179_v59 }
0x4a8b   :  { %v3224_v2 = vpop.f32.mrf.mxu1 }
0x4a8c   :  { %4265 = vtanh.f32 %v3230_v50  ;;  %v3231_v17 = vmul.f32 0.5, %v3230_v50 }
0x4a8d   :  { %v3913_v18 = vpop.f32.mrf.mxu1 }
0x4a8e   :  { %4267 = vtanh.f32 %v3231_v17 }
0x4a99   :  { %v4266_v23 = vpop.eup %4265 }
0x4a9a   :  { %3241 = vrot.lane.b32.xlu1 %v4266_v23, %s4424_s1  ;;  %v3408_v23 = vld [vmem:[#allocation2 + $0x78] sm:$0xf] }
0x4a9b   :  { %v4268_v20 = vpop.eup %4267 }
0x4a9c   :  { %v3233_v28 = vmul.f32 0.5, %v4268_v20 }
0x4a9e   :  { %v3234_v8 = vadd.f32 0.5, %v3233_v28 }
0x4aa0   :  { %v3239_v29 = vmul.f32 %v3237_v60, %v3234_v8 }
0x4b0c   :  { %v3242_v38 = vpop.permute.xlu1 %3241 }
0x4b0d   :  { %v3244_v40 = vmul.f32 %v3242_v38, %v3234_v8 }
0x4b0f   :  { %3246 = vrot.lane.b32.xlu0 %v3244_v40, %s4424_s1 }
0x4b81   :  { %v3247_v25 = vpop.permute.xlu0 %3246 }
0x4b82   :  { %v3249_v42 = vadd.f32 %v3247_v25, %v3239_v29 }
0x4b84   :  { %4269 = vtanh.f32 %v3249_v42  ;;  %v3312_v53 = vrot.slane %v3249_v42, 4 }
0x4b91   :  { %v4270_v10 = vpop.eup %4269 }
0x4b92   :  { %3252 = vrot.lane.b32.xlu1 %v4270_v10, %s4424_s1 }
0x4c04   :  { %v3253_v11 = vpop.permute.xlu1 %3252 }
0x4c05   :  { %v3255_v5 = vmul.f32 %v3253_v11, %v3234_v8 }
0x4c07   :  { %v3257_v13 = vpack.c.bf16 %v3255_v5, %v3255_v5 }
0x4c09   :  { %v3259_v46 = vrot.slane %v3257_v13, 2 }
0x4c0b   :  { %3260 = vrot.lane.b32.xlu0 %v3259_v46, %s4426_s27 }
0x4c7d   :  { %v3261_v51 = vpop.permute.xlu0 %3260 }
0x4c7e   :  { %3919 = vmatmul.mubr.msk.bf16.vlgmr.msra.gmra.mxu0 %vm389_vm2, %v3261_v51 }
0x4c7f   :  { %3931 = vmatpush3.bf16.msra.mxu0 %v5363_v30  ;;  %3934 = vmatprep.mubr.msk.bf16.mxu0 %vm4428_vm7, %v4427_v52 }
0x4c80   :  { %3932 = vmatprep.subr.bf16.mxu0 %v4427_v52 }
0x4c83   :  { %3933 = vmatpush3.bf16.msra.mxu0 %v5372_v31 }
0x4c84   :  { %3946 = vmatprep.subr.bf16.mxu0 %v4427_v52 }
0x4d3e   :  { %v3299_v27 = vpop.f32.mrf.mxu0 }
0x4d3f   :  { %v3305_v4 = vadd.f32 %v3299_v27, %v3256_v26  ;;  %v3560_v27 = vld [vmem:[#allocation2 + $0x28] sm:$0xf0] }
0x4d40   :  { %v3920_v39 = vpop.f32.mrf.mxu0 }
0x4d41   :  { %4271 = vtanh.f32 %v3305_v4  ;;  %v3306_v32 = vmul.f32 0.5, %v3305_v4 }
0x4d42   :  { %v3302_v33 = vpop.f32.mrf.mxu0 }
0x4d43   :  { %4273 = vtanh.f32 %v3306_v32 }
0x4d44   :  { %v3921_v36 = vpop.f32.mrf.mxu0 }
0x4d4e   :  { %v4272_v37 = vpop.eup %4271 }
0x4d4f   :  { %3316 = vrot.lane.b32.xlu1 %v4272_v37, %s4424_s1  ;;  %v3561_v37 = vmul.f32 0.5, %v3560_v27 }
0x4d50   :  { %v4274_v34 = vpop.eup %4273 }
0x4d51   :  { %v3308_v45 = vmul.f32 0.5, %v4274_v34 }
0x4d53   :  { %v3309_v47 = vadd.f32 0.5, %v3308_v45 }
0x4d55   :  { %v3314_v56 = vmul.f32 %v3312_v53, %v3309_v47 }
0x4dc1   :  { %v3317_v14 = vpop.permute.xlu1 %3316 }
0x4dc2   :  { %v3319_v54 = vmul.f32 %v3317_v14, %v3309_v47 }
0x4dc4   :  { %3321 = vrot.lane.b32.xlu0 %v3319_v54, %s4424_s1 }
0x4e36   :  { %v3322_v41 = vpop.permute.xlu0 %3321 }
0x4e37   :  { %v3324_v1 = vadd.f32 %v3322_v41, %v3314_v56 }
0x4e39   :  { %4275 = vtanh.f32 %v3324_v1 }
0x4e46   :  { %v4276_v9 = vpop.eup %4275 }
0x4e47   :  { %3327 = vrot.lane.b32.xlu1 %v4276_v9, %s4424_s1 }
0x4eb9   :  { %v3328_v12 = vpop.permute.xlu1 %3327 }
0x4eba   :  { %v3330_v35 = vmul.f32 %v3328_v12, %v3309_v47 }
0x4ebc   :  { %v3332_v44 = vpack.c.bf16 %v3330_v35, %v3330_v35  ;;  %v3483_v35 = vld [vmem:[#allocation2 + $0x78] sm:$0xf0] }
0x4ebe   :  { %3334 = vrot.lane.b32.xlu0 %v3332_v44, %s4426_s27 }
0x4f30   :  { %v3335_v63 = vpop.permute.xlu0 %3334 }
0x4f31   :  { %3927 = vmatmul.mubr.msk.bf16.vlgmr.msra.gmra.mxu1 %vm389_vm2, %v3335_v63 }
0x4f32   :  { %3939 = vmatpush3.bf16.msra.mxu1 %v5363_v30  ;;  %3942 = vmatprep.mubr.msk.bf16.mxu1 %vm4428_vm7, %v4427_v52 }
0x4f33   :  { %3940 = vmatprep.subr.bf16.mxu1 %v4427_v52 }
0x4f36   :  { %3941 = vmatpush3.bf16.msra.mxu1 %v5372_v31  ;;  %v3389_v31 = vrot.slane %v3324_v1, 4 }
0x4ff1   :  { %v3373_v48 = vpop.f32.mrf.mxu1 }
0x4ff2   :  { %v3380_v24 = vrot.slane %v3373_v48, 4 }
0x4ff3   :  { %v3928_v21 = vpop.f32.mrf.mxu1 }
0x4ff4   :  { %v3382_v16 = vadd.f32 %v3380_v24, %v3331_v6 }
0x4ff5   :  { %v3376_v61 = vpop.f32.mrf.mxu1 }
0x4ff6   :  { %4277 = vtanh.f32 %v3382_v16  ;;  %v3383_v19 = vmul.f32 0.5, %v3382_v16 }
0x4ff7   :  { %v3929_v43 = vpop.f32.mrf.mxu1 }
0x4ff8   :  { %4279 = vtanh.f32 %v3383_v19 }
0x5003   :  { %v4278_v55 = vpop.eup %4277 }
0x5004   :  { %3393 = vrot.lane.b32.xlu1 %v4278_v55, %s4424_s1 }
0x5005   :  { %v4280_v30 = vpop.eup %4279 }
0x5006   :  { %v3385_v7 = vmul.f32 0.5, %v4280_v30 }
0x5008   :  { %v3386_v22 = vadd.f32 0.5, %v3385_v7 }
0x500a   :  { %v3391_v3 = vmul.f32 %v3389_v31, %v3386_v22 }
0x5076   :  { %v3394_v57 = vpop.permute.xlu1 %3393 }
0x5077   :  { %v3396_v15 = vmul.f32 %v3394_v57, %v3386_v22 }
0x5079   :  { %3398 = vrot.lane.b32.xlu0 %v3396_v15, %s4424_s1 }
0x50eb   :  { %v3399_v0 = vpop.permute.xlu0 %3398 }
0x50ec   :  { %v3401_v62 = vadd.f32 %v3399_v0, %v3391_v3  ;;  %v4003_v3 = vld [vmem:[%s5455_s7 + $0x18] sm:$0xff]   ;;  %v4004_v0 = vld [vmem:[%s5455_s7 + $0x10] sm:$0xff]  }
0x50ee   :  { %4281 = vtanh.f32 %v3401_v62  ;;  %v3464_v5 = vrot.slane %v3401_v62, 4  ;;  %v4005_v62 = vld [vmem:[%s5455_s7 + $0x8] sm:$0xff]  }
0x50fb   :  { %v4282_v58 = vpop.eup %4281 }
0x50fc   :  { %3404 = vrot.lane.b32.xlu1 %v4282_v58, %s4424_s1 }
0x516e   :  { %v3405_v59 = vpop.permute.xlu1 %3404 }
0x516f   :  { %v3407_v49 = vmul.f32 %v3405_v59, %v3386_v22  ;;  %v4006_v59 = vld [vmem:[%s5455_s7] sm:$0xff]  }
0x5171   :  { %v3409_v50 = vpack.c.bf16 %v3407_v49, %v3407_v49 }
0x5173   :  { %v3411_v2 = vrot.slane %v3409_v50, 2 }
0x5175   :  { %3412 = vrot.lane.b32.xlu0 %v3411_v2, %s4426_s27 }
0x51e7   :  { %v3413_v18 = vpop.permute.xlu0 %3412 }
0x51e8   :  { %3935 = vmatmul.mubr.msk.bf16.vlgmr.msra.gmra.mxu0 %vm389_vm2, %v3413_v18 }
0x51e9   :  { %3954 = vmatprep.mubr.msk.bf16.mxu0 %vm4428_vm7, %v4427_v52  ;;  %3947 = vmatpush3.bf16.msra.mxu0 %v4003_v3 }
0x51ea   :  { %3948 = vmatprep.subr.bf16.mxu0 %v4427_v52 }
0x51ed   :  { %3949 = vmatpush3.bf16.msra.mxu0 %v4004_v0 }
0x51ee   :  { %3950 = vmatprep.subr.bf16.mxu0 %v4427_v52 }
0x51f1   :  { %3951 = vmatpush3.bf16.msra.mxu0 %v4005_v62 }
0x51f2   :  { %3952 = vmatprep.subr.bf16.mxu0 %v4427_v52 }
0x51f5   :  { %3953 = vmatpush3.bf16.msra.mxu0 %v4006_v59 }
0x52a8   :  { %v3451_v17 = vpop.f32.mrf.mxu0 }
0x52a9   :  { %v3457_v20 = vadd.f32 %v3451_v17, %v3408_v23 }
0x52aa   :  { %v3936_v28 = vpop.f32.mrf.mxu0 }
0x52ab   :  { %4283 = vtanh.f32 %v3457_v20  ;;  %v3458_v60 = vmul.f32 0.5, %v3457_v20  ;;  %v3759_v28 = vld [vmem:[#allocation10] ss:$0 sm:$0xff] }
0x52ac   :  { %v3454_v8 = vpop.f32.mrf.mxu0 }
0x52ad   :  { %4285 = vtanh.f32 %v3458_v60 }
0x52ae   :  { %v3937_v38 = vpop.f32.mrf.mxu0 }
0x52b8   :  { %v4284_v40 = vpop.eup %4283 }
0x52b9   :  { %3468 = vrot.lane.b32.xlu1 %v4284_v40, %s4424_s1 }
0x52ba   :  { %v4286_v29 = vpop.eup %4285 }
0x52bb   :  { %v3460_v25 = vmul.f32 0.5, %v4286_v29 }
0x52bd   :  { %v3461_v42 = vadd.f32 0.5, %v3460_v25 }
0x52bf   :  { %v3466_v13 = vmul.f32 %v3464_v5, %v3461_v42 }
0x532b   :  { %v3469_v10 = vpop.permute.xlu1 %3468 }
0x532c   :  { %v3471_v11 = vmul.f32 %v3469_v10, %v3461_v42 }
0x532e   :  { %3473 = vrot.lane.b32.xlu0 %v3471_v11, %s4424_s1 }
0x53a0   :  { %v3474_v46 = vpop.permute.xlu0 %3473 }
0x53a1   :  { %v3476_v51 = vadd.f32 %v3474_v46, %v3466_v13 }
0x53a3   :  { %4287 = vtanh.f32 %v3476_v51  ;;  %v3541_v22 = vrot.slane %v3476_v51, 4 }
0x53a4   :  { %4289 = vtanh.f32 %v3560_v27 }
0x53a5   :  { %4291 = vtanh.f32 %v3561_v37 }
0x53b0   :  { %v4288_v26 = vpop.eup %4287 }
0x53b1   :  { %3479 = vrot.lane.b32.xlu1 %v4288_v26, %s4424_s1  ;;  %v4290_v36 = vpop.eup %4289 }
0x53b2   :  { %v4292_v32 = vpop.eup %4291 }
0x53b3   :  { %v3563_v34 = vmul.f32 0.5, %v4292_v32 }
0x53b5   :  { %v3564_v47 = vadd.f32 0.5, %v3563_v34 }
0x53b7   :  { %v3566_v53 = vmul.f32 0.0, %v3564_v47 }
0x5423   :  { %v3480_v4 = vpop.permute.xlu1 %3479 }
0x5424   :  { %v3482_v39 = vmul.f32 %v3480_v4, %v3461_v42 }
0x5426   :  { %v3484_v33 = vpack.c.bf16 %v3482_v39, %v3482_v39 }
0x5428   :  { %3486 = vrot.lane.b32.xlu0 %v3484_v33, %s4426_s27 }
0x542c   :  { %3568 = vrot.lane.b32.xlu0 %v4290_v36, %s4424_s1 }
0x549a   :  { %v3487_v45 = vpop.permute.xlu0 %3486 }
0x549b   :  { %3943 = vmatmul.mubr.msk.bf16.vlgmr.msra.gmra.mxu1 %vm389_vm2, %v3487_v45 }
0x549e   :  { %v3569_v14 = vpop.permute.xlu0 %3568 }
0x549f   :  { %v3571_v54 = vmul.f32 %v3569_v14, %v3564_v47 }
0x54a1   :  { %3573 = vrot.lane.b32.xlu0 %v3571_v54, %s4424_s1 }
0x5513   :  { %v3574_v56 = vpop.permute.xlu0 %3573 }
0x5514   :  { %v3576_v41 = vadd.f32 %v3574_v56, %v3566_v53 }
0x5516   :  { %4293 = vtanh.f32 %v3576_v41 }
0x5523   :  { %v4294_v1 = vpop.eup %4293 }
0x5524   :  { %3579 = vrot.lane.b32.xlu0 %v4294_v1, %s4424_s1 }
0x555b   :  { %v3525_v9 = vpop.f32.mrf.mxu1 }
0x555c   :  { %v3532_v12 = vrot.slane %v3525_v9, 4 }
0x555d   :  { %v3944_v44 = vpop.f32.mrf.mxu1 }
0x555e   :  { %v3534_v63 = vadd.f32 %v3532_v12, %v3483_v35 }
0x555f   :  { %v3528_v48 = vpop.f32.mrf.mxu1 }
0x5560   :  { %4295 = vtanh.f32 %v3534_v63  ;;  %v3535_v61 = vmul.f32 0.5, %v3534_v63 }
0x5561   :  { %v3945_v24 = vpop.f32.mrf.mxu1 }
0x5562   :  { %4297 = vtanh.f32 %v3535_v61 }
0x556d   :  { %v4296_v6 = vpop.eup %4295 }
0x556e   :  { %3545 = vrot.lane.b32.xlu1 %v4296_v6, %s4424_s1 }
0x556f   :  { %v4298_v43 = vpop.eup %4297 }
0x5570   :  { %v3537_v55 = vmul.f32 0.5, %v4298_v43 }
0x5572   :  { %v3538_v19 = vadd.f32 0.5, %v3537_v55 }
0x5574   :  { %v3543_v57 = vmul.f32 %v3541_v22, %v3538_v19 }
0x5596   :  { %v3580_v21 = vpop.permute.xlu0 %3579 }
0x5597   :  { %v3582_v16 = vmul.f32 %v3580_v21, %v3564_v47 }
0x5599   :  { %3588 = vrot.lane.b32.xlu0 %v3582_v16, %s4425_s26 }
0x55e0   :  { %v3546_v30 = vpop.permute.xlu1 %3545 }
0x55e1   :  { %v3548_v7 = vmul.f32 %v3546_v30, %v3538_v19 }
0x55e3   :  { %3550 = vrot.lane.b32.xlu1 %v3548_v7, %s4424_s1 }
0x560b   :  { %v3589_v2 = vpop.permute.xlu0 %3588 }
0x5655   :  { %v3551_v15 = vpop.permute.xlu1 %3550 }
0x5656   :  { %v3553_v31 = vadd.f32 %v3551_v15, %v3543_v57 }
0x5658   :  { %4299 = vtanh.f32 %v3553_v31 }
0x5665   :  { %v4300_v58 = vpop.eup %4299 }
0x5666   :  { %3556 = vrot.lane.b32.xlu1 %v4300_v58, %s4424_s1  ;;  %s4429_s1 = smov [#allocation12]  }
0x5667   :  { %s3685_s25 = sshll.u32 %s4429_s1, 4  ;;  %s3686_s25 = int_to_ptr.vmem [resolvable:$true] %s3685_s25 }
0x5668   :  { %s4391_s7 = scalar_lea.vmem %s3686_s25, 64  ;;  %p4396_p7 = scmp.lt.s32.totalorder %s3686_s25, %s3686_s25 }
0x5669   :  { %p4392_p6 = scmp.ne.s32.totalorder %s3686_s25, %s4391_s7  ;;  %p4397_p8 = scmp.lt.s32.totalorder %s4391_s7, %s4391_s7 }
0x566b   :  { %p4398_p9 = por %p4397_p8, %p4396_p7 }
0x566d   :  { %p4399_p10 = pnand %p4398_p9, %p4392_p6 }
0x56d8   :  { %v3557_v49 = vpop.permute.xlu1 %3556 }
0x56d9   :  { %v3559_v50 = vmul.f32 %v3557_v49, %v3538_v19 }
0x56db   :  { %3584 = vrot.lane.b32.xlu1 %v3559_v50, %s4426_s27 }
0x574d   :  { %v3585_v18 = vpop.permute.xlu1 %3584 }
0x574e   :  { %v3591_v23 = vsel %vm389_vm2, %v3585_v18, %v3589_v2 }
0x574f   :  { %v3592_v17 = vpack.c.bf16 %v3591_v23, %v3591_v23 }
0x5751   :  { %v3609_v20 = vrot.slane %v3592_v17, 2 }
0x5753   :  { %3955 = vmatmul.mubr.msk.bf16.vlgmr.msra.gmra.mxu0 %vm284_vm4, %v3609_v20 }
0x5813   :  { %v3671_v52 = vpop.f32.mrf.mxu0 }
0x5814   :  { %v3672_v8 = vadd.f32 %v3759_v28, %v3671_v52 }
0x5815   :  { %v3956_v38 = vpop.f32.mrf.mxu0 }
0x5816   :  { %3678 = vst.msk [vmem:[#allocation12] sm:$0xf] %vm3677_vm9, %v3672_v8 }
0x5817   :  { %v3674_v40 = vpop.f32.mrf.mxu0 }
0x5818   :  { %4402 = shalt.err (!%p4399_p10)
}
0x5819   :  { %3688 = dma.vmem_to_hbm [thread:$0]  %s3686_s25, 64, %s5457_s9, [#allocation6]   ;;  %v3957_v60 = vpop.f32.mrf.mxu0 }
0x581a   :  { %4417 = dma.done.wait [#allocation6], 64  }
0x581b   :  { %4418 = vsyncadd [#allocation6], 4294967232 }
0x581c   :  { %3692 = vsyncpa [#allocation5], 1 }
0x581d   :  { %3693 = vsyncpa [#allocation8], 1 }
0x581e   :  { %3694 = vsyncpa [#allocation11], 1 }
0x581f   :  { %3695 = vsyncpa [#allocation6], 1 }

</bundles_post_ra>
